<compile_context>
chip_gen: v7x
topology: tpu7x:2x2x1
jax: 0.10.0
libtpu: 0.0.40
codegen_flags: <defaults>
</compile_context>

<pallas_src>
import jax
import jax.numpy as jnp
from jax import lax
from jax.experimental import pallas as pl
from jax.experimental.pallas import tpu as pltpu

# ---------------- config (small, consistent with a tiny BERT) ----------------
VOCAB = 100
MAX_POS = 64
TYPE_VOCAB = 2
HIDDEN = 32
HEADS = 2
HEAD_DIM = HIDDEN // HEADS
FFN = 64
LAYERS = 2
BATCH = 2
SEQ = 8
GROUPS = 2                 # {skill, sentence}
MG = BATCH * SEQ           # activation rows per group
LN_EPS = 1e-12             # BERT LayerNorm eps
ATTN_SCALE = 1.0 / (HEAD_DIM ** 0.5)


# ------------------------------ fused Pallas kernel ---------------------------
def _encoder_kernel(ids_ref, mask_ref,
                    tok_emb_ref, pos_emb_ref, type_emb_ref, emb_g_ref, emb_b_ref,
                    wq_ref, bq_ref, wk_ref, bk_ref, wv_ref, bv_ref,
                    wo_ref, bo_ref, ln1g_ref, ln1b_ref,
                    w1_ref, b1_ref, w2_ref, b2_ref, ln2g_ref, ln2b_ref,
                    o_ref):
    """Full BERT encoder stack for one group; emits only the [CLS] embeddings."""
    f32 = jnp.float32
    bf16 = jnp.bfloat16

    def ln(v, g, b):                      # f32 LayerNorm (VPU/EUP path stays f32)
        mu = jnp.mean(v, axis=-1, keepdims=True)
        var = jnp.mean((v - mu) ** 2, axis=-1, keepdims=True)
        return (v - mu) * lax.rsqrt(var + LN_EPS) * g + b

    def mm(a, w):                         # bf16 MXU operands, f32 accumulate
        return jnp.dot(a.astype(bf16), w.astype(bf16), preferred_element_type=f32)

    def mm_nt(a, b):                      # contract last dims -> no explicit transpose
        return lax.dot_general(a.astype(bf16), b.astype(bf16),
                               dimension_numbers=(((1,), (1,)), ((), ())),
                               preferred_element_type=f32)

    # ---- fused embedding lookup: one-hot bf16 MXU matmul instead of an XLA gather
    ids = ids_ref[...]                                            # (MG, 1) int32
    iota = lax.broadcasted_iota(jnp.int32, (MG, VOCAB), 1)
    onehot = jnp.where(ids == iota, 1.0, 0.0).astype(bf16)        # (MG, VOCAB)
    tok = jnp.dot(onehot, tok_emb_ref[...], preferred_element_type=f32)   # (MG, HIDDEN)
    pos_type = pos_emb_ref[0:SEQ, :] + type_emb_ref[0:1, :]       # (SEQ, HIDDEN), type 0
    x = ln(tok + jnp.concatenate([pos_type] * BATCH, axis=0),
           emb_g_ref[...], emb_b_ref[...])

    # additive attention-mask bias, built in-kernel from the int mask
    bias = (1.0 - mask_ref[0].astype(f32)) * -1e9                 # (BATCH, SEQ)

    for l in range(LAYERS):               # tiny layer count -> static unroll
        # per-batch context accumulators; Wo folded into the per-head loop
        ctx = [jnp.zeros((SEQ, HIDDEN), f32) for _ in range(BATCH)]
        for h in range(HEADS):
            qh = mm(x, wq_ref[l, h]) + bq_ref[l, h]               # (MG, HEAD_DIM)
            kh = mm(x, wk_ref[l, h]) + bk_ref[l, h]
            vh = mm(x, wv_ref[l, h]) + bv_ref[l, h]
            for b in range(BATCH):
                rows = slice(b * SEQ, (b + 1) * SEQ)
                s = mm_nt(qh[rows], kh[rows]) * ATTN_SCALE + bias[b:b + 1, :]
                s = s - jnp.max(s, axis=-1, keepdims=True)        # softmax stays f32
                p = jnp.exp(s)
                p = p * pl.reciprocal(jnp.sum(p, axis=-1, keepdims=True), approx=True)
                # fold output projection: (p @ V_h) @ Wo_h accumulated per batch
                ctx[b] = ctx[b] + mm(mm(p, vh[rows]), wo_ref[l, h])
        attn = jnp.concatenate(ctx, axis=0) + bo_ref[l]           # (MG, HIDDEN)
        x = ln(x + attn, ln1g_ref[l], ln1b_ref[l])

        hid = mm(x, w1_ref[l]) + b1_ref[l]
        # TODO(synk): HF BERT uses exact erf-GELU; tanh approximation used here.
        hid = jax.nn.gelu(hid, approximate=True)
        hid = mm(hid, w2_ref[l]) + b2_ref[l]
        x = ln(x + hid, ln2g_ref[l], ln2b_ref[l])

    # only the [CLS] rows are used downstream -> write just those (8x less HBM)
    cls = jnp.concatenate([x[b * SEQ:b * SEQ + 1, :] for b in range(BATCH)], axis=0)
    o_ref[0, :, :] = cls.astype(o_ref.dtype)


def _full(shape):
    """Whole-array block, constant block index (loaded once, resident in VMEM)."""
    zeros = (0,) * len(shape)
    return pl.BlockSpec(shape, lambda *_: zeros)


def encode_fused(params, ids, masks):
    """ids/masks: (GROUPS*BATCH, SEQ) int32 -> (GROUPS, BATCH, HIDDEN) [CLS] embeddings."""
    gb, s = ids.shape
    assert gb == GROUPS * BATCH and s == SEQ
    ids_col = ids.reshape(GROUPS * MG, 1).astype(jnp.int32)
    masks_g = masks.reshape(GROUPS, BATCH, SEQ).astype(jnp.int32)

    cls = pl.pallas_call(
        _encoder_kernel,
        out_shape=jax.ShapeDtypeStruct((GROUPS, BATCH, HIDDEN), jnp.float32),
        grid=(GROUPS,),
        in_specs=[
            pl.BlockSpec((MG, 1), lambda g: (g, 0)),               # token ids
            pl.BlockSpec((1, BATCH, SEQ), lambda g: (g, 0, 0)),    # attention mask
            _full((VOCAB, HIDDEN)),                                # tok_emb (bf16)
            _full((MAX_POS, HIDDEN)),                              # pos_emb
            _full((TYPE_VOCAB, HIDDEN)),                           # type_emb
            _full((1, HIDDEN)), _full((1, HIDDEN)),                # emb LN gamma/beta
            _full((LAYERS, HEADS, HIDDEN, HEAD_DIM)),              # Wq (bf16)
            _full((LAYERS, HEADS, 1, HEAD_DIM)),                   # bq
            _full((LAYERS, HEADS, HIDDEN, HEAD_DIM)),              # Wk (bf16)
            _full((LAYERS, HEADS, 1, HEAD_DIM)),                   # bk
            _full((LAYERS, HEADS, HIDDEN, HEAD_DIM)),              # Wv (bf16)
            _full((LAYERS, HEADS, 1, HEAD_DIM)),                   # bv
            _full((LAYERS, HEADS, HEAD_DIM, HIDDEN)),              # Wo (bf16, head-major)
            _full((LAYERS, 1, HIDDEN)),                            # bo
            _full((LAYERS, 1, HIDDEN)), _full((LAYERS, 1, HIDDEN)),# ln1 gamma/beta
            _full((LAYERS, HIDDEN, FFN)), _full((LAYERS, 1, FFN)), # W1 (bf16), b1
            _full((LAYERS, FFN, HIDDEN)), _full((LAYERS, 1, HIDDEN)),  # W2 (bf16), b2
            _full((LAYERS, 1, HIDDEN)), _full((LAYERS, 1, HIDDEN)),# ln2 gamma/beta
        ],
        out_specs=pl.BlockSpec((1, BATCH, HIDDEN), lambda g: (g, 0, 0)),
        compiler_params=pltpu.CompilerParams(
            dimension_semantics=("parallel",)),                    # v7x: 2-TC sharding
    )(ids_col, masks_g,
      params["tok_emb"], params["pos_emb"], params["type_emb"],
      params["emb_ln_g"], params["emb_ln_b"],
      params["Wq"], params["bq"], params["Wk"], params["bk"], params["Wv"], params["bv"],
      params["Wo"], params["bo"], params["ln1_g"], params["ln1_b"],
      params["W1"], params["b1"], params["W2"], params["b2"],
      params["ln2_g"], params["ln2_b"])
    return cls                                                     # (GROUPS, BATCH, HIDDEN)


# ------------------------------ model (init + glue) ---------------------------
def init_params(key):
    ks = jax.random.split(key, 10)

    def nrm(k, shape, dtype=jnp.float32):
        return (jax.random.normal(k, shape, jnp.float32) * 0.02).astype(dtype)

    return {
        "tok_emb": nrm(ks[0], (VOCAB, HIDDEN), jnp.bfloat16),
        "pos_emb": nrm(ks[1], (MAX_POS, HIDDEN)),
        "type_emb": nrm(ks[2], (TYPE_VOCAB, HIDDEN)),
        "emb_ln_g": jnp.ones((1, HIDDEN), jnp.float32),
        "emb_ln_b": jnp.zeros((1, HIDDEN), jnp.float32),
        # per-layer, per-head weights stacked on leading axes; matmul weights in bf16
        "Wq": nrm(ks[3], (LAYERS, HEADS, HIDDEN, HEAD_DIM), jnp.bfloat16),
        "bq": jnp.zeros((LAYERS, HEADS, 1, HEAD_DIM), jnp.float32),
        "Wk": nrm(ks[4], (LAYERS, HEADS, HIDDEN, HEAD_DIM), jnp.bfloat16),
        "bk": jnp.zeros((LAYERS, HEADS, 1, HEAD_DIM), jnp.float32),
        "Wv": nrm(ks[5], (LAYERS, HEADS, HIDDEN, HEAD_DIM), jnp.bfloat16),
        "bv": jnp.zeros((LAYERS, HEADS, 1, HEAD_DIM), jnp.float32),
        "Wo": nrm(ks[6], (LAYERS, HEADS, HEAD_DIM, HIDDEN), jnp.bfloat16),
        "bo": jnp.zeros((LAYERS, 1, HIDDEN), jnp.float32),
        "ln1_g": jnp.ones((LAYERS, 1, HIDDEN), jnp.float32),
        "ln1_b": jnp.zeros((LAYERS, 1, HIDDEN), jnp.float32),
        "W1": nrm(ks[7], (LAYERS, HIDDEN, FFN), jnp.bfloat16),
        "b1": jnp.zeros((LAYERS, 1, FFN), jnp.float32),
        "W2": nrm(ks[8], (LAYERS, FFN, HIDDEN), jnp.bfloat16),
        "b2": jnp.zeros((LAYERS, 1, HIDDEN), jnp.float32),
        "ln2_g": jnp.ones((LAYERS, 1, HIDDEN), jnp.float32),
        "ln2_b": jnp.zeros((LAYERS, 1, HIDDEN), jnp.float32),
    }


def bi_encoder_forward(params, skill_ids, skill_mask, sentence_ids, sentence_mask):
    # TODO(synk): BertTokenizer (string -> ids) has no Pallas/JAX equivalent;
    #             token ids + attention masks are taken as inputs instead.
    ids = jnp.concatenate([skill_ids, sentence_ids], axis=0)        # (GROUPS*BATCH, SEQ)
    masks = jnp.concatenate([skill_mask, sentence_mask], axis=0)
    cls = encode_fused(params, ids, masks)                          # (GROUPS, BATCH, HIDDEN)
    return cls[0], cls[1]                                           # skill, sentence


# ------------------------------------ main ------------------------------------
if __name__ == "__main__":
    key = jax.random.PRNGKey(0)
    kp, k1, k2 = jax.random.split(key, 3)
    params = init_params(kp)

    skill_ids = jax.random.randint(k1, (BATCH, SEQ), 0, VOCAB, dtype=jnp.int32)
    sentence_ids = jax.random.randint(k2, (BATCH, SEQ), 0, VOCAB, dtype=jnp.int32)
    # simulate padding on the second sequence of each batch (last 2 tokens padded)
    skill_mask = jnp.ones((BATCH, SEQ), jnp.int32).at[1, SEQ - 2:].set(0)
    sentence_mask = jnp.ones((BATCH, SEQ), jnp.int32).at[1, SEQ - 2:].set(0)

    fwd = jax.jit(bi_encoder_forward)
    skill_emb, sent_emb = fwd(params, skill_ids, skill_mask, sentence_ids, sentence_mask)
    jax.block_until_ready((skill_emb, sent_emb))

    assert skill_emb.shape == (BATCH, HIDDEN) and sent_emb.shape == (BATCH, HIDDEN)
    assert skill_emb.dtype == jnp.float32 and sent_emb.dtype == jnp.float32
    assert bool(jnp.all(jnp.isfinite(skill_emb))) and bool(jnp.all(jnp.isfinite(sent_emb)))
    print("KERNEL_OK")
</pallas_src>

<mosaic_0001>
module attributes {stable_mosaic.version = 11 : i64} {
  func.func @_encoder_kernel(%arg0: i32, %arg1: memref<16x1xi32, #tpu.memory_space<vmem>>, %arg2: memref<1x2x8xi32, #tpu.memory_space<vmem>>, %arg3: memref<100x32xbf16, #tpu.memory_space<vmem>>, %arg4: memref<64x32xf32, #tpu.memory_space<vmem>>, %arg5: memref<2x32xf32, #tpu.memory_space<vmem>>, %arg6: memref<1x32xf32, #tpu.memory_space<vmem>>, %arg7: memref<1x32xf32, #tpu.memory_space<vmem>>, %arg8: memref<2x2x32x16xbf16, #tpu.memory_space<vmem>>, %arg9: memref<2x2x1x16xf32, #tpu.memory_space<vmem>>, %arg10: memref<2x2x32x16xbf16, #tpu.memory_space<vmem>>, %arg11: memref<2x2x1x16xf32, #tpu.memory_space<vmem>>, %arg12: memref<2x2x32x16xbf16, #tpu.memory_space<vmem>>, %arg13: memref<2x2x1x16xf32, #tpu.memory_space<vmem>>, %arg14: memref<2x2x16x32xbf16, #tpu.memory_space<vmem>>, %arg15: memref<2x1x32xf32, #tpu.memory_space<vmem>>, %arg16: memref<2x1x32xf32, #tpu.memory_space<vmem>>, %arg17: memref<2x1x32xf32, #tpu.memory_space<vmem>>, %arg18: memref<2x32x64xbf16, #tpu.memory_space<vmem>>, %arg19: memref<2x1x64xf32, #tpu.memory_space<vmem>>, %arg20: memref<2x64x32xbf16, #tpu.memory_space<vmem>>, %arg21: memref<2x1x32xf32, #tpu.memory_space<vmem>>, %arg22: memref<2x1x32xf32, #tpu.memory_space<vmem>>, %arg23: memref<2x1x32xf32, #tpu.memory_space<vmem>>, %arg24: memref<1x2x32xf32, #tpu.memory_space<vmem>>) attributes {dimension_semantics = [#tpu.dimension_semantics<parallel>], iteration_bounds = array<i64: 2>, scalar_prefetch = 0 : i64, scratch_operands = 0 : i64, tpu.core_type = #tpu.core_type<tc>, window_params = [{transform_indices = @transform_0, window_bounds = array<i64: 16, 1>}, {transform_indices = @transform_1, window_bounds = array<i64: 1, 2, 8>}, {pipeline_mode = #tpu.pipeline_mode<synchronous>, transform_indices = @transform_2, window_bounds = array<i64: 100, 32>}, {pipeline_mode = #tpu.pipeline_mode<synchronous>, transform_indices = @transform_3, window_bounds = array<i64: 64, 32>}, {pipeline_mode = #tpu.pipeline_mode<synchronous>, transform_indices = @transform_4, window_bounds = array<i64: 2, 32>}, {pipeline_mode = #tpu.pipeline_mode<synchronous>, transform_indices = @transform_5, window_bounds = array<i64: 1, 32>}, {pipeline_mode = #tpu.pipeline_mode<synchronous>, transform_indices = @transform_6, window_bounds = array<i64: 1, 32>}, {pipeline_mode = #tpu.pipeline_mode<synchronous>, transform_indices = @transform_7, window_bounds = array<i64: 2, 2, 32, 16>}, {pipeline_mode = #tpu.pipeline_mode<synchronous>, transform_indices = @transform_8, window_bounds = array<i64: 2, 2, 1, 16>}, {pipeline_mode = #tpu.pipeline_mode<synchronous>, transform_indices = @transform_9, window_bounds = array<i64: 2, 2, 32, 16>}, {pipeline_mode = #tpu.pipeline_mode<synchronous>, transform_indices = @transform_10, window_bounds = array<i64: 2, 2, 1, 16>}, {pipeline_mode = #tpu.pipeline_mode<synchronous>, transform_indices = @transform_11, window_bounds = array<i64: 2, 2, 32, 16>}, {pipeline_mode = #tpu.pipeline_mode<synchronous>, transform_indices = @transform_12, window_bounds = array<i64: 2, 2, 1, 16>}, {pipeline_mode = #tpu.pipeline_mode<synchronous>, transform_indices = @transform_13, window_bounds = array<i64: 2, 2, 16, 32>}, {pipeline_mode = #tpu.pipeline_mode<synchronous>, transform_indices = @transform_14, window_bounds = array<i64: 2, 1, 32>}, {pipeline_mode = #tpu.pipeline_mode<synchronous>, transform_indices = @transform_15, window_bounds = array<i64: 2, 1, 32>}, {pipeline_mode = #tpu.pipeline_mode<synchronous>, transform_indices = @transform_16, window_bounds = array<i64: 2, 1, 32>}, {pipeline_mode = #tpu.pipeline_mode<synchronous>, transform_indices = @transform_17, window_bounds = array<i64: 2, 32, 64>}, {pipeline_mode = #tpu.pipeline_mode<synchronous>, transform_indices = @transform_18, window_bounds = array<i64: 2, 1, 64>}, {pipeline_mode = #tpu.pipeline_mode<synchronous>, transform_indices = @transform_19, window_bounds = array<i64: 2, 64, 32>}, {pipeline_mode = #tpu.pipeline_mode<synchronous>, transform_indices = @transform_20, window_bounds = array<i64: 2, 1, 32>}, {pipeline_mode = #tpu.pipeline_mode<synchronous>, transform_indices = @transform_21, window_bounds = array<i64: 2, 1, 32>}, {pipeline_mode = #tpu.pipeline_mode<synchronous>, transform_indices = @transform_22, window_bounds = array<i64: 2, 1, 32>}, {transform_indices = @transform_23, window_bounds = array<i64: 1, 2, 32>}]} {
    %c0 = arith.constant 0 : index
    %c0_0 = arith.constant 0 : index
    %0 = vector.load %arg1[%c0, %c0_0] : memref<16x1xi32, #tpu.memory_space<vmem>>, vector<16x1xi32>
    %1 = tpu.iota {dimensions = array<i32: 1>} : vector<16x100xi32>
    %2 = vector.broadcast %0 : vector<16x1xi32> to vector<16x100xi32>
    %3 = arith.cmpi eq, %2, %1 : vector<16x100xi32>
    %cst = arith.constant 1.000000e+00 : f32
    %cst_1 = arith.constant 0.000000e+00 : f32
    %4 = vector.broadcast %cst : f32 to vector<16x100xf32>
    %5 = vector.broadcast %cst_1 : f32 to vector<16x100xf32>
    %6 = arith.select %3, %4, %5 : vector<16x100xi1>, vector<16x100xf32>
    %7 = arith.truncf %6 : vector<16x100xf32> to vector<16x100xbf16>
    %c0_2 = arith.constant 0 : index
    %c0_3 = arith.constant 0 : index
    %8 = vector.load %arg3[%c0_2, %c0_3] : memref<100x32xbf16, #tpu.memory_space<vmem>>, vector<100x32xbf16>
    %cst_4 = arith.constant dense<0.000000e+00> : vector<16x32xf32>
    %9 = tpu.matmul %7, %8, %cst_4 {dimension_numbers = #tpu.dot_dimension_numbers<[1], [0], [0], [1], [0, 0, 1, 1], [], []>} : vector<16x100xbf16>, vector<100x32xbf16>, vector<16x32xf32> -> vector<16x32xf32>
    %c0_5 = arith.constant 0 : index
    %c0_6 = arith.constant 0 : index
    %10 = vector.load %arg4[%c0_5, %c0_6] : memref<64x32xf32, #tpu.memory_space<vmem>>, vector<8x32xf32>
    %c0_7 = arith.constant 0 : index
    %c0_8 = arith.constant 0 : index
    %11 = vector.load %arg5[%c0_7, %c0_8] : memref<2x32xf32, #tpu.memory_space<vmem>>, vector<1x32xf32>
    %12 = vector.broadcast %11 : vector<1x32xf32> to vector<8x32xf32>
    %13 = arith.addf %10, %12 : vector<8x32xf32>
    %14 = tpu.concatenate %13, %13 in 0 : vector<8x32xf32>, vector<8x32xf32> -> vector<16x32xf32>
    %15 = arith.addf %9, %14 : vector<16x32xf32>
    %c0_9 = arith.constant 0 : index
    %c0_10 = arith.constant 0 : index
    %16 = vector.load %arg6[%c0_9, %c0_10] : memref<1x32xf32, #tpu.memory_space<vmem>>, vector<1x32xf32>
    %c0_11 = arith.constant 0 : index
    %c0_12 = arith.constant 0 : index
    %17 = vector.load %arg7[%c0_11, %c0_12] : memref<1x32xf32, #tpu.memory_space<vmem>>, vector<1x32xf32>
    %cst_13 = arith.constant dense<0.000000e+00> : vector<16xf32>
    %18 = vector.multi_reduction <add>, %15, %cst_13 [1] : vector<16x32xf32> to vector<16xf32>
    %19 = vector.shape_cast %18 : vector<16xf32> to vector<16x1xf32>
    %cst_14 = arith.constant 3.200000e+01 : f32
    %20 = vector.broadcast %cst_14 : f32 to vector<16x1xf32>
    %21 = arith.divf %19, %20 : vector<16x1xf32>
    %22 = vector.broadcast %21 : vector<16x1xf32> to vector<16x32xf32>
    %23 = arith.subf %15, %22 : vector<16x32xf32>
    %24 = arith.mulf %23, %23 : vector<16x32xf32>
    %cst_15 = arith.constant dense<0.000000e+00> : vector<16xf32>
    %25 = vector.multi_reduction <add>, %24, %cst_15 [1] : vector<16x32xf32> to vector<16xf32>
    %26 = vector.shape_cast %25 : vector<16xf32> to vector<16x1xf32>
    %cst_16 = arith.constant 3.200000e+01 : f32
    %27 = vector.broadcast %cst_16 : f32 to vector<16x1xf32>
    %28 = arith.divf %26, %27 : vector<16x1xf32>
    %29 = vector.broadcast %21 : vector<16x1xf32> to vector<16x32xf32>
    %30 = arith.subf %15, %29 : vector<16x32xf32>
    %cst_17 = arith.constant 9.99999996E-13 : f32
    %31 = vector.broadcast %cst_17 : f32 to vector<16x1xf32>
    %32 = arith.addf %28, %31 : vector<16x1xf32>
    %33 = math.rsqrt %32 : vector<16x1xf32>
    %34 = vector.broadcast %33 : vector<16x1xf32> to vector<16x32xf32>
    %35 = arith.mulf %30, %34 : vector<16x32xf32>
    %36 = vector.broadcast %16 : vector<1x32xf32> to vector<16x32xf32>
    %37 = arith.mulf %35, %36 : vector<16x32xf32>
    %38 = vector.broadcast %17 : vector<1x32xf32> to vector<16x32xf32>
    %39 = arith.addf %37, %38 : vector<16x32xf32>
    %c0_18 = arith.constant 0 : index
    %c0_19 = arith.constant 0 : index
    %c0_20 = arith.constant 0 : index
    %40 = vector.load %arg2[%c0_18, %c0_19, %c0_20] : memref<1x2x8xi32, #tpu.memory_space<vmem>>, vector<1x2x8xi32>
    %41 = vector.shape_cast %40 : vector<1x2x8xi32> to vector<2x8xi32>
    %42 = arith.sitofp %41 : vector<2x8xi32> to vector<2x8xf32>
    %cst_21 = arith.constant 1.000000e+00 : f32
    %43 = vector.broadcast %cst_21 : f32 to vector<2x8xf32>
    %44 = arith.subf %43, %42 : vector<2x8xf32>
    %cst_22 = arith.constant -1.000000e+09 : f32
    %45 = vector.broadcast %cst_22 : f32 to vector<2x8xf32>
    %46 = arith.mulf %44, %45 : vector<2x8xf32>
    %cst_23 = arith.constant 0.000000e+00 : f32
    %47 = vector.broadcast %cst_23 : f32 to vector<8x32xf32>
    %cst_24 = arith.constant 0.000000e+00 : f32
    %48 = vector.broadcast %cst_24 : f32 to vector<8x32xf32>
    %c0_25 = arith.constant 0 : index
    %c0_26 = arith.constant 0 : index
    %c0_27 = arith.constant 0 : index
    %c0_28 = arith.constant 0 : index
    %49 = vector.load %arg8[%c0_25, %c0_26, %c0_27, %c0_28] : memref<2x2x32x16xbf16, #tpu.memory_space<vmem>>, vector<1x1x32x16xbf16>
    %50 = vector.shape_cast %49 : vector<1x1x32x16xbf16> to vector<32x16xbf16>
    %51 = arith.truncf %39 : vector<16x32xf32> to vector<16x32xbf16>
    %cst_29 = arith.constant dense<0.000000e+00> : vector<16x16xf32>
    %52 = tpu.matmul %51, %50, %cst_29 {dimension_numbers = #tpu.dot_dimension_numbers<[1], [0], [0], [1], [0, 0, 1, 1], [], []>} : vector<16x32xbf16>, vector<32x16xbf16>, vector<16x16xf32> -> vector<16x16xf32>
    %c0_30 = arith.constant 0 : index
    %c0_31 = arith.constant 0 : index
    %c0_32 = arith.constant 0 : index
    %c0_33 = arith.constant 0 : index
    %53 = vector.load %arg9[%c0_30, %c0_31, %c0_32, %c0_33] : memref<2x2x1x16xf32, #tpu.memory_space<vmem>>, vector<1x1x1x16xf32>
    %54 = vector.shape_cast %53 : vector<1x1x1x16xf32> to vector<1x16xf32>
    %55 = vector.broadcast %54 : vector<1x16xf32> to vector<16x16xf32>
    %56 = arith.addf %52, %55 : vector<16x16xf32>
    %c0_34 = arith.constant 0 : index
    %c0_35 = arith.constant 0 : index
    %c0_36 = arith.constant 0 : index
    %c0_37 = arith.constant 0 : index
    %57 = vector.load %arg10[%c0_34, %c0_35, %c0_36, %c0_37] : memref<2x2x32x16xbf16, #tpu.memory_space<vmem>>, vector<1x1x32x16xbf16>
    %58 = vector.shape_cast %57 : vector<1x1x32x16xbf16> to vector<32x16xbf16>
    %59 = arith.truncf %39 : vector<16x32xf32> to vector<16x32xbf16>
    %cst_38 = arith.constant dense<0.000000e+00> : vector<16x16xf32>
    %60 = tpu.matmul %59, %58, %cst_38 {dimension_numbers = #tpu.dot_dimension_numbers<[1], [0], [0], [1], [0, 0, 1, 1], [], []>} : vector<16x32xbf16>, vector<32x16xbf16>, vector<16x16xf32> -> vector<16x16xf32>
    %c0_39 = arith.constant 0 : index
    %c0_40 = arith.constant 0 : index
    %c0_41 = arith.constant 0 : index
    %c0_42 = arith.constant 0 : index
    %61 = vector.load %arg11[%c0_39, %c0_40, %c0_41, %c0_42] : memref<2x2x1x16xf32, #tpu.memory_space<vmem>>, vector<1x1x1x16xf32>
    %62 = vector.shape_cast %61 : vector<1x1x1x16xf32> to vector<1x16xf32>
    %63 = vector.broadcast %62 : vector<1x16xf32> to vector<16x16xf32>
    %64 = arith.addf %60, %63 : vector<16x16xf32>
    %c0_43 = arith.constant 0 : index
    %c0_44 = arith.constant 0 : index
    %c0_45 = arith.constant 0 : index
    %c0_46 = arith.constant 0 : index
    %65 = vector.load %arg12[%c0_43, %c0_44, %c0_45, %c0_46] : memref<2x2x32x16xbf16, #tpu.memory_space<vmem>>, vector<1x1x32x16xbf16>
    %66 = vector.shape_cast %65 : vector<1x1x32x16xbf16> to vector<32x16xbf16>
    %67 = arith.truncf %39 : vector<16x32xf32> to vector<16x32xbf16>
    %cst_47 = arith.constant dense<0.000000e+00> : vector<16x16xf32>
    %68 = tpu.matmul %67, %66, %cst_47 {dimension_numbers = #tpu.dot_dimension_numbers<[1], [0], [0], [1], [0, 0, 1, 1], [], []>} : vector<16x32xbf16>, vector<32x16xbf16>, vector<16x16xf32> -> vector<16x16xf32>
    %c0_48 = arith.constant 0 : index
    %c0_49 = arith.constant 0 : index
    %c0_50 = arith.constant 0 : index
    %c0_51 = arith.constant 0 : index
    %69 = vector.load %arg13[%c0_48, %c0_49, %c0_50, %c0_51] : memref<2x2x1x16xf32, #tpu.memory_space<vmem>>, vector<1x1x1x16xf32>
    %70 = vector.shape_cast %69 : vector<1x1x1x16xf32> to vector<1x16xf32>
    %71 = vector.broadcast %70 : vector<1x16xf32> to vector<16x16xf32>
    %72 = arith.addf %68, %71 : vector<16x16xf32>
    %73 = vector.extract_strided_slice %56 {offsets = [0, 0], sizes = [8, 16], strides = [1, 1]} : vector<16x16xf32> to vector<8x16xf32>
    %74 = vector.extract_strided_slice %64 {offsets = [0, 0], sizes = [8, 16], strides = [1, 1]} : vector<16x16xf32> to vector<8x16xf32>
    %75 = arith.truncf %73 : vector<8x16xf32> to vector<8x16xbf16>
    %76 = arith.truncf %74 : vector<8x16xf32> to vector<8x16xbf16>
    %cst_52 = arith.constant dense<0.000000e+00> : vector<8x8xf32>
    %77 = tpu.matmul %75, %76, %cst_52 {dimension_numbers = #tpu.dot_dimension_numbers<[1], [1], [0], [0], [0, 0, 1, 0], [], []>} : vector<8x16xbf16>, vector<8x16xbf16>, vector<8x8xf32> -> vector<8x8xf32>
    %cst_53 = arith.constant 2.500000e-01 : f32
    %78 = vector.broadcast %cst_53 : f32 to vector<8x8xf32>
    %79 = arith.mulf %77, %78 : vector<8x8xf32>
    %80 = vector.extract_strided_slice %46 {offsets = [0, 0], sizes = [1, 8], strides = [1, 1]} : vector<2x8xf32> to vector<1x8xf32>
    %81 = vector.broadcast %80 : vector<1x8xf32> to vector<8x8xf32>
    %82 = arith.addf %79, %81 : vector<8x8xf32>
    %cst_54 = arith.constant dense<0xFF800000> : vector<8xf32>
    %83 = vector.multi_reduction <maximumf>, %82, %cst_54 [1] : vector<8x8xf32> to vector<8xf32>
    %84 = vector.shape_cast %83 : vector<8xf32> to vector<8x1xf32>
    %85 = vector.broadcast %84 : vector<8x1xf32> to vector<8x8xf32>
    %86 = arith.subf %82, %85 : vector<8x8xf32>
    %87 = math.exp %86 : vector<8x8xf32>
    %cst_55 = arith.constant dense<0.000000e+00> : vector<8xf32>
    %88 = vector.multi_reduction <add>, %87, %cst_55 [1] : vector<8x8xf32> to vector<8xf32>
    %89 = vector.shape_cast %88 : vector<8xf32> to vector<8x1xf32>
    %90 = tpu.reciprocal %89 {approx = true} : vector<8x1xf32> -> vector<8x1xf32>
    %91 = vector.broadcast %90 : vector<8x1xf32> to vector<8x8xf32>
    %92 = arith.mulf %87, %91 : vector<8x8xf32>
    %93 = vector.extract_strided_slice %72 {offsets = [0, 0], sizes = [8, 16], strides = [1, 1]} : vector<16x16xf32> to vector<8x16xf32>
    %94 = arith.truncf %92 : vector<8x8xf32> to vector<8x8xbf16>
    %95 = arith.truncf %93 : vector<8x16xf32> to vector<8x16xbf16>
    %cst_56 = arith.constant dense<0.000000e+00> : vector<8x16xf32>
    %96 = tpu.matmul %94, %95, %cst_56 {dimension_numbers = #tpu.dot_dimension_numbers<[1], [0], [0], [1], [0, 0, 1, 1], [], []>} : vector<8x8xbf16>, vector<8x16xbf16>, vector<8x16xf32> -> vector<8x16xf32>
    %c0_57 = arith.constant 0 : index
    %c0_58 = arith.constant 0 : index
    %c0_59 = arith.constant 0 : index
    %c0_60 = arith.constant 0 : index
    %97 = vector.load %arg14[%c0_57, %c0_58, %c0_59, %c0_60] : memref<2x2x16x32xbf16, #tpu.memory_space<vmem>>, vector<1x1x16x32xbf16>
    %98 = vector.shape_cast %97 : vector<1x1x16x32xbf16> to vector<16x32xbf16>
    %99 = arith.truncf %96 : vector<8x16xf32> to vector<8x16xbf16>
    %cst_61 = arith.constant dense<0.000000e+00> : vector<8x32xf32>
    %100 = tpu.matmul %99, %98, %cst_61 {dimension_numbers = #tpu.dot_dimension_numbers<[1], [0], [0], [1], [0, 0, 1, 1], [], []>} : vector<8x16xbf16>, vector<16x32xbf16>, vector<8x32xf32> -> vector<8x32xf32>
    %101 = arith.addf %47, %100 : vector<8x32xf32>
    %102 = vector.extract_strided_slice %56 {offsets = [8, 0], sizes = [8, 16], strides = [1, 1]} : vector<16x16xf32> to vector<8x16xf32>
    %103 = vector.extract_strided_slice %64 {offsets = [8, 0], sizes = [8, 16], strides = [1, 1]} : vector<16x16xf32> to vector<8x16xf32>
    %104 = arith.truncf %102 : vector<8x16xf32> to vector<8x16xbf16>
    %105 = arith.truncf %103 : vector<8x16xf32> to vector<8x16xbf16>
    %cst_62 = arith.constant dense<0.000000e+00> : vector<8x8xf32>
    %106 = tpu.matmul %104, %105, %cst_62 {dimension_numbers = #tpu.dot_dimension_numbers<[1], [1], [0], [0], [0, 0, 1, 0], [], []>} : vector<8x16xbf16>, vector<8x16xbf16>, vector<8x8xf32> -> vector<8x8xf32>
    %cst_63 = arith.constant 2.500000e-01 : f32
    %107 = vector.broadcast %cst_63 : f32 to vector<8x8xf32>
    %108 = arith.mulf %106, %107 : vector<8x8xf32>
    %109 = vector.extract_strided_slice %46 {offsets = [1, 0], sizes = [1, 8], strides = [1, 1]} : vector<2x8xf32> to vector<1x8xf32>
    %110 = vector.broadcast %109 : vector<1x8xf32> to vector<8x8xf32>
    %111 = arith.addf %108, %110 : vector<8x8xf32>
    %cst_64 = arith.constant dense<0xFF800000> : vector<8xf32>
    %112 = vector.multi_reduction <maximumf>, %111, %cst_64 [1] : vector<8x8xf32> to vector<8xf32>
    %113 = vector.shape_cast %112 : vector<8xf32> to vector<8x1xf32>
    %114 = vector.broadcast %113 : vector<8x1xf32> to vector<8x8xf32>
    %115 = arith.subf %111, %114 : vector<8x8xf32>
    %116 = math.exp %115 : vector<8x8xf32>
    %cst_65 = arith.constant dense<0.000000e+00> : vector<8xf32>
    %117 = vector.multi_reduction <add>, %116, %cst_65 [1] : vector<8x8xf32> to vector<8xf32>
    %118 = vector.shape_cast %117 : vector<8xf32> to vector<8x1xf32>
    %119 = tpu.reciprocal %118 {approx = true} : vector<8x1xf32> -> vector<8x1xf32>
    %120 = vector.broadcast %119 : vector<8x1xf32> to vector<8x8xf32>
    %121 = arith.mulf %116, %120 : vector<8x8xf32>
    %122 = vector.extract_strided_slice %72 {offsets = [8, 0], sizes = [8, 16], strides = [1, 1]} : vector<16x16xf32> to vector<8x16xf32>
    %123 = arith.truncf %121 : vector<8x8xf32> to vector<8x8xbf16>
    %124 = arith.truncf %122 : vector<8x16xf32> to vector<8x16xbf16>
    %cst_66 = arith.constant dense<0.000000e+00> : vector<8x16xf32>
    %125 = tpu.matmul %123, %124, %cst_66 {dimension_numbers = #tpu.dot_dimension_numbers<[1], [0], [0], [1], [0, 0, 1, 1], [], []>} : vector<8x8xbf16>, vector<8x16xbf16>, vector<8x16xf32> -> vector<8x16xf32>
    %c0_67 = arith.constant 0 : index
    %c0_68 = arith.constant 0 : index
    %c0_69 = arith.constant 0 : index
    %c0_70 = arith.constant 0 : index
    %126 = vector.load %arg14[%c0_67, %c0_68, %c0_69, %c0_70] : memref<2x2x16x32xbf16, #tpu.memory_space<vmem>>, vector<1x1x16x32xbf16>
    %127 = vector.shape_cast %126 : vector<1x1x16x32xbf16> to vector<16x32xbf16>
    %128 = arith.truncf %125 : vector<8x16xf32> to vector<8x16xbf16>
    %cst_71 = arith.constant dense<0.000000e+00> : vector<8x32xf32>
    %129 = tpu.matmul %128, %127, %cst_71 {dimension_numbers = #tpu.dot_dimension_numbers<[1], [0], [0], [1], [0, 0, 1, 1], [], []>} : vector<8x16xbf16>, vector<16x32xbf16>, vector<8x32xf32> -> vector<8x32xf32>
    %130 = arith.addf %48, %129 : vector<8x32xf32>
    %c0_72 = arith.constant 0 : index
    %c1 = arith.constant 1 : index
    %c0_73 = arith.constant 0 : index
    %c0_74 = arith.constant 0 : index
    %131 = vector.load %arg8[%c0_72, %c1, %c0_73, %c0_74] : memref<2x2x32x16xbf16, #tpu.memory_space<vmem>>, vector<1x1x32x16xbf16>
    %132 = vector.shape_cast %131 : vector<1x1x32x16xbf16> to vector<32x16xbf16>
    %133 = arith.truncf %39 : vector<16x32xf32> to vector<16x32xbf16>
    %cst_75 = arith.constant dense<0.000000e+00> : vector<16x16xf32>
    %134 = tpu.matmul %133, %132, %cst_75 {dimension_numbers = #tpu.dot_dimension_numbers<[1], [0], [0], [1], [0, 0, 1, 1], [], []>} : vector<16x32xbf16>, vector<32x16xbf16>, vector<16x16xf32> -> vector<16x16xf32>
    %c0_76 = arith.constant 0 : index
    %c1_77 = arith.constant 1 : index
    %c0_78 = arith.constant 0 : index
    %c0_79 = arith.constant 0 : index
    %135 = vector.load %arg9[%c0_76, %c1_77, %c0_78, %c0_79] : memref<2x2x1x16xf32, #tpu.memory_space<vmem>>, vector<1x1x1x16xf32>
    %136 = vector.shape_cast %135 : vector<1x1x1x16xf32> to vector<1x16xf32>
    %137 = vector.broadcast %136 : vector<1x16xf32> to vector<16x16xf32>
    %138 = arith.addf %134, %137 : vector<16x16xf32>
    %c0_80 = arith.constant 0 : index
    %c1_81 = arith.constant 1 : index
    %c0_82 = arith.constant 0 : index
    %c0_83 = arith.constant 0 : index
    %139 = vector.load %arg10[%c0_80, %c1_81, %c0_82, %c0_83] : memref<2x2x32x16xbf16, #tpu.memory_space<vmem>>, vector<1x1x32x16xbf16>
    %140 = vector.shape_cast %139 : vector<1x1x32x16xbf16> to vector<32x16xbf16>
    %141 = arith.truncf %39 : vector<16x32xf32> to vector<16x32xbf16>
    %cst_84 = arith.constant dense<0.000000e+00> : vector<16x16xf32>
    %142 = tpu.matmul %141, %140, %cst_84 {dimension_numbers = #tpu.dot_dimension_numbers<[1], [0], [0], [1], [0, 0, 1, 1], [], []>} : vector<16x32xbf16>, vector<32x16xbf16>, vector<16x16xf32> -> vector<16x16xf32>
    %c0_85 = arith.constant 0 : index
    %c1_86 = arith.constant 1 : index
    %c0_87 = arith.constant 0 : index
    %c0_88 = arith.constant 0 : index
    %143 = vector.load %arg11[%c0_85, %c1_86, %c0_87, %c0_88] : memref<2x2x1x16xf32, #tpu.memory_space<vmem>>, vector<1x1x1x16xf32>
    %144 = vector.shape_cast %143 : vector<1x1x1x16xf32> to vector<1x16xf32>
    %145 = vector.broadcast %144 : vector<1x16xf32> to vector<16x16xf32>
    %146 = arith.addf %142, %145 : vector<16x16xf32>
    %c0_89 = arith.constant 0 : index
    %c1_90 = arith.constant 1 : index
    %c0_91 = arith.constant 0 : index
    %c0_92 = arith.constant 0 : index
    %147 = vector.load %arg12[%c0_89, %c1_90, %c0_91, %c0_92] : memref<2x2x32x16xbf16, #tpu.memory_space<vmem>>, vector<1x1x32x16xbf16>
    %148 = vector.shape_cast %147 : vector<1x1x32x16xbf16> to vector<32x16xbf16>
    %149 = arith.truncf %39 : vector<16x32xf32> to vector<16x32xbf16>
    %cst_93 = arith.constant dense<0.000000e+00> : vector<16x16xf32>
    %150 = tpu.matmul %149, %148, %cst_93 {dimension_numbers = #tpu.dot_dimension_numbers<[1], [0], [0], [1], [0, 0, 1, 1], [], []>} : vector<16x32xbf16>, vector<32x16xbf16>, vector<16x16xf32> -> vector<16x16xf32>
    %c0_94 = arith.constant 0 : index
    %c1_95 = arith.constant 1 : index
    %c0_96 = arith.constant 0 : index
    %c0_97 = arith.constant 0 : index
    %151 = vector.load %arg13[%c0_94, %c1_95, %c0_96, %c0_97] : memref<2x2x1x16xf32, #tpu.memory_space<vmem>>, vector<1x1x1x16xf32>
    %152 = vector.shape_cast %151 : vector<1x1x1x16xf32> to vector<1x16xf32>
    %153 = vector.broadcast %152 : vector<1x16xf32> to vector<16x16xf32>
    %154 = arith.addf %150, %153 : vector<16x16xf32>
    %155 = vector.extract_strided_slice %138 {offsets = [0, 0], sizes = [8, 16], strides = [1, 1]} : vector<16x16xf32> to vector<8x16xf32>
    %156 = vector.extract_strided_slice %146 {offsets = [0, 0], sizes = [8, 16], strides = [1, 1]} : vector<16x16xf32> to vector<8x16xf32>
    %157 = arith.truncf %155 : vector<8x16xf32> to vector<8x16xbf16>
    %158 = arith.truncf %156 : vector<8x16xf32> to vector<8x16xbf16>
    %cst_98 = arith.constant dense<0.000000e+00> : vector<8x8xf32>
    %159 = tpu.matmul %157, %158, %cst_98 {dimension_numbers = #tpu.dot_dimension_numbers<[1], [1], [0], [0], [0, 0, 1, 0], [], []>} : vector<8x16xbf16>, vector<8x16xbf16>, vector<8x8xf32> -> vector<8x8xf32>
    %cst_99 = arith.constant 2.500000e-01 : f32
    %160 = vector.broadcast %cst_99 : f32 to vector<8x8xf32>
    %161 = arith.mulf %159, %160 : vector<8x8xf32>
    %162 = vector.extract_strided_slice %46 {offsets = [0, 0], sizes = [1, 8], strides = [1, 1]} : vector<2x8xf32> to vector<1x8xf32>
    %163 = vector.broadcast %162 : vector<1x8xf32> to vector<8x8xf32>
    %164 = arith.addf %161, %163 : vector<8x8xf32>
    %cst_100 = arith.constant dense<0xFF800000> : vector<8xf32>
    %165 = vector.multi_reduction <maximumf>, %164, %cst_100 [1] : vector<8x8xf32> to vector<8xf32>
    %166 = vector.shape_cast %165 : vector<8xf32> to vector<8x1xf32>
    %167 = vector.broadcast %166 : vector<8x1xf32> to vector<8x8xf32>
    %168 = arith.subf %164, %167 : vector<8x8xf32>
    %169 = math.exp %168 : vector<8x8xf32>
    %cst_101 = arith.constant dense<0.000000e+00> : vector<8xf32>
    %170 = vector.multi_reduction <add>, %169, %cst_101 [1] : vector<8x8xf32> to vector<8xf32>
    %171 = vector.shape_cast %170 : vector<8xf32> to vector<8x1xf32>
    %172 = tpu.reciprocal %171 {approx = true} : vector<8x1xf32> -> vector<8x1xf32>
    %173 = vector.broadcast %172 : vector<8x1xf32> to vector<8x8xf32>
    %174 = arith.mulf %169, %173 : vector<8x8xf32>
    %175 = vector.extract_strided_slice %154 {offsets = [0, 0], sizes = [8, 16], strides = [1, 1]} : vector<16x16xf32> to vector<8x16xf32>
    %176 = arith.truncf %174 : vector<8x8xf32> to vector<8x8xbf16>
    %177 = arith.truncf %175 : vector<8x16xf32> to vector<8x16xbf16>
    %cst_102 = arith.constant dense<0.000000e+00> : vector<8x16xf32>
    %178 = tpu.matmul %176, %177, %cst_102 {dimension_numbers = #tpu.dot_dimension_numbers<[1], [0], [0], [1], [0, 0, 1, 1], [], []>} : vector<8x8xbf16>, vector<8x16xbf16>, vector<8x16xf32> -> vector<8x16xf32>
    %c0_103 = arith.constant 0 : index
    %c1_104 = arith.constant 1 : index
    %c0_105 = arith.constant 0 : index
    %c0_106 = arith.constant 0 : index
    %179 = vector.load %arg14[%c0_103, %c1_104, %c0_105, %c0_106] : memref<2x2x16x32xbf16, #tpu.memory_space<vmem>>, vector<1x1x16x32xbf16>
    %180 = vector.shape_cast %179 : vector<1x1x16x32xbf16> to vector<16x32xbf16>
    %181 = arith.truncf %178 : vector<8x16xf32> to vector<8x16xbf16>
    %cst_107 = arith.constant dense<0.000000e+00> : vector<8x32xf32>
    %182 = tpu.matmul %181, %180, %cst_107 {dimension_numbers = #tpu.dot_dimension_numbers<[1], [0], [0], [1], [0, 0, 1, 1], [], []>} : vector<8x16xbf16>, vector<16x32xbf16>, vector<8x32xf32> -> vector<8x32xf32>
    %183 = arith.addf %101, %182 : vector<8x32xf32>
    %184 = vector.extract_strided_slice %138 {offsets = [8, 0], sizes = [8, 16], strides = [1, 1]} : vector<16x16xf32> to vector<8x16xf32>
    %185 = vector.extract_strided_slice %146 {offsets = [8, 0], sizes = [8, 16], strides = [1, 1]} : vector<16x16xf32> to vector<8x16xf32>
    %186 = arith.truncf %184 : vector<8x16xf32> to vector<8x16xbf16>
    %187 = arith.truncf %185 : vector<8x16xf32> to vector<8x16xbf16>
    %cst_108 = arith.constant dense<0.000000e+00> : vector<8x8xf32>
    %188 = tpu.matmul %186, %187, %cst_108 {dimension_numbers = #tpu.dot_dimension_numbers<[1], [1], [0], [0], [0, 0, 1, 0], [], []>} : vector<8x16xbf16>, vector<8x16xbf16>, vector<8x8xf32> -> vector<8x8xf32>
    %cst_109 = arith.constant 2.500000e-01 : f32
    %189 = vector.broadcast %cst_109 : f32 to vector<8x8xf32>
    %190 = arith.mulf %188, %189 : vector<8x8xf32>
    %191 = vector.extract_strided_slice %46 {offsets = [1, 0], sizes = [1, 8], strides = [1, 1]} : vector<2x8xf32> to vector<1x8xf32>
    %192 = vector.broadcast %191 : vector<1x8xf32> to vector<8x8xf32>
    %193 = arith.addf %190, %192 : vector<8x8xf32>
    %cst_110 = arith.constant dense<0xFF800000> : vector<8xf32>
    %194 = vector.multi_reduction <maximumf>, %193, %cst_110 [1] : vector<8x8xf32> to vector<8xf32>
    %195 = vector.shape_cast %194 : vector<8xf32> to vector<8x1xf32>
    %196 = vector.broadcast %195 : vector<8x1xf32> to vector<8x8xf32>
    %197 = arith.subf %193, %196 : vector<8x8xf32>
    %198 = math.exp %197 : vector<8x8xf32>
    %cst_111 = arith.constant dense<0.000000e+00> : vector<8xf32>
    %199 = vector.multi_reduction <add>, %198, %cst_111 [1] : vector<8x8xf32> to vector<8xf32>
    %200 = vector.shape_cast %199 : vector<8xf32> to vector<8x1xf32>
    %201 = tpu.reciprocal %200 {approx = true} : vector<8x1xf32> -> vector<8x1xf32>
    %202 = vector.broadcast %201 : vector<8x1xf32> to vector<8x8xf32>
    %203 = arith.mulf %198, %202 : vector<8x8xf32>
    %204 = vector.extract_strided_slice %154 {offsets = [8, 0], sizes = [8, 16], strides = [1, 1]} : vector<16x16xf32> to vector<8x16xf32>
    %205 = arith.truncf %203 : vector<8x8xf32> to vector<8x8xbf16>
    %206 = arith.truncf %204 : vector<8x16xf32> to vector<8x16xbf16>
    %cst_112 = arith.constant dense<0.000000e+00> : vector<8x16xf32>
    %207 = tpu.matmul %205, %206, %cst_112 {dimension_numbers = #tpu.dot_dimension_numbers<[1], [0], [0], [1], [0, 0, 1, 1], [], []>} : vector<8x8xbf16>, vector<8x16xbf16>, vector<8x16xf32> -> vector<8x16xf32>
    %c0_113 = arith.constant 0 : index
    %c1_114 = arith.constant 1 : index
    %c0_115 = arith.constant 0 : index
    %c0_116 = arith.constant 0 : index
    %208 = vector.load %arg14[%c0_113, %c1_114, %c0_115, %c0_116] : memref<2x2x16x32xbf16, #tpu.memory_space<vmem>>, vector<1x1x16x32xbf16>
    %209 = vector.shape_cast %208 : vector<1x1x16x32xbf16> to vector<16x32xbf16>
    %210 = arith.truncf %207 : vector<8x16xf32> to vector<8x16xbf16>
    %cst_117 = arith.constant dense<0.000000e+00> : vector<8x32xf32>
    %211 = tpu.matmul %210, %209, %cst_117 {dimension_numbers = #tpu.dot_dimension_numbers<[1], [0], [0], [1], [0, 0, 1, 1], [], []>} : vector<8x16xbf16>, vector<16x32xbf16>, vector<8x32xf32> -> vector<8x32xf32>
    %212 = arith.addf %130, %211 : vector<8x32xf32>
    %213 = tpu.concatenate %183, %212 in 0 : vector<8x32xf32>, vector<8x32xf32> -> vector<16x32xf32>
    %c0_118 = arith.constant 0 : index
    %c0_119 = arith.constant 0 : index
    %c0_120 = arith.constant 0 : index
    %214 = vector.load %arg15[%c0_118, %c0_119, %c0_120] : memref<2x1x32xf32, #tpu.memory_space<vmem>>, vector<1x1x32xf32>
    %215 = vector.shape_cast %214 : vector<1x1x32xf32> to vector<1x32xf32>
    %216 = vector.broadcast %215 : vector<1x32xf32> to vector<16x32xf32>
    %217 = arith.addf %213, %216 : vector<16x32xf32>
    %218 = arith.addf %39, %217 : vector<16x32xf32>
    %c0_121 = arith.constant 0 : index
    %c0_122 = arith.constant 0 : index
    %c0_123 = arith.constant 0 : index
    %219 = vector.load %arg16[%c0_121, %c0_122, %c0_123] : memref<2x1x32xf32, #tpu.memory_space<vmem>>, vector<1x1x32xf32>
    %220 = vector.shape_cast %219 : vector<1x1x32xf32> to vector<1x32xf32>
    %c0_124 = arith.constant 0 : index
    %c0_125 = arith.constant 0 : index
    %c0_126 = arith.constant 0 : index
    %221 = vector.load %arg17[%c0_124, %c0_125, %c0_126] : memref<2x1x32xf32, #tpu.memory_space<vmem>>, vector<1x1x32xf32>
    %222 = vector.shape_cast %221 : vector<1x1x32xf32> to vector<1x32xf32>
    %cst_127 = arith.constant dense<0.000000e+00> : vector<16xf32>
    %223 = vector.multi_reduction <add>, %218, %cst_127 [1] : vector<16x32xf32> to vector<16xf32>
    %224 = vector.shape_cast %223 : vector<16xf32> to vector<16x1xf32>
    %cst_128 = arith.constant 3.200000e+01 : f32
    %225 = vector.broadcast %cst_128 : f32 to vector<16x1xf32>
    %226 = arith.divf %224, %225 : vector<16x1xf32>
    %227 = vector.broadcast %226 : vector<16x1xf32> to vector<16x32xf32>
    %228 = arith.subf %218, %227 : vector<16x32xf32>
    %229 = arith.mulf %228, %228 : vector<16x32xf32>
    %cst_129 = arith.constant dense<0.000000e+00> : vector<16xf32>
    %230 = vector.multi_reduction <add>, %229, %cst_129 [1] : vector<16x32xf32> to vector<16xf32>
    %231 = vector.shape_cast %230 : vector<16xf32> to vector<16x1xf32>
    %cst_130 = arith.constant 3.200000e+01 : f32
    %232 = vector.broadcast %cst_130 : f32 to vector<16x1xf32>
    %233 = arith.divf %231, %232 : vector<16x1xf32>
    %234 = vector.broadcast %226 : vector<16x1xf32> to vector<16x32xf32>
    %235 = arith.subf %218, %234 : vector<16x32xf32>
    %cst_131 = arith.constant 9.99999996E-13 : f32
    %236 = vector.broadcast %cst_131 : f32 to vector<16x1xf32>
    %237 = arith.addf %233, %236 : vector<16x1xf32>
    %238 = math.rsqrt %237 : vector<16x1xf32>
    %239 = vector.broadcast %238 : vector<16x1xf32> to vector<16x32xf32>
    %240 = arith.mulf %235, %239 : vector<16x32xf32>
    %241 = vector.broadcast %220 : vector<1x32xf32> to vector<16x32xf32>
    %242 = arith.mulf %240, %241 : vector<16x32xf32>
    %243 = vector.broadcast %222 : vector<1x32xf32> to vector<16x32xf32>
    %244 = arith.addf %242, %243 : vector<16x32xf32>
    %c0_132 = arith.constant 0 : index
    %c0_133 = arith.constant 0 : index
    %c0_134 = arith.constant 0 : index
    %245 = vector.load %arg18[%c0_132, %c0_133, %c0_134] : memref<2x32x64xbf16, #tpu.memory_space<vmem>>, vector<1x32x64xbf16>
    %246 = vector.shape_cast %245 : vector<1x32x64xbf16> to vector<32x64xbf16>
    %247 = arith.truncf %244 : vector<16x32xf32> to vector<16x32xbf16>
    %cst_135 = arith.constant dense<0.000000e+00> : vector<16x64xf32>
    %248 = tpu.matmul %247, %246, %cst_135 {dimension_numbers = #tpu.dot_dimension_numbers<[1], [0], [0], [1], [0, 0, 1, 1], [], []>} : vector<16x32xbf16>, vector<32x64xbf16>, vector<16x64xf32> -> vector<16x64xf32>
    %c0_136 = arith.constant 0 : index
    %c0_137 = arith.constant 0 : index
    %c0_138 = arith.constant 0 : index
    %249 = vector.load %arg19[%c0_136, %c0_137, %c0_138] : memref<2x1x64xf32, #tpu.memory_space<vmem>>, vector<1x1x64xf32>
    %250 = vector.shape_cast %249 : vector<1x1x64xf32> to vector<1x64xf32>
    %251 = vector.broadcast %250 : vector<1x64xf32> to vector<16x64xf32>
    %252 = arith.addf %248, %251 : vector<16x64xf32>
    %253 = arith.mulf %252, %252 : vector<16x64xf32>
    %254 = arith.mulf %252, %253 : vector<16x64xf32>
    %cst_139 = arith.constant 4.471500e-02 : f32
    %255 = vector.broadcast %cst_139 : f32 to vector<16x64xf32>
    %256 = arith.mulf %255, %254 : vector<16x64xf32>
    %257 = arith.addf %252, %256 : vector<16x64xf32>
    %cst_140 = arith.constant 0.797884583 : f32
    %258 = vector.broadcast %cst_140 : f32 to vector<16x64xf32>
    %259 = arith.mulf %258, %257 : vector<16x64xf32>
    %260 = math.tanh %259 : vector<16x64xf32>
    %cst_141 = arith.constant 1.000000e+00 : f32
    %261 = vector.broadcast %cst_141 : f32 to vector<16x64xf32>
    %262 = arith.addf %261, %260 : vector<16x64xf32>
    %cst_142 = arith.constant 5.000000e-01 : f32
    %263 = vector.broadcast %cst_142 : f32 to vector<16x64xf32>
    %264 = arith.mulf %263, %262 : vector<16x64xf32>
    %265 = arith.mulf %252, %264 : vector<16x64xf32>
    %c0_143 = arith.constant 0 : index
    %c0_144 = arith.constant 0 : index
    %c0_145 = arith.constant 0 : index
    %266 = vector.load %arg20[%c0_143, %c0_144, %c0_145] : memref<2x64x32xbf16, #tpu.memory_space<vmem>>, vector<1x64x32xbf16>
    %267 = vector.shape_cast %266 : vector<1x64x32xbf16> to vector<64x32xbf16>
    %268 = arith.truncf %265 : vector<16x64xf32> to vector<16x64xbf16>
    %cst_146 = arith.constant dense<0.000000e+00> : vector<16x32xf32>
    %269 = tpu.matmul %268, %267, %cst_146 {dimension_numbers = #tpu.dot_dimension_numbers<[1], [0], [0], [1], [0, 0, 1, 1], [], []>} : vector<16x64xbf16>, vector<64x32xbf16>, vector<16x32xf32> -> vector<16x32xf32>
    %c0_147 = arith.constant 0 : index
    %c0_148 = arith.constant 0 : index
    %c0_149 = arith.constant 0 : index
    %270 = vector.load %arg21[%c0_147, %c0_148, %c0_149] : memref<2x1x32xf32, #tpu.memory_space<vmem>>, vector<1x1x32xf32>
    %271 = vector.shape_cast %270 : vector<1x1x32xf32> to vector<1x32xf32>
    %272 = vector.broadcast %271 : vector<1x32xf32> to vector<16x32xf32>
    %273 = arith.addf %269, %272 : vector<16x32xf32>
    %274 = arith.addf %244, %273 : vector<16x32xf32>
    %c0_150 = arith.constant 0 : index
    %c0_151 = arith.constant 0 : index
    %c0_152 = arith.constant 0 : index
    %275 = vector.load %arg22[%c0_150, %c0_151, %c0_152] : memref<2x1x32xf32, #tpu.memory_space<vmem>>, vector<1x1x32xf32>
    %276 = vector.shape_cast %275 : vector<1x1x32xf32> to vector<1x32xf32>
    %c0_153 = arith.constant 0 : index
    %c0_154 = arith.constant 0 : index
    %c0_155 = arith.constant 0 : index
    %277 = vector.load %arg23[%c0_153, %c0_154, %c0_155] : memref<2x1x32xf32, #tpu.memory_space<vmem>>, vector<1x1x32xf32>
    %278 = vector.shape_cast %277 : vector<1x1x32xf32> to vector<1x32xf32>
    %cst_156 = arith.constant dense<0.000000e+00> : vector<16xf32>
    %279 = vector.multi_reduction <add>, %274, %cst_156 [1] : vector<16x32xf32> to vector<16xf32>
    %280 = vector.shape_cast %279 : vector<16xf32> to vector<16x1xf32>
    %cst_157 = arith.constant 3.200000e+01 : f32
    %281 = vector.broadcast %cst_157 : f32 to vector<16x1xf32>
    %282 = arith.divf %280, %281 : vector<16x1xf32>
    %283 = vector.broadcast %282 : vector<16x1xf32> to vector<16x32xf32>
    %284 = arith.subf %274, %283 : vector<16x32xf32>
    %285 = arith.mulf %284, %284 : vector<16x32xf32>
    %cst_158 = arith.constant dense<0.000000e+00> : vector<16xf32>
    %286 = vector.multi_reduction <add>, %285, %cst_158 [1] : vector<16x32xf32> to vector<16xf32>
    %287 = vector.shape_cast %286 : vector<16xf32> to vector<16x1xf32>
    %cst_159 = arith.constant 3.200000e+01 : f32
    %288 = vector.broadcast %cst_159 : f32 to vector<16x1xf32>
    %289 = arith.divf %287, %288 : vector<16x1xf32>
    %290 = vector.broadcast %282 : vector<16x1xf32> to vector<16x32xf32>
    %291 = arith.subf %274, %290 : vector<16x32xf32>
    %cst_160 = arith.constant 9.99999996E-13 : f32
    %292 = vector.broadcast %cst_160 : f32 to vector<16x1xf32>
    %293 = arith.addf %289, %292 : vector<16x1xf32>
    %294 = math.rsqrt %293 : vector<16x1xf32>
    %295 = vector.broadcast %294 : vector<16x1xf32> to vector<16x32xf32>
    %296 = arith.mulf %291, %295 : vector<16x32xf32>
    %297 = vector.broadcast %276 : vector<1x32xf32> to vector<16x32xf32>
    %298 = arith.mulf %296, %297 : vector<16x32xf32>
    %299 = vector.broadcast %278 : vector<1x32xf32> to vector<16x32xf32>
    %300 = arith.addf %298, %299 : vector<16x32xf32>
    %cst_161 = arith.constant 0.000000e+00 : f32
    %301 = vector.broadcast %cst_161 : f32 to vector<8x32xf32>
    %cst_162 = arith.constant 0.000000e+00 : f32
    %302 = vector.broadcast %cst_162 : f32 to vector<8x32xf32>
    %c1_163 = arith.constant 1 : index
    %c0_164 = arith.constant 0 : index
    %c0_165 = arith.constant 0 : index
    %c0_166 = arith.constant 0 : index
    %303 = vector.load %arg8[%c1_163, %c0_164, %c0_165, %c0_166] : memref<2x2x32x16xbf16, #tpu.memory_space<vmem>>, vector<1x1x32x16xbf16>
    %304 = vector.shape_cast %303 : vector<1x1x32x16xbf16> to vector<32x16xbf16>
    %305 = arith.truncf %300 : vector<16x32xf32> to vector<16x32xbf16>
    %cst_167 = arith.constant dense<0.000000e+00> : vector<16x16xf32>
    %306 = tpu.matmul %305, %304, %cst_167 {dimension_numbers = #tpu.dot_dimension_numbers<[1], [0], [0], [1], [0, 0, 1, 1], [], []>} : vector<16x32xbf16>, vector<32x16xbf16>, vector<16x16xf32> -> vector<16x16xf32>
    %c1_168 = arith.constant 1 : index
    %c0_169 = arith.constant 0 : index
    %c0_170 = arith.constant 0 : index
    %c0_171 = arith.constant 0 : index
    %307 = vector.load %arg9[%c1_168, %c0_169, %c0_170, %c0_171] : memref<2x2x1x16xf32, #tpu.memory_space<vmem>>, vector<1x1x1x16xf32>
    %308 = vector.shape_cast %307 : vector<1x1x1x16xf32> to vector<1x16xf32>
    %309 = vector.broadcast %308 : vector<1x16xf32> to vector<16x16xf32>
    %310 = arith.addf %306, %309 : vector<16x16xf32>
    %c1_172 = arith.constant 1 : index
    %c0_173 = arith.constant 0 : index
    %c0_174 = arith.constant 0 : index
    %c0_175 = arith.constant 0 : index
    %311 = vector.load %arg10[%c1_172, %c0_173, %c0_174, %c0_175] : memref<2x2x32x16xbf16, #tpu.memory_space<vmem>>, vector<1x1x32x16xbf16>
    %312 = vector.shape_cast %311 : vector<1x1x32x16xbf16> to vector<32x16xbf16>
    %313 = arith.truncf %300 : vector<16x32xf32> to vector<16x32xbf16>
    %cst_176 = arith.constant dense<0.000000e+00> : vector<16x16xf32>
    %314 = tpu.matmul %313, %312, %cst_176 {dimension_numbers = #tpu.dot_dimension_numbers<[1], [0], [0], [1], [0, 0, 1, 1], [], []>} : vector<16x32xbf16>, vector<32x16xbf16>, vector<16x16xf32> -> vector<16x16xf32>
    %c1_177 = arith.constant 1 : index
    %c0_178 = arith.constant 0 : index
    %c0_179 = arith.constant 0 : index
    %c0_180 = arith.constant 0 : index
    %315 = vector.load %arg11[%c1_177, %c0_178, %c0_179, %c0_180] : memref<2x2x1x16xf32, #tpu.memory_space<vmem>>, vector<1x1x1x16xf32>
    %316 = vector.shape_cast %315 : vector<1x1x1x16xf32> to vector<1x16xf32>
    %317 = vector.broadcast %316 : vector<1x16xf32> to vector<16x16xf32>
    %318 = arith.addf %314, %317 : vector<16x16xf32>
    %c1_181 = arith.constant 1 : index
    %c0_182 = arith.constant 0 : index
    %c0_183 = arith.constant 0 : index
    %c0_184 = arith.constant 0 : index
    %319 = vector.load %arg12[%c1_181, %c0_182, %c0_183, %c0_184] : memref<2x2x32x16xbf16, #tpu.memory_space<vmem>>, vector<1x1x32x16xbf16>
    %320 = vector.shape_cast %319 : vector<1x1x32x16xbf16> to vector<32x16xbf16>
    %321 = arith.truncf %300 : vector<16x32xf32> to vector<16x32xbf16>
    %cst_185 = arith.constant dense<0.000000e+00> : vector<16x16xf32>
    %322 = tpu.matmul %321, %320, %cst_185 {dimension_numbers = #tpu.dot_dimension_numbers<[1], [0], [0], [1], [0, 0, 1, 1], [], []>} : vector<16x32xbf16>, vector<32x16xbf16>, vector<16x16xf32> -> vector<16x16xf32>
    %c1_186 = arith.constant 1 : index
    %c0_187 = arith.constant 0 : index
    %c0_188 = arith.constant 0 : index
    %c0_189 = arith.constant 0 : index
    %323 = vector.load %arg13[%c1_186, %c0_187, %c0_188, %c0_189] : memref<2x2x1x16xf32, #tpu.memory_space<vmem>>, vector<1x1x1x16xf32>
    %324 = vector.shape_cast %323 : vector<1x1x1x16xf32> to vector<1x16xf32>
    %325 = vector.broadcast %324 : vector<1x16xf32> to vector<16x16xf32>
    %326 = arith.addf %322, %325 : vector<16x16xf32>
    %327 = vector.extract_strided_slice %310 {offsets = [0, 0], sizes = [8, 16], strides = [1, 1]} : vector<16x16xf32> to vector<8x16xf32>
    %328 = vector.extract_strided_slice %318 {offsets = [0, 0], sizes = [8, 16], strides = [1, 1]} : vector<16x16xf32> to vector<8x16xf32>
    %329 = arith.truncf %327 : vector<8x16xf32> to vector<8x16xbf16>
    %330 = arith.truncf %328 : vector<8x16xf32> to vector<8x16xbf16>
    %cst_190 = arith.constant dense<0.000000e+00> : vector<8x8xf32>
    %331 = tpu.matmul %329, %330, %cst_190 {dimension_numbers = #tpu.dot_dimension_numbers<[1], [1], [0], [0], [0, 0, 1, 0], [], []>} : vector<8x16xbf16>, vector<8x16xbf16>, vector<8x8xf32> -> vector<8x8xf32>
    %cst_191 = arith.constant 2.500000e-01 : f32
    %332 = vector.broadcast %cst_191 : f32 to vector<8x8xf32>
    %333 = arith.mulf %331, %332 : vector<8x8xf32>
    %334 = vector.extract_strided_slice %46 {offsets = [0, 0], sizes = [1, 8], strides = [1, 1]} : vector<2x8xf32> to vector<1x8xf32>
    %335 = vector.broadcast %334 : vector<1x8xf32> to vector<8x8xf32>
    %336 = arith.addf %333, %335 : vector<8x8xf32>
    %cst_192 = arith.constant dense<0xFF800000> : vector<8xf32>
    %337 = vector.multi_reduction <maximumf>, %336, %cst_192 [1] : vector<8x8xf32> to vector<8xf32>
    %338 = vector.shape_cast %337 : vector<8xf32> to vector<8x1xf32>
    %339 = vector.broadcast %338 : vector<8x1xf32> to vector<8x8xf32>
    %340 = arith.subf %336, %339 : vector<8x8xf32>
    %341 = math.exp %340 : vector<8x8xf32>
    %cst_193 = arith.constant dense<0.000000e+00> : vector<8xf32>
    %342 = vector.multi_reduction <add>, %341, %cst_193 [1] : vector<8x8xf32> to vector<8xf32>
    %343 = vector.shape_cast %342 : vector<8xf32> to vector<8x1xf32>
    %344 = tpu.reciprocal %343 {approx = true} : vector<8x1xf32> -> vector<8x1xf32>
    %345 = vector.broadcast %344 : vector<8x1xf32> to vector<8x8xf32>
    %346 = arith.mulf %341, %345 : vector<8x8xf32>
    %347 = vector.extract_strided_slice %326 {offsets = [0, 0], sizes = [8, 16], strides = [1, 1]} : vector<16x16xf32> to vector<8x16xf32>
    %348 = arith.truncf %346 : vector<8x8xf32> to vector<8x8xbf16>
    %349 = arith.truncf %347 : vector<8x16xf32> to vector<8x16xbf16>
    %cst_194 = arith.constant dense<0.000000e+00> : vector<8x16xf32>
    %350 = tpu.matmul %348, %349, %cst_194 {dimension_numbers = #tpu.dot_dimension_numbers<[1], [0], [0], [1], [0, 0, 1, 1], [], []>} : vector<8x8xbf16>, vector<8x16xbf16>, vector<8x16xf32> -> vector<8x16xf32>
    %c1_195 = arith.constant 1 : index
    %c0_196 = arith.constant 0 : index
    %c0_197 = arith.constant 0 : index
    %c0_198 = arith.constant 0 : index
    %351 = vector.load %arg14[%c1_195, %c0_196, %c0_197, %c0_198] : memref<2x2x16x32xbf16, #tpu.memory_space<vmem>>, vector<1x1x16x32xbf16>
    %352 = vector.shape_cast %351 : vector<1x1x16x32xbf16> to vector<16x32xbf16>
    %353 = arith.truncf %350 : vector<8x16xf32> to vector<8x16xbf16>
    %cst_199 = arith.constant dense<0.000000e+00> : vector<8x32xf32>
    %354 = tpu.matmul %353, %352, %cst_199 {dimension_numbers = #tpu.dot_dimension_numbers<[1], [0], [0], [1], [0, 0, 1, 1], [], []>} : vector<8x16xbf16>, vector<16x32xbf16>, vector<8x32xf32> -> vector<8x32xf32>
    %355 = arith.addf %301, %354 : vector<8x32xf32>
    %356 = vector.extract_strided_slice %310 {offsets = [8, 0], sizes = [8, 16], strides = [1, 1]} : vector<16x16xf32> to vector<8x16xf32>
    %357 = vector.extract_strided_slice %318 {offsets = [8, 0], sizes = [8, 16], strides = [1, 1]} : vector<16x16xf32> to vector<8x16xf32>
    %358 = arith.truncf %356 : vector<8x16xf32> to vector<8x16xbf16>
    %359 = arith.truncf %357 : vector<8x16xf32> to vector<8x16xbf16>
    %cst_200 = arith.constant dense<0.000000e+00> : vector<8x8xf32>
    %360 = tpu.matmul %358, %359, %cst_200 {dimension_numbers = #tpu.dot_dimension_numbers<[1], [1], [0], [0], [0, 0, 1, 0], [], []>} : vector<8x16xbf16>, vector<8x16xbf16>, vector<8x8xf32> -> vector<8x8xf32>
    %cst_201 = arith.constant 2.500000e-01 : f32
    %361 = vector.broadcast %cst_201 : f32 to vector<8x8xf32>
    %362 = arith.mulf %360, %361 : vector<8x8xf32>
    %363 = vector.extract_strided_slice %46 {offsets = [1, 0], sizes = [1, 8], strides = [1, 1]} : vector<2x8xf32> to vector<1x8xf32>
    %364 = vector.broadcast %363 : vector<1x8xf32> to vector<8x8xf32>
    %365 = arith.addf %362, %364 : vector<8x8xf32>
    %cst_202 = arith.constant dense<0xFF800000> : vector<8xf32>
    %366 = vector.multi_reduction <maximumf>, %365, %cst_202 [1] : vector<8x8xf32> to vector<8xf32>
    %367 = vector.shape_cast %366 : vector<8xf32> to vector<8x1xf32>
    %368 = vector.broadcast %367 : vector<8x1xf32> to vector<8x8xf32>
    %369 = arith.subf %365, %368 : vector<8x8xf32>
    %370 = math.exp %369 : vector<8x8xf32>
    %cst_203 = arith.constant dense<0.000000e+00> : vector<8xf32>
    %371 = vector.multi_reduction <add>, %370, %cst_203 [1] : vector<8x8xf32> to vector<8xf32>
    %372 = vector.shape_cast %371 : vector<8xf32> to vector<8x1xf32>
    %373 = tpu.reciprocal %372 {approx = true} : vector<8x1xf32> -> vector<8x1xf32>
    %374 = vector.broadcast %373 : vector<8x1xf32> to vector<8x8xf32>
    %375 = arith.mulf %370, %374 : vector<8x8xf32>
    %376 = vector.extract_strided_slice %326 {offsets = [8, 0], sizes = [8, 16], strides = [1, 1]} : vector<16x16xf32> to vector<8x16xf32>
    %377 = arith.truncf %375 : vector<8x8xf32> to vector<8x8xbf16>
    %378 = arith.truncf %376 : vector<8x16xf32> to vector<8x16xbf16>
    %cst_204 = arith.constant dense<0.000000e+00> : vector<8x16xf32>
    %379 = tpu.matmul %377, %378, %cst_204 {dimension_numbers = #tpu.dot_dimension_numbers<[1], [0], [0], [1], [0, 0, 1, 1], [], []>} : vector<8x8xbf16>, vector<8x16xbf16>, vector<8x16xf32> -> vector<8x16xf32>
    %c1_205 = arith.constant 1 : index
    %c0_206 = arith.constant 0 : index
    %c0_207 = arith.constant 0 : index
    %c0_208 = arith.constant 0 : index
    %380 = vector.load %arg14[%c1_205, %c0_206, %c0_207, %c0_208] : memref<2x2x16x32xbf16, #tpu.memory_space<vmem>>, vector<1x1x16x32xbf16>
    %381 = vector.shape_cast %380 : vector<1x1x16x32xbf16> to vector<16x32xbf16>
    %382 = arith.truncf %379 : vector<8x16xf32> to vector<8x16xbf16>
    %cst_209 = arith.constant dense<0.000000e+00> : vector<8x32xf32>
    %383 = tpu.matmul %382, %381, %cst_209 {dimension_numbers = #tpu.dot_dimension_numbers<[1], [0], [0], [1], [0, 0, 1, 1], [], []>} : vector<8x16xbf16>, vector<16x32xbf16>, vector<8x32xf32> -> vector<8x32xf32>
    %384 = arith.addf %302, %383 : vector<8x32xf32>
    %c1_210 = arith.constant 1 : index
    %c1_211 = arith.constant 1 : index
    %c0_212 = arith.constant 0 : index
    %c0_213 = arith.constant 0 : index
    %385 = vector.load %arg8[%c1_210, %c1_211, %c0_212, %c0_213] : memref<2x2x32x16xbf16, #tpu.memory_space<vmem>>, vector<1x1x32x16xbf16>
    %386 = vector.shape_cast %385 : vector<1x1x32x16xbf16> to vector<32x16xbf16>
    %387 = arith.truncf %300 : vector<16x32xf32> to vector<16x32xbf16>
    %cst_214 = arith.constant dense<0.000000e+00> : vector<16x16xf32>
    %388 = tpu.matmul %387, %386, %cst_214 {dimension_numbers = #tpu.dot_dimension_numbers<[1], [0], [0], [1], [0, 0, 1, 1], [], []>} : vector<16x32xbf16>, vector<32x16xbf16>, vector<16x16xf32> -> vector<16x16xf32>
    %c1_215 = arith.constant 1 : index
    %c1_216 = arith.constant 1 : index
    %c0_217 = arith.constant 0 : index
    %c0_218 = arith.constant 0 : index
    %389 = vector.load %arg9[%c1_215, %c1_216, %c0_217, %c0_218] : memref<2x2x1x16xf32, #tpu.memory_space<vmem>>, vector<1x1x1x16xf32>
    %390 = vector.shape_cast %389 : vector<1x1x1x16xf32> to vector<1x16xf32>
    %391 = vector.broadcast %390 : vector<1x16xf32> to vector<16x16xf32>
    %392 = arith.addf %388, %391 : vector<16x16xf32>
    %c1_219 = arith.constant 1 : index
    %c1_220 = arith.constant 1 : index
    %c0_221 = arith.constant 0 : index
    %c0_222 = arith.constant 0 : index
    %393 = vector.load %arg10[%c1_219, %c1_220, %c0_221, %c0_222] : memref<2x2x32x16xbf16, #tpu.memory_space<vmem>>, vector<1x1x32x16xbf16>
    %394 = vector.shape_cast %393 : vector<1x1x32x16xbf16> to vector<32x16xbf16>
    %395 = arith.truncf %300 : vector<16x32xf32> to vector<16x32xbf16>
    %cst_223 = arith.constant dense<0.000000e+00> : vector<16x16xf32>
    %396 = tpu.matmul %395, %394, %cst_223 {dimension_numbers = #tpu.dot_dimension_numbers<[1], [0], [0], [1], [0, 0, 1, 1], [], []>} : vector<16x32xbf16>, vector<32x16xbf16>, vector<16x16xf32> -> vector<16x16xf32>
    %c1_224 = arith.constant 1 : index
    %c1_225 = arith.constant 1 : index
    %c0_226 = arith.constant 0 : index
    %c0_227 = arith.constant 0 : index
    %397 = vector.load %arg11[%c1_224, %c1_225, %c0_226, %c0_227] : memref<2x2x1x16xf32, #tpu.memory_space<vmem>>, vector<1x1x1x16xf32>
    %398 = vector.shape_cast %397 : vector<1x1x1x16xf32> to vector<1x16xf32>
    %399 = vector.broadcast %398 : vector<1x16xf32> to vector<16x16xf32>
    %400 = arith.addf %396, %399 : vector<16x16xf32>
    %c1_228 = arith.constant 1 : index
    %c1_229 = arith.constant 1 : index
    %c0_230 = arith.constant 0 : index
    %c0_231 = arith.constant 0 : index
    %401 = vector.load %arg12[%c1_228, %c1_229, %c0_230, %c0_231] : memref<2x2x32x16xbf16, #tpu.memory_space<vmem>>, vector<1x1x32x16xbf16>
    %402 = vector.shape_cast %401 : vector<1x1x32x16xbf16> to vector<32x16xbf16>
    %403 = arith.truncf %300 : vector<16x32xf32> to vector<16x32xbf16>
    %cst_232 = arith.constant dense<0.000000e+00> : vector<16x16xf32>
    %404 = tpu.matmul %403, %402, %cst_232 {dimension_numbers = #tpu.dot_dimension_numbers<[1], [0], [0], [1], [0, 0, 1, 1], [], []>} : vector<16x32xbf16>, vector<32x16xbf16>, vector<16x16xf32> -> vector<16x16xf32>
    %c1_233 = arith.constant 1 : index
    %c1_234 = arith.constant 1 : index
    %c0_235 = arith.constant 0 : index
    %c0_236 = arith.constant 0 : index
    %405 = vector.load %arg13[%c1_233, %c1_234, %c0_235, %c0_236] : memref<2x2x1x16xf32, #tpu.memory_space<vmem>>, vector<1x1x1x16xf32>
    %406 = vector.shape_cast %405 : vector<1x1x1x16xf32> to vector<1x16xf32>
    %407 = vector.broadcast %406 : vector<1x16xf32> to vector<16x16xf32>
    %408 = arith.addf %404, %407 : vector<16x16xf32>
    %409 = vector.extract_strided_slice %392 {offsets = [0, 0], sizes = [8, 16], strides = [1, 1]} : vector<16x16xf32> to vector<8x16xf32>
    %410 = vector.extract_strided_slice %400 {offsets = [0, 0], sizes = [8, 16], strides = [1, 1]} : vector<16x16xf32> to vector<8x16xf32>
    %411 = arith.truncf %409 : vector<8x16xf32> to vector<8x16xbf16>
    %412 = arith.truncf %410 : vector<8x16xf32> to vector<8x16xbf16>
    %cst_237 = arith.constant dense<0.000000e+00> : vector<8x8xf32>
    %413 = tpu.matmul %411, %412, %cst_237 {dimension_numbers = #tpu.dot_dimension_numbers<[1], [1], [0], [0], [0, 0, 1, 0], [], []>} : vector<8x16xbf16>, vector<8x16xbf16>, vector<8x8xf32> -> vector<8x8xf32>
    %cst_238 = arith.constant 2.500000e-01 : f32
    %414 = vector.broadcast %cst_238 : f32 to vector<8x8xf32>
    %415 = arith.mulf %413, %414 : vector<8x8xf32>
    %416 = vector.extract_strided_slice %46 {offsets = [0, 0], sizes = [1, 8], strides = [1, 1]} : vector<2x8xf32> to vector<1x8xf32>
    %417 = vector.broadcast %416 : vector<1x8xf32> to vector<8x8xf32>
    %418 = arith.addf %415, %417 : vector<8x8xf32>
    %cst_239 = arith.constant dense<0xFF800000> : vector<8xf32>
    %419 = vector.multi_reduction <maximumf>, %418, %cst_239 [1] : vector<8x8xf32> to vector<8xf32>
    %420 = vector.shape_cast %419 : vector<8xf32> to vector<8x1xf32>
    %421 = vector.broadcast %420 : vector<8x1xf32> to vector<8x8xf32>
    %422 = arith.subf %418, %421 : vector<8x8xf32>
    %423 = math.exp %422 : vector<8x8xf32>
    %cst_240 = arith.constant dense<0.000000e+00> : vector<8xf32>
    %424 = vector.multi_reduction <add>, %423, %cst_240 [1] : vector<8x8xf32> to vector<8xf32>
    %425 = vector.shape_cast %424 : vector<8xf32> to vector<8x1xf32>
    %426 = tpu.reciprocal %425 {approx = true} : vector<8x1xf32> -> vector<8x1xf32>
    %427 = vector.broadcast %426 : vector<8x1xf32> to vector<8x8xf32>
    %428 = arith.mulf %423, %427 : vector<8x8xf32>
    %429 = vector.extract_strided_slice %408 {offsets = [0, 0], sizes = [8, 16], strides = [1, 1]} : vector<16x16xf32> to vector<8x16xf32>
    %430 = arith.truncf %428 : vector<8x8xf32> to vector<8x8xbf16>
    %431 = arith.truncf %429 : vector<8x16xf32> to vector<8x16xbf16>
    %cst_241 = arith.constant dense<0.000000e+00> : vector<8x16xf32>
    %432 = tpu.matmul %430, %431, %cst_241 {dimension_numbers = #tpu.dot_dimension_numbers<[1], [0], [0], [1], [0, 0, 1, 1], [], []>} : vector<8x8xbf16>, vector<8x16xbf16>, vector<8x16xf32> -> vector<8x16xf32>
    %c1_242 = arith.constant 1 : index
    %c1_243 = arith.constant 1 : index
    %c0_244 = arith.constant 0 : index
    %c0_245 = arith.constant 0 : index
    %433 = vector.load %arg14[%c1_242, %c1_243, %c0_244, %c0_245] : memref<2x2x16x32xbf16, #tpu.memory_space<vmem>>, vector<1x1x16x32xbf16>
    %434 = vector.shape_cast %433 : vector<1x1x16x32xbf16> to vector<16x32xbf16>
    %435 = arith.truncf %432 : vector<8x16xf32> to vector<8x16xbf16>
    %cst_246 = arith.constant dense<0.000000e+00> : vector<8x32xf32>
    %436 = tpu.matmul %435, %434, %cst_246 {dimension_numbers = #tpu.dot_dimension_numbers<[1], [0], [0], [1], [0, 0, 1, 1], [], []>} : vector<8x16xbf16>, vector<16x32xbf16>, vector<8x32xf32> -> vector<8x32xf32>
    %437 = arith.addf %355, %436 : vector<8x32xf32>
    %438 = vector.extract_strided_slice %392 {offsets = [8, 0], sizes = [8, 16], strides = [1, 1]} : vector<16x16xf32> to vector<8x16xf32>
    %439 = vector.extract_strided_slice %400 {offsets = [8, 0], sizes = [8, 16], strides = [1, 1]} : vector<16x16xf32> to vector<8x16xf32>
    %440 = arith.truncf %438 : vector<8x16xf32> to vector<8x16xbf16>
    %441 = arith.truncf %439 : vector<8x16xf32> to vector<8x16xbf16>
    %cst_247 = arith.constant dense<0.000000e+00> : vector<8x8xf32>
    %442 = tpu.matmul %440, %441, %cst_247 {dimension_numbers = #tpu.dot_dimension_numbers<[1], [1], [0], [0], [0, 0, 1, 0], [], []>} : vector<8x16xbf16>, vector<8x16xbf16>, vector<8x8xf32> -> vector<8x8xf32>
    %cst_248 = arith.constant 2.500000e-01 : f32
    %443 = vector.broadcast %cst_248 : f32 to vector<8x8xf32>
    %444 = arith.mulf %442, %443 : vector<8x8xf32>
    %445 = vector.extract_strided_slice %46 {offsets = [1, 0], sizes = [1, 8], strides = [1, 1]} : vector<2x8xf32> to vector<1x8xf32>
    %446 = vector.broadcast %445 : vector<1x8xf32> to vector<8x8xf32>
    %447 = arith.addf %444, %446 : vector<8x8xf32>
    %cst_249 = arith.constant dense<0xFF800000> : vector<8xf32>
    %448 = vector.multi_reduction <maximumf>, %447, %cst_249 [1] : vector<8x8xf32> to vector<8xf32>
    %449 = vector.shape_cast %448 : vector<8xf32> to vector<8x1xf32>
    %450 = vector.broadcast %449 : vector<8x1xf32> to vector<8x8xf32>
    %451 = arith.subf %447, %450 : vector<8x8xf32>
    %452 = math.exp %451 : vector<8x8xf32>
    %cst_250 = arith.constant dense<0.000000e+00> : vector<8xf32>
    %453 = vector.multi_reduction <add>, %452, %cst_250 [1] : vector<8x8xf32> to vector<8xf32>
    %454 = vector.shape_cast %453 : vector<8xf32> to vector<8x1xf32>
    %455 = tpu.reciprocal %454 {approx = true} : vector<8x1xf32> -> vector<8x1xf32>
    %456 = vector.broadcast %455 : vector<8x1xf32> to vector<8x8xf32>
    %457 = arith.mulf %452, %456 : vector<8x8xf32>
    %458 = vector.extract_strided_slice %408 {offsets = [8, 0], sizes = [8, 16], strides = [1, 1]} : vector<16x16xf32> to vector<8x16xf32>
    %459 = arith.truncf %457 : vector<8x8xf32> to vector<8x8xbf16>
    %460 = arith.truncf %458 : vector<8x16xf32> to vector<8x16xbf16>
    %cst_251 = arith.constant dense<0.000000e+00> : vector<8x16xf32>
    %461 = tpu.matmul %459, %460, %cst_251 {dimension_numbers = #tpu.dot_dimension_numbers<[1], [0], [0], [1], [0, 0, 1, 1], [], []>} : vector<8x8xbf16>, vector<8x16xbf16>, vector<8x16xf32> -> vector<8x16xf32>
    %c1_252 = arith.constant 1 : index
    %c1_253 = arith.constant 1 : index
    %c0_254 = arith.constant 0 : index
    %c0_255 = arith.constant 0 : index
    %462 = vector.load %arg14[%c1_252, %c1_253, %c0_254, %c0_255] : memref<2x2x16x32xbf16, #tpu.memory_space<vmem>>, vector<1x1x16x32xbf16>
    %463 = vector.shape_cast %462 : vector<1x1x16x32xbf16> to vector<16x32xbf16>
    %464 = arith.truncf %461 : vector<8x16xf32> to vector<8x16xbf16>
    %cst_256 = arith.constant dense<0.000000e+00> : vector<8x32xf32>
    %465 = tpu.matmul %464, %463, %cst_256 {dimension_numbers = #tpu.dot_dimension_numbers<[1], [0], [0], [1], [0, 0, 1, 1], [], []>} : vector<8x16xbf16>, vector<16x32xbf16>, vector<8x32xf32> -> vector<8x32xf32>
    %466 = arith.addf %384, %465 : vector<8x32xf32>
    %467 = tpu.concatenate %437, %466 in 0 : vector<8x32xf32>, vector<8x32xf32> -> vector<16x32xf32>
    %c1_257 = arith.constant 1 : index
    %c0_258 = arith.constant 0 : index
    %c0_259 = arith.constant 0 : index
    %468 = vector.load %arg15[%c1_257, %c0_258, %c0_259] : memref<2x1x32xf32, #tpu.memory_space<vmem>>, vector<1x1x32xf32>
    %469 = vector.shape_cast %468 : vector<1x1x32xf32> to vector<1x32xf32>
    %470 = vector.broadcast %469 : vector<1x32xf32> to vector<16x32xf32>
    %471 = arith.addf %467, %470 : vector<16x32xf32>
    %472 = arith.addf %300, %471 : vector<16x32xf32>
    %c1_260 = arith.constant 1 : index
    %c0_261 = arith.constant 0 : index
    %c0_262 = arith.constant 0 : index
    %473 = vector.load %arg16[%c1_260, %c0_261, %c0_262] : memref<2x1x32xf32, #tpu.memory_space<vmem>>, vector<1x1x32xf32>
    %474 = vector.shape_cast %473 : vector<1x1x32xf32> to vector<1x32xf32>
    %c1_263 = arith.constant 1 : index
    %c0_264 = arith.constant 0 : index
    %c0_265 = arith.constant 0 : index
    %475 = vector.load %arg17[%c1_263, %c0_264, %c0_265] : memref<2x1x32xf32, #tpu.memory_space<vmem>>, vector<1x1x32xf32>
    %476 = vector.shape_cast %475 : vector<1x1x32xf32> to vector<1x32xf32>
    %cst_266 = arith.constant dense<0.000000e+00> : vector<16xf32>
    %477 = vector.multi_reduction <add>, %472, %cst_266 [1] : vector<16x32xf32> to vector<16xf32>
    %478 = vector.shape_cast %477 : vector<16xf32> to vector<16x1xf32>
    %cst_267 = arith.constant 3.200000e+01 : f32
    %479 = vector.broadcast %cst_267 : f32 to vector<16x1xf32>
    %480 = arith.divf %478, %479 : vector<16x1xf32>
    %481 = vector.broadcast %480 : vector<16x1xf32> to vector<16x32xf32>
    %482 = arith.subf %472, %481 : vector<16x32xf32>
    %483 = arith.mulf %482, %482 : vector<16x32xf32>
    %cst_268 = arith.constant dense<0.000000e+00> : vector<16xf32>
    %484 = vector.multi_reduction <add>, %483, %cst_268 [1] : vector<16x32xf32> to vector<16xf32>
    %485 = vector.shape_cast %484 : vector<16xf32> to vector<16x1xf32>
    %cst_269 = arith.constant 3.200000e+01 : f32
    %486 = vector.broadcast %cst_269 : f32 to vector<16x1xf32>
    %487 = arith.divf %485, %486 : vector<16x1xf32>
    %488 = vector.broadcast %480 : vector<16x1xf32> to vector<16x32xf32>
    %489 = arith.subf %472, %488 : vector<16x32xf32>
    %cst_270 = arith.constant 9.99999996E-13 : f32
    %490 = vector.broadcast %cst_270 : f32 to vector<16x1xf32>
    %491 = arith.addf %487, %490 : vector<16x1xf32>
    %492 = math.rsqrt %491 : vector<16x1xf32>
    %493 = vector.broadcast %492 : vector<16x1xf32> to vector<16x32xf32>
    %494 = arith.mulf %489, %493 : vector<16x32xf32>
    %495 = vector.broadcast %474 : vector<1x32xf32> to vector<16x32xf32>
    %496 = arith.mulf %494, %495 : vector<16x32xf32>
    %497 = vector.broadcast %476 : vector<1x32xf32> to vector<16x32xf32>
    %498 = arith.addf %496, %497 : vector<16x32xf32>
    %c1_271 = arith.constant 1 : index
    %c0_272 = arith.constant 0 : index
    %c0_273 = arith.constant 0 : index
    %499 = vector.load %arg18[%c1_271, %c0_272, %c0_273] : memref<2x32x64xbf16, #tpu.memory_space<vmem>>, vector<1x32x64xbf16>
    %500 = vector.shape_cast %499 : vector<1x32x64xbf16> to vector<32x64xbf16>
    %501 = arith.truncf %498 : vector<16x32xf32> to vector<16x32xbf16>
    %cst_274 = arith.constant dense<0.000000e+00> : vector<16x64xf32>
    %502 = tpu.matmul %501, %500, %cst_274 {dimension_numbers = #tpu.dot_dimension_numbers<[1], [0], [0], [1], [0, 0, 1, 1], [], []>} : vector<16x32xbf16>, vector<32x64xbf16>, vector<16x64xf32> -> vector<16x64xf32>
    %c1_275 = arith.constant 1 : index
    %c0_276 = arith.constant 0 : index
    %c0_277 = arith.constant 0 : index
    %503 = vector.load %arg19[%c1_275, %c0_276, %c0_277] : memref<2x1x64xf32, #tpu.memory_space<vmem>>, vector<1x1x64xf32>
    %504 = vector.shape_cast %503 : vector<1x1x64xf32> to vector<1x64xf32>
    %505 = vector.broadcast %504 : vector<1x64xf32> to vector<16x64xf32>
    %506 = arith.addf %502, %505 : vector<16x64xf32>
    %507 = arith.mulf %506, %506 : vector<16x64xf32>
    %508 = arith.mulf %506, %507 : vector<16x64xf32>
    %cst_278 = arith.constant 4.471500e-02 : f32
    %509 = vector.broadcast %cst_278 : f32 to vector<16x64xf32>
    %510 = arith.mulf %509, %508 : vector<16x64xf32>
    %511 = arith.addf %506, %510 : vector<16x64xf32>
    %cst_279 = arith.constant 0.797884583 : f32
    %512 = vector.broadcast %cst_279 : f32 to vector<16x64xf32>
    %513 = arith.mulf %512, %511 : vector<16x64xf32>
    %514 = math.tanh %513 : vector<16x64xf32>
    %cst_280 = arith.constant 1.000000e+00 : f32
    %515 = vector.broadcast %cst_280 : f32 to vector<16x64xf32>
    %516 = arith.addf %515, %514 : vector<16x64xf32>
    %cst_281 = arith.constant 5.000000e-01 : f32
    %517 = vector.broadcast %cst_281 : f32 to vector<16x64xf32>
    %518 = arith.mulf %517, %516 : vector<16x64xf32>
    %519 = arith.mulf %506, %518 : vector<16x64xf32>
    %c1_282 = arith.constant 1 : index
    %c0_283 = arith.constant 0 : index
    %c0_284 = arith.constant 0 : index
    %520 = vector.load %arg20[%c1_282, %c0_283, %c0_284] : memref<2x64x32xbf16, #tpu.memory_space<vmem>>, vector<1x64x32xbf16>
    %521 = vector.shape_cast %520 : vector<1x64x32xbf16> to vector<64x32xbf16>
    %522 = arith.truncf %519 : vector<16x64xf32> to vector<16x64xbf16>
    %cst_285 = arith.constant dense<0.000000e+00> : vector<16x32xf32>
    %523 = tpu.matmul %522, %521, %cst_285 {dimension_numbers = #tpu.dot_dimension_numbers<[1], [0], [0], [1], [0, 0, 1, 1], [], []>} : vector<16x64xbf16>, vector<64x32xbf16>, vector<16x32xf32> -> vector<16x32xf32>
    %c1_286 = arith.constant 1 : index
    %c0_287 = arith.constant 0 : index
    %c0_288 = arith.constant 0 : index
    %524 = vector.load %arg21[%c1_286, %c0_287, %c0_288] : memref<2x1x32xf32, #tpu.memory_space<vmem>>, vector<1x1x32xf32>
    %525 = vector.shape_cast %524 : vector<1x1x32xf32> to vector<1x32xf32>
    %526 = vector.broadcast %525 : vector<1x32xf32> to vector<16x32xf32>
    %527 = arith.addf %523, %526 : vector<16x32xf32>
    %528 = arith.addf %498, %527 : vector<16x32xf32>
    %c1_289 = arith.constant 1 : index
    %c0_290 = arith.constant 0 : index
    %c0_291 = arith.constant 0 : index
    %529 = vector.load %arg22[%c1_289, %c0_290, %c0_291] : memref<2x1x32xf32, #tpu.memory_space<vmem>>, vector<1x1x32xf32>
    %530 = vector.shape_cast %529 : vector<1x1x32xf32> to vector<1x32xf32>
    %c1_292 = arith.constant 1 : index
    %c0_293 = arith.constant 0 : index
    %c0_294 = arith.constant 0 : index
    %531 = vector.load %arg23[%c1_292, %c0_293, %c0_294] : memref<2x1x32xf32, #tpu.memory_space<vmem>>, vector<1x1x32xf32>
    %532 = vector.shape_cast %531 : vector<1x1x32xf32> to vector<1x32xf32>
    %cst_295 = arith.constant dense<0.000000e+00> : vector<16xf32>
    %533 = vector.multi_reduction <add>, %528, %cst_295 [1] : vector<16x32xf32> to vector<16xf32>
    %534 = vector.shape_cast %533 : vector<16xf32> to vector<16x1xf32>
    %cst_296 = arith.constant 3.200000e+01 : f32
    %535 = vector.broadcast %cst_296 : f32 to vector<16x1xf32>
    %536 = arith.divf %534, %535 : vector<16x1xf32>
    %537 = vector.broadcast %536 : vector<16x1xf32> to vector<16x32xf32>
    %538 = arith.subf %528, %537 : vector<16x32xf32>
    %539 = arith.mulf %538, %538 : vector<16x32xf32>
    %cst_297 = arith.constant dense<0.000000e+00> : vector<16xf32>
    %540 = vector.multi_reduction <add>, %539, %cst_297 [1] : vector<16x32xf32> to vector<16xf32>
    %541 = vector.shape_cast %540 : vector<16xf32> to vector<16x1xf32>
    %cst_298 = arith.constant 3.200000e+01 : f32
    %542 = vector.broadcast %cst_298 : f32 to vector<16x1xf32>
    %543 = arith.divf %541, %542 : vector<16x1xf32>
    %544 = vector.broadcast %536 : vector<16x1xf32> to vector<16x32xf32>
    %545 = arith.subf %528, %544 : vector<16x32xf32>
    %cst_299 = arith.constant 9.99999996E-13 : f32
    %546 = vector.broadcast %cst_299 : f32 to vector<16x1xf32>
    %547 = arith.addf %543, %546 : vector<16x1xf32>
    %548 = math.rsqrt %547 : vector<16x1xf32>
    %549 = vector.broadcast %548 : vector<16x1xf32> to vector<16x32xf32>
    %550 = arith.mulf %545, %549 : vector<16x32xf32>
    %551 = vector.broadcast %530 : vector<1x32xf32> to vector<16x32xf32>
    %552 = arith.mulf %550, %551 : vector<16x32xf32>
    %553 = vector.broadcast %532 : vector<1x32xf32> to vector<16x32xf32>
    %554 = arith.addf %552, %553 : vector<16x32xf32>
    %555 = vector.extract_strided_slice %554 {offsets = [0, 0], sizes = [1, 32], strides = [1, 1]} : vector<16x32xf32> to vector<1x32xf32>
    %556 = vector.extract_strided_slice %554 {offsets = [8, 0], sizes = [1, 32], strides = [1, 1]} : vector<16x32xf32> to vector<1x32xf32>
    %557 = tpu.concatenate %555, %556 in 0 : vector<1x32xf32>, vector<1x32xf32> -> vector<2x32xf32>
    %c0_300 = arith.constant 0 : index
    %c0_301 = arith.constant 0 : index
    %c0_302 = arith.constant 0 : index
    %558 = vector.load %arg24[%c0_300, %c0_301, %c0_302] : memref<1x2x32xf32, #tpu.memory_space<vmem>>, vector<1x2x32xf32>
    %559 = vector.shape_cast %558 : vector<1x2x32xf32> to vector<2x32xf32>
    %560 = vector.shape_cast %557 : vector<2x32xf32> to vector<1x2x32xf32>
    tpu.vector_store %arg24[%c0_300, %c0_301, %c0_302], %560 {strides = array<i32>} : memref<1x2x32xf32, #tpu.memory_space<vmem>>, vector<1x2x32xf32>,
    return
  }
  func.func @transform_0(%arg0: i32) -> (i32, i32) {
    %c0_i32 = arith.constant 0 : i32
    %c0_i32_0 = arith.constant 0 : i32
    return %arg0, %c0_i32 : i32, i32
  }
  func.func @transform_1(%arg0: i32) -> (i32, i32, i32) {
    %c0_i32 = arith.constant 0 : i32
    %c0_i32_0 = arith.constant 0 : i32
    %c0_i32_1 = arith.constant 0 : i32
    return %arg0, %c0_i32, %c0_i32_0 : i32, i32, i32
  }
  func.func @transform_2(%arg0: i32) -> (i32, i32) {
    %c0_i32 = arith.constant 0 : i32
    %c0_i32_0 = arith.constant 0 : i32
    %c0_i32_1 = arith.constant 0 : i32
    return %c0_i32, %c0_i32_0 : i32, i32
  }
  func.func @transform_3(%arg0: i32) -> (i32, i32) {
    %c0_i32 = arith.constant 0 : i32
    %c0_i32_0 = arith.constant 0 : i32
    %c0_i32_1 = arith.constant 0 : i32
    return %c0_i32, %c0_i32_0 : i32, i32
  }
  func.func @transform_4(%arg0: i32) -> (i32, i32) {
    %c0_i32 = arith.constant 0 : i32
    %c0_i32_0 = arith.constant 0 : i32
    %c0_i32_1 = arith.constant 0 : i32
    return %c0_i32, %c0_i32_0 : i32, i32
  }
  func.func @transform_5(%arg0: i32) -> (i32, i32) {
    %c0_i32 = arith.constant 0 : i32
    %c0_i32_0 = arith.constant 0 : i32
    %c0_i32_1 = arith.constant 0 : i32
    return %c0_i32, %c0_i32_0 : i32, i32
  }
  func.func @transform_6(%arg0: i32) -> (i32, i32) {
    %c0_i32 = arith.constant 0 : i32
    %c0_i32_0 = arith.constant 0 : i32
    %c0_i32_1 = arith.constant 0 : i32
    return %c0_i32, %c0_i32_0 : i32, i32
  }
  func.func @transform_7(%arg0: i32) -> (i32, i32, i32, i32) {
    %c0_i32 = arith.constant 0 : i32
    %c0_i32_0 = arith.constant 0 : i32
    %c0_i32_1 = arith.constant 0 : i32
    %c0_i32_2 = arith.constant 0 : i32
    %c0_i32_3 = arith.constant 0 : i32
    return %c0_i32, %c0_i32_0, %c0_i32_1, %c0_i32_2 : i32, i32, i32, i32
  }
  func.func @transform_8(%arg0: i32) -> (i32, i32, i32, i32) {
    %c0_i32 = arith.constant 0 : i32
    %c0_i32_0 = arith.constant 0 : i32
    %c0_i32_1 = arith.constant 0 : i32
    %c0_i32_2 = arith.constant 0 : i32
    %c0_i32_3 = arith.constant 0 : i32
    return %c0_i32, %c0_i32_0, %c0_i32_1, %c0_i32_2 : i32, i32, i32, i32
  }
  func.func @transform_9(%arg0: i32) -> (i32, i32, i32, i32) {
    %c0_i32 = arith.constant 0 : i32
    %c0_i32_0 = arith.constant 0 : i32
    %c0_i32_1 = arith.constant 0 : i32
    %c0_i32_2 = arith.constant 0 : i32
    %c0_i32_3 = arith.constant 0 : i32
    return %c0_i32, %c0_i32_0, %c0_i32_1, %c0_i32_2 : i32, i32, i32, i32
  }
  func.func @transform_10(%arg0: i32) -> (i32, i32, i32, i32) {
    %c0_i32 = arith.constant 0 : i32
    %c0_i32_0 = arith.constant 0 : i32
    %c0_i32_1 = arith.constant 0 : i32
    %c0_i32_2 = arith.constant 0 : i32
    %c0_i32_3 = arith.constant 0 : i32
    return %c0_i32, %c0_i32_0, %c0_i32_1, %c0_i32_2 : i32, i32, i32, i32
  }
  func.func @transform_11(%arg0: i32) -> (i32, i32, i32, i32) {
    %c0_i32 = arith.constant 0 : i32
    %c0_i32_0 = arith.constant 0 : i32
    %c0_i32_1 = arith.constant 0 : i32
    %c0_i32_2 = arith.constant 0 : i32
    %c0_i32_3 = arith.constant 0 : i32
    return %c0_i32, %c0_i32_0, %c0_i32_1, %c0_i32_2 : i32, i32, i32, i32
  }
  func.func @transform_12(%arg0: i32) -> (i32, i32, i32, i32) {
    %c0_i32 = arith.constant 0 : i32
    %c0_i32_0 = arith.constant 0 : i32
    %c0_i32_1 = arith.constant 0 : i32
    %c0_i32_2 = arith.constant 0 : i32
    %c0_i32_3 = arith.constant 0 : i32
    return %c0_i32, %c0_i32_0, %c0_i32_1, %c0_i32_2 : i32, i32, i32, i32
  }
  func.func @transform_13(%arg0: i32) -> (i32, i32, i32, i32) {
    %c0_i32 = arith.constant 0 : i32
    %c0_i32_0 = arith.constant 0 : i32
    %c0_i32_1 = arith.constant 0 : i32
    %c0_i32_2 = arith.constant 0 : i32
    %c0_i32_3 = arith.constant 0 : i32
    return %c0_i32, %c0_i32_0, %c0_i32_1, %c0_i32_2 : i32, i32, i32, i32
  }
  func.func @transform_14(%arg0: i32) -> (i32, i32, i32) {
    %c0_i32 = arith.constant 0 : i32
    %c0_i32_0 = arith.constant 0 : i32
    %c0_i32_1 = arith.constant 0 : i32
    %c0_i32_2 = arith.constant 0 : i32
    return %c0_i32, %c0_i32_0, %c0_i32_1 : i32, i32, i32
  }
  func.func @transform_15(%arg0: i32) -> (i32, i32, i32) {
    %c0_i32 = arith.constant 0 : i32
    %c0_i32_0 = arith.constant 0 : i32
    %c0_i32_1 = arith.constant 0 : i32
    %c0_i32_2 = arith.constant 0 : i32
    return %c0_i32, %c0_i32_0, %c0_i32_1 : i32, i32, i32
  }
  func.func @transform_16(%arg0: i32) -> (i32, i32, i32) {
    %c0_i32 = arith.constant 0 : i32
    %c0_i32_0 = arith.constant 0 : i32
    %c0_i32_1 = arith.constant 0 : i32
    %c0_i32_2 = arith.constant 0 : i32
    return %c0_i32, %c0_i32_0, %c0_i32_1 : i32, i32, i32
  }
  func.func @transform_17(%arg0: i32) -> (i32, i32, i32) {
    %c0_i32 = arith.constant 0 : i32
    %c0_i32_0 = arith.constant 0 : i32
    %c0_i32_1 = arith.constant 0 : i32
    %c0_i32_2 = arith.constant 0 : i32
    return %c0_i32, %c0_i32_0, %c0_i32_1 : i32, i32, i32
  }
  func.func @transform_18(%arg0: i32) -> (i32, i32, i32) {
    %c0_i32 = arith.constant 0 : i32
    %c0_i32_0 = arith.constant 0 : i32
    %c0_i32_1 = arith.constant 0 : i32
    %c0_i32_2 = arith.constant 0 : i32
    return %c0_i32, %c0_i32_0, %c0_i32_1 : i32, i32, i32
  }
  func.func @transform_19(%arg0: i32) -> (i32, i32, i32) {
    %c0_i32 = arith.constant 0 : i32
    %c0_i32_0 = arith.constant 0 : i32
    %c0_i32_1 = arith.constant 0 : i32
    %c0_i32_2 = arith.constant 0 : i32
    return %c0_i32, %c0_i32_0, %c0_i32_1 : i32, i32, i32
  }
  func.func @transform_20(%arg0: i32) -> (i32, i32, i32) {
    %c0_i32 = arith.constant 0 : i32
    %c0_i32_0 = arith.constant 0 : i32
    %c0_i32_1 = arith.constant 0 : i32
    %c0_i32_2 = arith.constant 0 : i32
    return %c0_i32, %c0_i32_0, %c0_i32_1 : i32, i32, i32
  }
  func.func @transform_21(%arg0: i32) -> (i32, i32, i32) {
    %c0_i32 = arith.constant 0 : i32
    %c0_i32_0 = arith.constant 0 : i32
    %c0_i32_1 = arith.constant 0 : i32
    %c0_i32_2 = arith.constant 0 : i32
    return %c0_i32, %c0_i32_0, %c0_i32_1 : i32, i32, i32
  }
  func.func @transform_22(%arg0: i32) -> (i32, i32, i32) {
    %c0_i32 = arith.constant 0 : i32
    %c0_i32_0 = arith.constant 0 : i32
    %c0_i32_1 = arith.constant 0 : i32
    %c0_i32_2 = arith.constant 0 : i32
    return %c0_i32, %c0_i32_0, %c0_i32_1 : i32, i32, i32
  }
  func.func @transform_23(%arg0: i32) -> (i32, i32, i32) {
    %c0_i32 = arith.constant 0 : i32
    %c0_i32_0 = arith.constant 0 : i32
    %c0_i32_1 = arith.constant 0 : i32
    return %arg0, %c0_i32, %c0_i32_0 : i32, i32, i32
  }
}

</mosaic_0001>

<bundles_post_ra>
// kernel: bi_encoder_forward.1
= control target key start
LH: loop header
LB: loop body
LE: loop exit
PB: predicated region body
PF: predicated region fallthrough
CT: control target
= control target key end

     0   :  { %s5047_s0 = inlined_call_operand.vmem [shape: s32[32,1], index: 0, kind: input, shape index: {}]   ;;  %s5048_s1 = inlined_call_operand.vmem [shape: s32[2,2,8], index: 1, kind: input, shape index: {}]   ;;  %s5049_s2 = inlined_call_operand.vmem [shape: bf16[100,32], index: 2, kind: input, shape index: {}]   ;;  %s5050_s3 = inlined_call_operand.vmem [shape: f32[64,32], index: 3, kind: input, shape index: {}]   ;;  %s5051_s4 = inlined_call_operand.vmem [shape: f32[2,32], index: 4, kind: input, shape index: {}]   ;;  %s5052_s5 = inlined_call_operand.vmem [shape: f32[1,32], index: 5, kind: input, shape index: {}]   ;;  %s5053_s6 = inlined_call_operand.vmem [shape: f32[1,32], index: 6, kind: input, shape index: {}]   ;;  %s5054_s7 = inlined_call_operand.vmem [shape: bf16[2,2,32,16], index: 7, kind: input, shape index: {}]   ;;  %s5055_s8 = inlined_call_operand.vmem [shape: f32[2,2,1,16], index: 8, kind: input, shape index: {}]   ;;  %s5056_s9 = inlined_call_operand.vmem [shape: bf16[2,2,32,16], index: 9, kind: input, shape index: {}]   ;;  %s5057_s10 = inlined_call_operand.vmem [shape: f32[2,2,1,16], index: 10, kind: input, shape index: {}]   ;;  %s5058_s11 = inlined_call_operand.vmem [shape: bf16[2,2,32,16], index: 11, kind: input, shape index: {}]   ;;  %s5059_s12 = inlined_call_operand.vmem [shape: f32[2,2,1,16], index: 12, kind: input, shape index: {}]   ;;  %s5060_s13 = inlined_call_operand.vmem [shape: bf16[2,2,16,32], index: 13, kind: input, shape index: {}]   ;;  %s5061_s14 = inlined_call_operand.vmem [shape: f32[2,1,32], index: 14, kind: input, shape index: {}]   ;;  %s5062_s15 = inlined_call_operand.vmem [shape: f32[2,1,32], index: 15, kind: input, shape index: {}]   ;;  %s5063_s16 = inlined_call_operand.vmem [shape: f32[2,1,32], index: 16, kind: input, shape index: {}]   ;;  %s5064_s17 = inlined_call_operand.vmem [shape: bf16[2,32,64], index: 17, kind: input, shape index: {}]   ;;  %s5065_s18 = inlined_call_operand.vmem [shape: f32[2,1,64], index: 18, kind: input, shape index: {}]   ;;  %s5066_s19 = inlined_call_operand.vmem [shape: bf16[2,64,32], index: 19, kind: input, shape index: {}]   ;;  %s5067_s20 = inlined_call_operand.vmem [shape: f32[2,1,32], index: 20, kind: input, shape index: {}]   ;;  %s5068_s21 = inlined_call_operand.vmem [shape: f32[2,1,32], index: 21, kind: input, shape index: {}]   ;;  %s5069_s22 = inlined_call_operand.vmem [shape: f32[2,1,32], index: 22, kind: input, shape index: {}]   ;;  %s5070_s23 = inlined_call_operand.vmem [shape: f32[2,2,32], index: 23, kind: output, shape index: {}]  }
   0x1   :  { %5073 = sst [smem:[#allocation2_spill]] %s5047_s0 }
   0x2   :  { %5074 = sst [smem:[#allocation3_spill]] %s5048_s1 }
   0x3   :  { %5075 = sst [smem:[#allocation4_spill]] %s5049_s2 }
   0x4   :  { %5076 = sst [smem:[#allocation5_spill]] %s5050_s3 }
   0x5   :  { %5077 = sst [smem:[#allocation6_spill]] %s5051_s4  ;;  %s4444_s4 = smov 0  }
   0x6   :  { %5078 = sst [smem:[#allocation7_spill]] %s5052_s5 }
   0x7   :  { %5079 = sst [smem:[#allocation8_spill]] %s5053_s6 }
   0x8   :  { %5080 = sst [smem:[#allocation9_spill]] %s5054_s7 }
   0x9 LB: > { %s4450_s30 = sadd.s32 4294967295, %s4319_s4   ;;  %p3594_p0 = scmp.ge.s32.totalorder %s4319_s4, 1  ;;  %s4319_s4 = sphi %s4444_s4, %s33_s4  }
   0xa   : > { %p647_p1 = scmp.lt.s32.totalorder %s4319_s4, 3 }
   0xc   : > { %p648_p2 = pnand %p3594_p0, %p647_p1 }
   0xd   : > { %s3595_s24 = sshll.u32 (!%p648_p2), %s4450_s30, 1  ;;  %s5081_s1 = sld [smem:[#allocation4_spill]] (!%p648_p2)  ;;  %v4321_v1 = vmov (!%p648_p2), 0   ;;  %v4322_v2 = vmov (!%p648_p2), 0.0   ;;  %vm807_vm0 = vcmask (!%p648_p2), 1041408   ;;  %vm4323_vm1 = vmmov (!%p648_p2), 0  }
   0xe   : > { %651 = sbr.rel (%p648_p2) target bundleno = 8858 (0x229a), region = 112  ;;  %4205 = vset.pattern.permute.xlu0 (!%p648_p2), %v4321_v1  ;;  %p715_p3 = scmp.lt.s32.totalorder (!%p648_p2), %s3595_s24, 3  ;;  %3896 = vmatprep.subr.bf16.mxu0 (!%p648_p2), %v4322_v2  ;;  %v731_v12 = vlaneseq (!%p648_p2)  ;;  %vm803_vm4 = vcmask (!%p648_p2), 818176   ;;  %vm854_vm5 = vcmask (!%p648_p2), 261120   ;;  %v4215_v58 = vld [vmem:[%s5056_s9] sm:$0xff] (!%p648_p2)   ;;  %v4216_v60 = vld [vmem:[%s5056_s9 + $0x8] sm:$0xff] (!%p648_p2)  }
   0xf   : > { %3914 = vmatprep.subr.bf16.mxu1 (!%p648_p2), %v4322_v2  ;;  %s5082_s3 = sld [smem:[#allocation2_spill]] (!%p648_p2)  ;;  %3910 = vmatprep.mubr.msk.bf16.mxu0 (!%p648_p2), %vm4323_vm1, %v4322_v2  ;;  %s5084_s5 = sld [smem:[#allocation6_spill]] (!%p648_p2)  ;;  %v4217_v61 = vld [vmem:[%s5058_s11] sm:$0xff] (!%p648_p2)   ;;  %v4218_v62 = vld [vmem:[%s5058_s11 + $0x8] sm:$0xff] (!%p648_p2)   ;;  %vm1100_vm6 = vcmask (!%p648_p2), 130048   ;;  %vm1170_vm7 = vcmask (!%p648_p2), 1043456  }
  0x10   : > { %3918 = vmatprep.mubr.msk.bf16.mxu1 (!%p648_p2), %vm4323_vm1, %v4322_v2  ;;  %v732_v13 = vand.u32 (!%p648_p2), 127, %v731_v12  ;;  %s5085_s2 = sld [smem:[#allocation9_spill]] (!%p648_p2)  ;;  %s5086_s29 = sld [smem:[#allocation7_spill]] (!%p648_p2)  ;;  %v3610_v1 = vld [vmem:[%s5055_s8] ss:$0 sm:$0xff] (!%p648_p2)  ;;  %vm1153_vm8 = vcmask (!%p648_p2), 64512  }
  0x11   : > { %s5087_s25 = sld [smem:[#allocation8_spill]] (!%p648_p2)  ;;  %p720_p4 = scmp.lt.s32.totalorder (!%p648_p2), %s4450_s30, 1  ;;  %vm2117_vm9 = vcmask (!%p648_p2), 523264   ;;  %vm3521_vm10 = vcmask (!%p648_p2), 1040384   ;;  %vm3523_vm11 = vcmask (!%p648_p2), 254976  }
  0x12   : > { %s5088_s28 = sld [smem:[#allocation3_spill]] (!%p648_p2) }
  0x13   : > { %v4206_v0 = vld [vmem:[%s5081_s1] sm:$0xff] (!%p648_p2)   ;;  %v4207_v3 = vld [vmem:[%s5081_s1 + $0x8] sm:$0xff] (!%p648_p2)   ;;  %v4208_v4 = vld [vmem:[%s5081_s1 + $0x10] sm:$0xff] (!%p648_p2)  }
  0x14   : > { %3897 = vmatpush3.bf16.msra.mxu0 (!%p648_p2), %v4206_v0  ;;  %v4209_v7 = vld [vmem:[%s5081_s1 + $0x18] sm:$0xff] (!%p648_p2)   ;;  %v4212_v8 = vld [vmem:[%s5081_s1 + $0x30] ss:$0 sps:$4 sm:$0x33] (!%p648_p2)   ;;  %v4210_v9 = vld [vmem:[%s5081_s1 + $0x20] sm:$0xff] (!%p648_p2)  }
  0x15   : > { %s5090_s24 = smov (!%p715_p3, %s3595_s24), 3  ;;  %3898 = vmatprep.subr.bf16.mxu0 %v4322_v2  ;;  %v4211_v10 = vld [vmem:[%s5081_s1 + $0x28] sm:$0xff]   ;;  %v809_v11 = vsel %vm807_vm0, %v4212_v8, 0  ;;  %v3599_v20 = vld [vmem:[%s5084_s5] ss:$0 sm:$0xff]  ;;  %s5092_s30 = smov (!%p720_p4, %s4450_s30), 1 }
  0x16   : > { %s3596_s6 = sshll.u32 %s5090_s24, 3  ;;  %v4213_v40 = vld [vmem:[%s5085_s2] sm:$0xff]   ;;  %v4214_v41 = vld [vmem:[%s5085_s2 + $0x8] sm:$0xff]  }
  0x17   : > { %s718_s0 = scalar_lea.vmem %s5082_s3, %s3596_s6  ;;  %s5083_s3 = sld [smem:[#allocation5_spill]]  ;;  %3915 = vmatpush3.bf16.msra.mxu1 %v4213_v40  ;;  %v3608_v50 = vld [vmem:[%s5086_s29] ss:$0 sm:$0xff] }
  0x18   : > { %3899 = vmatpush3.bf16.msra.mxu0 %v4207_v3  ;;  %v729_v5 = vld [vmem:[%s718_s0] sm:$0xff]  ;;  %v730_v6 = vld [vmem:[%s718_s0 + $0x8] sm:$0xff]  ;;  %3916 = vmatprep.subr.bf16.mxu1 %v4322_v2  ;;  %s3597_s6 = sshll.u32 %s5092_s30, 1 }
  0x19   : > { %3900 = vmatprep.subr.bf16.mxu0 %v4322_v2  ;;  %734 = vperm.xlu0 %4205, %v729_v5   ;;  %v3609_v54 = vld [vmem:[%s5087_s25] ss:$0 sm:$0xff]  ;;  %s723_s29 = scalar_lea.vmem %s5088_s28, %s3597_s6  ;;  %s727_s27 = scalar_lea.vmem %s5070_s23, %s3597_s6 }
  0x1b   : > { %3917 = vmatpush3.bf16.msra.mxu1 %v4214_v41 }
  0x1c   : > { %3901 = vmatpush3.bf16.msra.mxu0 %v4208_v4  ;;  %3922 = vmatprep.subr.bf16.mxu1 %v4322_v2 }
  0x1d   : > { %3902 = vmatprep.subr.bf16.mxu0 %v4322_v2  ;;  %737 = vperm.xlu0 %4205, %v730_v6   ;;  %v757_v19 = vld [vmem:[%s5083_s3] sm:$0xff] }
  0x1e   : > { %v763_v21 = vadd.f32 %v3599_v20, %v757_v19  ;;  %v3614_v6 = vld [vmem:[%s5057_s10] ss:$0 sm:$0xff] }
  0x20   : > { %3903 = vmatpush3.bf16.msra.mxu0 %v4209_v7 }
  0x21   : > { %3904 = vmatprep.subr.bf16.mxu0 %v4322_v2 }
  0x24   : > { %3905 = vmatpush3.bf16.msra.mxu0 %v4210_v9 }
  0x25   : > { %3906 = vmatprep.subr.bf16.mxu0 %v4322_v2 }
  0x28   : > { %3907 = vmatpush3.bf16.msra.mxu0 %v4211_v10 }
  0x29   : > { %3908 = vmatprep.subr.bf16.mxu0 %v4322_v2 }
  0x2c   : > { %3909 = vmatpush3.bf16.msra.mxu0 %v809_v11 }
  0x2d   : > { %3956 = vmatprep.subr.bf16.mxu0 %v4322_v2 }
  0x98   : > { %v735_v14 = vpop.permute.xlu0 %734 }
  0x99   : > { %vm739_vm2 = vcmp.eq.s32.totalorder %v735_v14, %v732_v13 }
  0x9a   : > { %v741_v16 = vsel %vm739_vm2, 1.0, %v4322_v2 }
  0x9c   : > { %v738_v15 = vpop.permute.xlu0 %737 }
  0x9d   : > { %vm740_vm3 = vcmp.eq.s32.totalorder %v738_v15, %v732_v13 }
  0x9e   : > { %v742_v17 = vsel %vm740_vm3, 1.0, %v4322_v2 }
  0x9f   : > { %v743_v18 = vpack.c.bf16 %v742_v17, %v741_v16  ;;  %v3618_v16 = vld [vmem:[%s5059_s12] ss:$0 sm:$0xff] }
  0xa1   : > { %3911 = vmatmul.mubr.msk.bf16.vlgmr.msra.gmra.mrb[0].mxu0 %vm803_vm4, %v743_v18 }
  0xa2   : > { %3958 = vmatprep.mubr.msk.bf16.mxu0 %vm4323_vm1, %v4322_v2 }
 0x174   : > { %v845_v22 = vpop.f32.mrb[0].mxu0 }
 0x175   : > { %v846_v23 = vadd.f32 %v845_v22, %v763_v21  ;;  %v3912_v24 = vpop.f32.mrb[1].mxu0 }
 0x176   : > { %v848_v25 = vpop.f32.mrb[2].mxu0 }
 0x177   : > { %v849_v26 = vadd.f32 %v848_v25, %v763_v21  ;;  %v3913_v27 = vpop.f32.mrb[3].mxu0  ;;  %v855_v28 = vsel %vm854_vm5, %v846_v23, 0.0 }
 0x178   : > { %856 = vadd.xlane.f32.xlu1 %v855_v28 }
 0x179   : > { %v858_v29 = vsel %vm854_vm5, %v849_v26, 0.0 }
 0x17c   : > { %859 = vadd.xlane.f32.xlu1 %v858_v29  ;;  %v898_v29 = vld [vmem:[%s723_s29] sm:$0x3] }
 0x205   : > { %v857_v30 = vpop.xlane.xlu1 %856 }
 0x206   : > { %v862_v31 = vmul.f32 0.03125, %v857_v30  ;;  %v899_v30 = vcvt.s32.f32 %v898_v29 }
 0x208   : > { %v864_v32 = vsub.f32 %v846_v23, %v862_v31  ;;  %v1149_v31 = vshrl.u32 %v731_v12, 7 }
 0x209   : > { %v860_v33 = vpop.xlane.xlu1 %859 }
 0x20a   : > { %v863_v34 = vmul.f32 0.03125, %v860_v33  ;;  %v866_v35 = vmul.f32 %v864_v32, %v864_v32  ;;  %v1150_v33 = vsub.s32 0, %v1149_v31 }
 0x20c   : > { %v865_v36 = vsub.f32 %v849_v26, %v863_v34  ;;  %v868_v37 = vsel %vm854_vm5, %v866_v35, 0.0 }
 0x20d   : > { %869 = vadd.xlane.f32.xlu0 %v868_v37 }
 0x20e   : > { %v867_v38 = vmul.f32 %v865_v36, %v865_v36 }
 0x210   : > { %v871_v39 = vsel %vm854_vm5, %v867_v38, 0.0 }
 0x211   : > { %872 = vadd.xlane.f32.xlu1 %v871_v39 }
 0x29a   : > { %v870_v42 = vpop.xlane.xlu0 %869 }
 0x29b   : > { %v874_v43 = vmul.f32 0.03125, %v870_v42 }
 0x29d   : > { %v876_v44 = vadd.f32 1e-12, %v874_v43 }
 0x29e   : > { %v873_v45 = vpop.xlane.xlu1 %872 }
 0x29f   : > { %4253 = vrsqrt.f32 %v876_v44  ;;  %v875_v46 = vmul.f32 0.03125, %v873_v45 }
 0x2a1   : > { %v877_v47 = vadd.f32 1e-12, %v875_v46 }
 0x2a3   : > { %4255 = vrsqrt.f32 %v877_v47 }
 0x2a9   : > { %v4254_v48 = vpop.eup %4253 }
 0x2aa   : > { %v880_v49 = vmul.f32 %v4254_v48, %v864_v32  ;;  %v900_v32 = vsub.f32 1.0, %v899_v30 }
 0x2ac   : > { %v888_v52 = vmul.f32 %v3608_v50, %v880_v49  ;;  %v901_v34 = vmul.f32 -1e+09, %v900_v32 }
 0x2ad   : > { %v4256_v51 = vpop.eup %4255 }
 0x2ae   : > { %v881_v53 = vmul.f32 %v4256_v51, %v865_v36  ;;  %v4521_v56 = vadd.f32 %v3609_v54, %v888_v52  ;;  %v4588_v35 = vrot.slane %v901_v34, %v1150_v33 }
 0x2b0   : > { %v889_v55 = vmul.f32 %v3608_v50, %v881_v53  ;;  %v4219_v53 = vld [vmem:[%s5085_s2 + $0x10] sm:$0xff]  }
 0x2b2   : > { %v4523_v57 = vadd.f32 %v3609_v54, %v889_v55  ;;  %v4220_v55 = vld [vmem:[%s5085_s2 + $0x18] sm:$0xff]  }
 0x2b4   : > { %v4530_v59 = vpack.c.bf16 %v4523_v57, %v4521_v56 }
 0x2b6   : > { %3919 = vmatmul.mubr.msk.bf16.vlgmr.msra.gmra.mrb[0].mxu1 %vm854_vm5, %v4530_v59 }
 0x2b7   : > { %3923 = vmatpush3.bf16.msra.mxu1 %v4215_v58  ;;  %3926 = vmatprep.mubr.msk.bf16.mxu1 %vm4323_vm1, %v4322_v2  ;;  %v4221_v58 = vld [vmem:[%s5058_s11 + $0x10] sm:$0xff]  }
 0x2b8   : > { %3924 = vmatprep.subr.bf16.mxu1 %v4322_v2 }
 0x2bb   : > { %3925 = vmatpush3.bf16.msra.mxu1 %v4216_v60  ;;  %v4222_v60 = vld [vmem:[%s5058_s11 + $0x18] sm:$0xff]  }
 0x2bc   : > { %3930 = vmatprep.subr.bf16.mxu1 %v4322_v2 }
 0x2be   : > { %3927 = vmatmul.mubr.msk.bf16.vlgmr.msra.gmra.mrb[4].mxu1 %vm854_vm5, %v4530_v59 }
 0x2bf   : > { %3931 = vmatpush3.bf16.msra.mxu1 %v4217_v61  ;;  %3934 = vmatprep.mubr.msk.bf16.mxu1 %vm4323_vm1, %v4322_v2 }
 0x2c0   : > { %3932 = vmatprep.subr.bf16.mxu1 %v4322_v2 }
 0x2c3   : > { %3933 = vmatpush3.bf16.msra.mxu1 %v4218_v62 }
 0x2c4   : > { %3938 = vmatprep.subr.bf16.mxu1 %v4322_v2 }
 0x2c6   : > { %3935 = vmatmul.mubr.msk.bf16.vlgmr.msra.gmra.mrb[8].mxu1 %vm854_vm5, %v4530_v59 }
 0x2c7   : > { %3940 = vmatprep.mubr.msk.bf16.mxu1 %vm4323_vm1, %v4322_v2 }
 0x389   : > { %v963_v63 = vpop.f32.mrb[0].mxu1 }
 0x38a   : > { %v3920_v0 = vpop.f32.mrb[1].mxu1  ;;  %v964_v17 = vadd.f32 %v3610_v1, %v963_v63 }
 0x38b   : > { %v966_v3 = vpop.f32.mrb[2].mxu1  ;;  %v1268_v0 = vsub.s32 1, %v1149_v31 }
 0x38c   : > { %v4560_v4 = vadd.f32 %v3610_v1, %v966_v3  ;;  %v3921_v5 = vpop.f32.mrb[3].mxu1  ;;  %v1098_v22 = vpack.c.bf16 %v964_v17, %v964_v17 }
 0x38d   : > { %v4629_v3 = vrot.slane %v901_v34, %v1268_v0 }
 0x38e   : > { %v1217_v54 = vpack.c.bf16 %v4560_v4, %v4560_v4 }
 0x391   : > { %v1027_v7 = vpop.f32.mrb[4].mxu1 }
 0x392   : > { %v1028_v8 = vadd.f32 %v3614_v6, %v1027_v7  ;;  %v3928_v9 = vpop.f32.mrb[5].mxu1 }
 0x393   : > { %v1030_v10 = vpop.f32.mrb[6].mxu1 }
 0x394   : > { %v1099_v11 = vpack.c.bf16 %v1028_v8, %v1028_v8  ;;  %v1031_v13 = vadd.f32 %v3614_v6, %v1030_v10  ;;  %v3929_v14 = vpop.f32.mrb[7].mxu1 }
 0x395   : > { %v3631_v14 = vld [vmem:[%s5055_s8 + $0x1] ss:$0 sm:$0xff] }
 0x396   : > { %v1105_v15 = vsel %vm1100_vm6, %v1099_v11, 0  ;;  %v1218_v49 = vpack.c.bf16 %v1031_v13, %v1031_v13 }
 0x397   : > { %3939 = vmatpush3.bf16.xpose.msra.mxu1 %v1105_v15 }
 0x398   : > { %3944 = vmatprep.subr.bf16.mxu1 %v4322_v2  ;;  %v1223_v52 = vsel %vm1100_vm6, %v1218_v49, 0 }
 0x399   : > { %v1091_v18 = vpop.f32.mrb[8].mxu1 }
 0x39a   : > { %v1092_v19 = vadd.f32 %v3618_v16, %v1091_v18  ;;  %v3936_v20 = vpop.f32.mrb[9].mxu1  ;;  %v3649_v18 = vld [vmem:[%s5059_s12 + $0x1] ss:$0 sm:$0xff] }
 0x39b   : > { %v1094_v21 = vpop.f32.mrb[10].mxu1 }
 0x39c   : > { %v1166_v23 = vpack.c.bf16 %v1092_v19, %v1092_v19  ;;  %v1095_v24 = vadd.f32 %v3618_v16, %v1094_v21  ;;  %v3937_v25 = vpop.f32.mrb[11].mxu1 }
 0x39e   : > { %v1172_v26 = vsel %vm1170_vm7, %v1166_v23, 0  ;;  %v1283_v27 = vpack.c.bf16 %v1095_v24, %v1095_v24  ;;  %3941 = vmatmul.mubr.msk.bf16.vlgmr.msra.gmra.mrb[12].mxu1 %vm1100_vm6, %v1098_v22 }
 0x39f   : > { %3945 = vmatpush3.bf16.msra.mxu1 %v1172_v26  ;;  %3946 = vmatprep.mubr.msk.bf16.mxu1 %vm4323_vm1, %v4322_v2 }
 0x3a0   : > { %v1288_v28 = vsel %vm1170_vm7, %v1283_v27, 0  ;;  %3950 = vmatprep.subr.bf16.mxu1 %v4322_v2 }
 0x3a1   : > { %3957 = vmatpush3.bf16.msra.mxu0 %v1288_v28 }
 0x3a2   : > { %3970 = vmatprep.subr.bf16.mxu0 %v4322_v2 }
 0x471   : > { %v1141_v36 = vpop.f32.mrb[12].mxu1 }
 0x472   : > { %v1147_v37 = vmul.f32 0.25, %v1141_v36  ;;  %v3942_v38 = vpop.f32.mrb[13].mxu1  ;;  %v4223_v36 = vld [vmem:[%s5056_s9 + $0x10] sm:$0xff]  }
 0x473   : > { %v1144_v39 = vpop.f32.mrb[14].mxu1  ;;  %v4224_v38 = vld [vmem:[%s5056_s9 + $0x18] sm:$0xff]  }
 0x474   : > { %v3943_v40 = vpop.f32.mrb[15].mxu1  ;;  %v1152_v41 = vadd.f32 %v4588_v35, %v1147_v37 }
 0x476   : > { %v1154_v42 = vsel %vm1153_vm8, %v1152_v41, -inf }
 0x477   : > { %1155 = vmax.xlane.f32.xlu1 %v1154_v42 }
 0x504   : > { %v1156_v43 = vpop.xlane.xlu1 %1155 }
 0x505   : > { %v1157_v44 = vsub.f32 %v1152_v41, %v1156_v43  ;;  %v3640_v43 = vld [vmem:[%s5057_s10 + $0x1] ss:$0 sm:$0xff] }
 0x507   : > { %v1158_v45 = vmul.f32 1.442695, %v1157_v44 }
 0x509   : > { %4257 = vpow2.f32 %v1158_v45 }
 0x513   : > { %v4258_v12 = vpop.eup %4257 }
 0x514   : > { %v1160_v46 = vsel %vm1153_vm8, %v4258_v12, 0.0 }
 0x515   : > { %1161 = vadd.xlane.f32.xlu1 %v1160_v46 }
 0x5a2   : > { %v1162_v47 = vpop.xlane.xlu1 %1161 }
 0x5a3   : > { %4259 = vrcp.f32 %v1162_v47 }
 0x5ad   : > { %v4260_v48 = vpop.eup %4259 }
 0x5ae   : > { %v1164_v50 = vmul.f32 %v4260_v48, %v4258_v12 }
 0x5b0   : > { %v1165_v51 = vpack.c.bf16 %v1164_v50, %v1164_v50 }
 0x5b2   : > { %3947 = vmatmul.mubr.msk.bf16.vlgmr.msra.gmra.mrb[16].mxu1 %vm1153_vm8, %v1165_v51 }
 0x5b3   : > { %3951 = vmatpush3.bf16.xpose.msra.mxu1 %v1223_v52  ;;  %3952 = vmatprep.mubr.msk.bf16.mxu1 %vm4323_vm1, %v4322_v2 }
 0x5b4   : > { %3962 = vmatprep.subr.bf16.mxu1 %v4322_v2 }
 0x5ba   : > { %3953 = vmatmul.mubr.msk.bf16.vlgmr.msra.gmra.mrb[20].mxu1 %vm1100_vm6, %v1217_v54 }
 0x5bb   : > { %3963 = vmatpush3.bf16.msra.mxu1 %v4219_v53  ;;  %3966 = vmatprep.mubr.msk.bf16.mxu1 %vm4323_vm1, %v4322_v2 }
 0x5bc   : > { %3964 = vmatprep.subr.bf16.mxu1 %v4322_v2 }
 0x5bf   : > { %3965 = vmatpush3.bf16.msra.mxu1 %v4220_v55 }
 0x5c0   : > { %3978 = vmatprep.subr.bf16.mxu1 %v4322_v2 }
 0x5c2   : > { %3967 = vmatmul.mubr.msk.bf16.vlgmr.msra.gmra.mrb[24].mxu1 %vm854_vm5, %v4530_v59 }
 0x5c3   : > { %3979 = vmatpush3.bf16.msra.mxu1 %v4221_v58  ;;  %3982 = vmatprep.mubr.msk.bf16.mxu1 %vm4323_vm1, %v4322_v2 }
 0x5c4   : > { %3980 = vmatprep.subr.bf16.mxu1 %v4322_v2 }
 0x5c7   : > { %3981 = vmatpush3.bf16.msra.mxu1 %v4222_v60 }
 0x5c8   : > { %3992 = vmatprep.subr.bf16.mxu1 %v4322_v2 }
 0x5ca   : > { %3983 = vmatmul.mubr.msk.bf16.vlgmr.msra.gmra.mrb[28].mxu1 %vm854_vm5, %v4530_v59 }
 0x5cb   : > { %3994 = vmatprep.mubr.msk.bf16.mxu1 %vm4323_vm1, %v4322_v2 }
 0x685   : > { %v4627_v61 = vpop.f32.mrb[16].mxu1 }
 0x686   : > { %v3948_v62 = vpop.f32.mrb[17].mxu1 }
 0x687   : > { %v1211_v63 = vpop.f32.mrb[18].mxu1 }
 0x688   : > { %v3949_v1 = vpop.f32.mrb[19].mxu1 }
 0x68d   : > { %v1259_v4 = vpop.f32.mrb[20].mxu1 }
 0x68e   : > { %v1265_v5 = vmul.f32 0.25, %v1259_v4  ;;  %v3954_v6 = vpop.f32.mrb[21].mxu1 }
 0x68f   : > { %v1262_v7 = vpop.f32.mrb[22].mxu1  ;;  %v4226_v6 = vld [vmem:[%s5060_s13 + $0x8] sm:$0xff]  }
 0x690   : > { %v3955_v8 = vpop.f32.mrb[23].mxu1  ;;  %v1270_v9 = vadd.f32 %v4629_v3, %v1265_v5 }
 0x692   : > { %v1271_v10 = vsel %vm1153_vm8, %v1270_v9, -inf }
 0x693   : > { %1272 = vmax.xlane.f32.xlu1 %v1271_v10  ;;  %v4681_v10 = vld [vmem:[%s5060_s13] sm:$0xff]  }
 0x695   : > { %v1390_v11 = vpop.f32.mrb[24].mxu1 }
 0x696   : > { %v3968_v13 = vpop.f32.mrb[25].mxu1  ;;  %v1391_v50 = vadd.f32 %v3631_v14, %v1390_v11 }
 0x697   : > { %v1393_v15 = vpop.f32.mrb[26].mxu1 }
 0x698   : > { %v4636_v16 = vadd.f32 %v3631_v14, %v1393_v15  ;;  %v3969_v17 = vpop.f32.mrb[27].mxu1  ;;  %v1529_v51 = vpack.c.bf16 %v1391_v50, %v1391_v50  ;;  %v1216_v14 = vpack.c.bf16 %v4627_v61, %v4627_v61 }
 0x69d   : > { %v1522_v19 = vpop.f32.mrb[28].mxu1 }
 0x69e   : > { %v1523_v20 = vadd.f32 %v3649_v18, %v1522_v19  ;;  %v3984_v21 = vpop.f32.mrb[29].mxu1 }
 0x69f   : > { %v1525_v22 = vpop.f32.mrb[30].mxu1 }
 0x6a0   : > { %v1591_v23 = vpack.c.bf16 %v1523_v20, %v1523_v20  ;;  %v4641_v24 = vadd.f32 %v3649_v18, %v1525_v22  ;;  %v3985_v25 = vpop.f32.mrb[31].mxu1 }
 0x6a2   : > { %v1596_v26 = vsel %vm1170_vm7, %v1591_v23, 0  ;;  %v1802_v13 = vpack.c.bf16 %v4641_v24, %v4641_v24  ;;  %v1740_v24 = vpack.c.bf16 %v4636_v16, %v4636_v16  ;;  %v3665_v16 = vld [vmem:[%s5061_s14] ss:$0 sm:$0xff] }
 0x6a3   : > { %3993 = vmatpush3.bf16.msra.mxu1 %v1596_v26 }
 0x6a4   : > { %4004 = vmatprep.subr.bf16.mxu1 %v4322_v2  ;;  %v1807_v15 = vsel %vm1170_vm7, %v1802_v13, 0 }
 0x720   : > { %v1273_v27 = vpop.xlane.xlu1 %1272 }
 0x721   : > { %v1274_v28 = vsub.f32 %v1270_v9, %v1273_v27 }
 0x723   : > { %v1275_v29 = vmul.f32 1.442695, %v1274_v28 }
 0x725   : > { %4261 = vpow2.f32 %v1275_v29 }
 0x72f   : > { %v4262_v30 = vpop.eup %4261 }
 0x730   : > { %v1277_v31 = vsel %vm1153_vm8, %v4262_v30, 0.0 }
 0x731   : > { %1278 = vadd.xlane.f32.xlu1 %v1277_v31 }
 0x7be   : > { %v1279_v32 = vpop.xlane.xlu1 %1278 }
 0x7bf   : > { %4263 = vrcp.f32 %v1279_v32 }
 0x7c9   : > { %v4264_v33 = vpop.eup %4263 }
 0x7ca   : > { %v1281_v34 = vmul.f32 %v4264_v33, %v4262_v30 }
 0x7cc   : > { %v1282_v37 = vpack.c.bf16 %v1281_v34, %v1281_v34 }
 0x7ce   : > { %3959 = vmatmul.mubr.msk.bf16.vlgmr.msra.gmra.mrb[4].mxu0 %vm1153_vm8, %v1282_v37 }
 0x7cf   : > { %3971 = vmatpush3.bf16.msra.mxu0 %v4223_v36  ;;  %3974 = vmatprep.mubr.msk.bf16.mxu0 %vm4323_vm1, %v4322_v2 }
 0x7d0   : > { %3972 = vmatprep.subr.bf16.mxu0 %v4322_v2 }
 0x7d3   : > { %3973 = vmatpush3.bf16.msra.mxu0 %v4224_v38 }
 0x7d4   : > { %3986 = vmatprep.subr.bf16.mxu0 %v4322_v2 }
 0x7d6   : > { %3975 = vmatmul.mubr.msk.bf16.vlgmr.msra.gmra.mrb[8].mxu0 %vm854_vm5, %v4530_v59 }
 0x7d7   : > { %3988 = vmatprep.mubr.msk.bf16.mxu0 %vm4323_vm1, %v4322_v2 }
 0x8a1   : > { %v4661_v39 = vpop.f32.mrb[4].mxu0 }
 0x8a2   : > { %v3960_v40 = vpop.f32.mrb[5].mxu0 }
 0x8a3   : > { %v1327_v41 = vpop.f32.mrb[6].mxu0 }
 0x8a4   : > { %v3961_v42 = vpop.f32.mrb[7].mxu0 }
 0x8a9   : > { %v1456_v44 = vpop.f32.mrb[8].mxu0 }
 0x8aa   : > { %v1457_v45 = vadd.f32 %v3640_v43, %v1456_v44  ;;  %v3976_v12 = vpop.f32.mrb[9].mxu0 }
 0x8ab   : > { %v1459_v46 = vpop.f32.mrb[10].mxu0 }
 0x8ac   : > { %v1530_v47 = vpack.c.bf16 %v1457_v45, %v1457_v45  ;;  %v1460_v48 = vadd.f32 %v3640_v43, %v1459_v46  ;;  %v3977_v49 = vpop.f32.mrb[11].mxu0 }
 0x8ae   : > { %v1535_v59 = vsel %vm1100_vm6, %v1530_v47, 0  ;;  %v1741_v17 = vpack.c.bf16 %v1460_v48, %v1460_v48 }
 0x8af   : > { %3987 = vmatpush3.bf16.xpose.msra.mxu0 %v1535_v59 }
 0x8b0   : > { %3998 = vmatprep.subr.bf16.mxu0 %v4322_v2  ;;  %v1746_v22 = vsel %vm1100_vm6, %v1741_v17, 0 }
 0x8b6   : > { %3989 = vmatmul.mubr.msk.bf16.vlgmr.msra.gmra.mrb[12].mxu0 %vm1100_vm6, %v1529_v51 }
 0x8b7   : > { %4000 = vmatprep.mubr.msk.bf16.mxu0 %vm4323_vm1, %v4322_v2  ;;  %3999 = vmatpush3.bf16.msra.mxu0 %v4226_v6 }
 0x8b8   : > { %4010 = vmatprep.subr.bf16.mxu0 %v4322_v2 }
 0x989   : > { %v1571_v52 = vpop.f32.mrb[12].mxu0 }
 0x98a   : > { %v1577_v53 = vmul.f32 0.25, %v1571_v52  ;;  %v3990_v54 = vpop.f32.mrb[13].mxu0 }
 0x98b   : > { %v1574_v55 = vpop.f32.mrb[14].mxu0 }
 0x98c   : > { %v3991_v58 = vpop.f32.mrb[15].mxu0  ;;  %v1578_v60 = vadd.f32 %v1577_v53, %v4588_v35 }
 0x98d   : > { %v1330_v58 = vpack.c.bf16 %v4661_v39, %v4661_v39 }
 0x98e   : > { %v1579_v62 = vsel %vm1153_vm8, %v1578_v60, -inf }
 0x98f   : > { %1580 = vmax.xlane.f32.xlu1 %v1579_v62 }
 0xa1c   : > { %v1581_v63 = vpop.xlane.xlu1 %1580 }
 0xa1d   : > { %v1582_v0 = vsub.f32 %v1578_v60, %v1581_v63 }
 0xa1f   : > { %v1583_v1 = vmul.f32 1.442695, %v1582_v0 }
 0xa21   : > { %4265 = vpow2.f32 %v1583_v1 }
 0xa2b   : > { %v4266_v4 = vpop.eup %4265 }
 0xa2c   : > { %v1585_v5 = vsel %vm1153_vm8, %v4266_v4, 0.0 }
 0xa2d   : > { %1586 = vadd.xlane.f32.xlu1 %v1585_v5 }
 0xaba   : > { %v1587_v7 = vpop.xlane.xlu1 %1586 }
 0xabb   : > { %4267 = vrcp.f32 %v1587_v7 }
 0xac5   : > { %v4268_v8 = vpop.eup %4267 }
 0xac6   : > { %v1589_v9 = vmul.f32 %v4268_v8, %v4266_v4 }
 0xac8   : > { %v1590_v11 = vpack.c.bf16 %v1589_v9, %v1589_v9 }
 0xaca   : > { %3995 = vmatmul.mubr.msk.bf16.vlgmr.msra.gmra.mrb[32].mxu1 %vm1153_vm8, %v1590_v11 }
 0xacb   : > { %4005 = vmatpush3.bf16.msra.mxu1 %v4681_v10  ;;  %4006 = vmatprep.mubr.msk.bf16.mxu1 %vm4323_vm1, %v4322_v2 }
 0xacc   : > { %4016 = vmatprep.subr.bf16.mxu1 %v4322_v2 }
 0xad2   : > { %4007 = vmatmul.mubr.msk.bf16.vlgmr.msra.gmra.mrb[36].mxu1 %vm1100_vm6, %v1216_v14 }
 0xad3   : > { %4017 = vmatpush3.bf16.msra.mxu1 %v1807_v15  ;;  %4018 = vmatprep.mubr.msk.bf16.mxu1 %vm4323_vm1, %v4322_v2 }
 0xad4   : > { %4028 = vmatprep.subr.bf16.mxu1 %v4322_v2 }
 0xb9d   : > { %v1632_v18 = vpop.f32.mrb[32].mxu1 }
 0xb9e   : > { %v1641_v19 = vpack.c.bf16 %v1632_v18, %v1632_v18  ;;  %v3996_v20 = vpop.f32.mrb[33].mxu1 }
 0xb9f   : > { %v1635_v21 = vpop.f32.mrb[34].mxu1 }
 0xba0   : > { %v3997_v23 = vpop.f32.mrb[35].mxu1  ;;  %4001 = vmatmul.mubr.msk.bf16.vlgmr.msra.gmra.mrb[16].mxu0 %vm1100_vm6, %v1641_v19 }
 0xba1   : > { %4011 = vmatpush3.bf16.xpose.msra.mxu0 %v1746_v22  ;;  %4012 = vmatprep.mubr.msk.bf16.mxu0 %vm4323_vm1, %v4322_v2  ;;  %v4227_v22 = vld [vmem:[%s5064_s17] sm:$0xff]   ;;  %v4228_v23 = vld [vmem:[%s5064_s17 + $0x8] sm:$0xff]  }
 0xba2   : > { %4022 = vmatprep.subr.bf16.mxu0 %v4322_v2 }
 0xba5   : > { %v1734_v61 = vpop.f32.mrb[36].mxu1 }
 0xba6   : > { %v4008_v25 = vpop.f32.mrb[37].mxu1 }
 0xba7   : > { %v1737_v26 = vpop.f32.mrb[38].mxu1 }
 0xba8   : > { %v4009_v27 = vpop.f32.mrb[39].mxu1  ;;  %4013 = vmatmul.mubr.msk.bf16.vlgmr.msra.gmra.mrb[20].mxu0 %vm1100_vm6, %v1740_v24 }
 0xba9   : > { %4023 = vmatpush3.bf16.msra.mxu0 %v4226_v6  ;;  %4024 = vmatprep.mubr.msk.bf16.mxu0 %vm4323_vm1, %v4322_v2 }
 0xbaa   : > { %4034 = vmatprep.subr.bf16.mxu0 %v4322_v2 }
 0xc73   : > { %v1685_v28 = vpop.f32.mrb[16].mxu0 }
 0xc74   : > { %v1735_v29 = vadd.f32 %v1734_v61, %v1685_v28  ;;  %v4002_v30 = vpop.f32.mrb[17].mxu0 }
 0xc75   : > { %v1688_v31 = vpop.f32.mrb[18].mxu0  ;;  %v3666_v30 = vld [vmem:[%s5062_s15] ss:$0 sm:$0xff] }
 0xc76   : > { %v4003_v32 = vpop.f32.mrb[19].mxu0  ;;  %v1943_v34 = vadd.f32 %v3665_v16, %v1735_v29 }
 0xc78   : > { %v1945_v43 = vadd.f32 %v1943_v34, %v4521_v56 }
 0xc7a   : > { %v1949_v44 = vsel %vm854_vm5, %v1945_v43, 0.0 }
 0xc7b   : > { %v1782_v33 = vpop.f32.mrb[20].mxu0 }
 0xc7c   : > { %v1788_v36 = vmul.f32 0.25, %v1782_v33  ;;  %v4014_v37 = vpop.f32.mrb[21].mxu0  ;;  %v3667_v33 = vld [vmem:[%s5063_s16] ss:$0 sm:$0xff] }
 0xc7d   : > { %v1785_v38 = vpop.f32.mrb[22].mxu0 }
 0xc7e   : > { %v4015_v40 = vpop.f32.mrb[23].mxu0  ;;  %v1789_v41 = vadd.f32 %v1788_v36, %v4629_v3 }
 0xc7f   : > { %v4229_v40 = vld [vmem:[%s5066_s19] sm:$0xff]  }
 0xc80   : > { %v1790_v42 = vsel %vm1153_vm8, %v1789_v41, -inf }
 0xc81   : > { %1791 = vmax.xlane.f32.xlu1 %v1790_v42  ;;  %v4231_v42 = vld [vmem:[%s5066_s19 + $0x10] sm:$0xff]  }
 0xc85   : > { %1950 = vadd.xlane.f32.xlu1 %v1949_v44  ;;  %v3668_v44 = vld [vmem:[%s5065_s18] ss:$0 sm:$0xff] }
 0xd0e   : > { %v1792_v45 = vpop.xlane.xlu1 %1791 }
 0xd0f   : > { %v1793_v12 = vsub.f32 %v1789_v41, %v1792_v45  ;;  %v4230_v41 = vld [vmem:[%s5066_s19 + $0x8] sm:$0xff]  }
 0xd11   : > { %v1794_v46 = vmul.f32 1.442695, %v1793_v12 }
 0xd12   : > { %v1951_v47 = vpop.xlane.xlu1 %1950 }
 0xd13   : > { %4269 = vpow2.f32 %v1794_v46  ;;  %v1955_v48 = vmul.f32 0.03125, %v1951_v47 }
 0xd15   : > { %v1957_v49 = vsub.f32 %v1945_v43, %v1955_v48  ;;  %v4232_v43 = vld [vmem:[%s5066_s19 + $0x18] sm:$0xff]  }
 0xd17   : > { %v1959_v59 = vmul.f32 %v1957_v49, %v1957_v49 }
 0xd19   : > { %v1961_v50 = vsel %vm854_vm5, %v1959_v59, 0.0 }
 0xd1a   : > { %1962 = vadd.xlane.f32.xlu1 %v1961_v50 }
 0xd1d   : > { %v4270_v51 = vpop.eup %4269 }
 0xd1e   : > { %v1796_v52 = vsel %vm1153_vm8, %v4270_v51, 0.0 }
 0xd1f   : > { %1797 = vadd.xlane.f32.xlu0 %v1796_v52 }
 0xdac   : > { %v1798_v56 = vpop.xlane.xlu0 %1797 }
 0xdad   : > { %4271 = vrcp.f32 %v1798_v56 }
 0xdb7   : > { %v4272_v53 = vpop.eup %4271 }
 0xdb8   : > { %v1800_v54 = vmul.f32 %v4272_v53, %v4270_v51 }
 0xdba   : > { %v1801_v55 = vpack.c.bf16 %v1800_v54, %v1800_v54 }
 0xdbc   : > { %4019 = vmatmul.mubr.msk.bf16.vlgmr.msra.gmra.mrb[40].mxu1 %vm1153_vm8, %v1801_v55 }
 0xdbd   : > { %4029 = vmatpush3.bf16.msra.mxu1 %v4681_v10  ;;  %4030 = vmatprep.mubr.msk.bf16.mxu1 %vm4323_vm1, %v4322_v2 }
 0xdbe   : > { %4042 = vmatprep.subr.bf16.mxu1 %v4322_v2 }
 0xdc4   : > { %4031 = vmatmul.mubr.msk.bf16.vlgmr.msra.gmra.mrb[44].mxu1 %vm1100_vm6, %v1330_v58 }
 0xdc5   : > { %4050 = vmatprep.mubr.msk.bf16.mxu1 %vm4323_vm1, %v4322_v2  ;;  %4043 = vmatpush3.bf16.msra.mxu1 %v4229_v40 }
 0xdc6   : > { %4044 = vmatprep.subr.bf16.mxu1 %v4322_v2 }
 0xdc9   : > { %4045 = vmatpush3.bf16.msra.mxu1 %v4230_v41  ;;  %v3678_v41 = vld [vmem:[%s5068_s21] ss:$0 sm:$0xff] }
 0xdca   : > { %4046 = vmatprep.subr.bf16.mxu1 %v4322_v2 }
 0xdcd   : > { %4047 = vmatpush3.bf16.msra.mxu1 %v4231_v42 }
 0xdce   : > { %4048 = vmatprep.subr.bf16.mxu1 %v4322_v2 }
 0xdd1   : > { %4049 = vmatpush3.bf16.msra.mxu1 %v4232_v43 }
 0xdd2   : > { %4070 = vmatprep.subr.bf16.mxu1 %v4322_v2 }
 0xe8f   : > { %v1843_v60 = vpop.f32.mrb[40].mxu1 }
 0xe90   : > { %v1849_v62 = vpack.c.bf16 %v1843_v60, %v1843_v60  ;;  %v4020_v63 = vpop.f32.mrb[41].mxu1 }
 0xe91   : > { %v1846_v0 = vpop.f32.mrb[42].mxu1 }
 0xe92   : > { %v4021_v1 = vpop.f32.mrb[43].mxu1  ;;  %4025 = vmatmul.mubr.msk.bf16.vlgmr.msra.gmra.mrb[24].mxu0 %vm1100_vm6, %v1849_v62 }
 0xe93   : > { %4038 = vmatprep.mubr.msk.bf16.mxu0 %vm4323_vm1, %v4322_v2  ;;  %4035 = vmatpush3.bf16.msra.mxu0 %v4227_v22 }
 0xe94   : > { %4036 = vmatprep.subr.bf16.mxu0 %v4322_v2 }
 0xe97   : > { %v1930_v4 = vpop.f32.mrb[44].mxu1  ;;  %4037 = vmatpush3.bf16.msra.mxu0 %v4228_v23 }
 0xe98   : > { %v4032_v5 = vpop.f32.mrb[45].mxu1  ;;  %4054 = vmatprep.subr.bf16.mxu0 %v4322_v2 }
 0xe99   : > { %v1933_v6 = vpop.f32.mrb[46].mxu1 }
 0xe9a   : > { %v4033_v7 = vpop.f32.mrb[47].mxu1 }
 0xf65   : > { %v1887_v39 = vpop.f32.mrb[24].mxu0 }
 0xf66   : > { %v1931_v8 = vadd.f32 %v1930_v4, %v1887_v39  ;;  %v4026_v9 = vpop.f32.mrb[25].mxu0 }
 0xf67   : > { %v1890_v10 = vpop.f32.mrb[26].mxu0 }
 0xf68   : > { %v1944_v11 = vadd.f32 %v3665_v16, %v1931_v8  ;;  %v4027_v13 = vpop.f32.mrb[27].mxu0  ;;  %v3672_v8 = vld [vmem:[%s5067_s20] ss:$0 sm:$0xff] }
 0xf6a   : > { %v1946_v14 = vadd.f32 %v1944_v11, %v4523_v57  ;;  %v1963_v57 = vpop.xlane.xlu1 %1962 }
 0xf6b   : > { %v1967_v61 = vmul.f32 0.03125, %v1963_v57 }
 0xf6c   : > { %v1952_v15 = vsel %vm854_vm5, %v1946_v14, 0.0 }
 0xf6d   : > { %1953 = vadd.xlane.f32.xlu0 %v1952_v15  ;;  %v1969_v24 = vadd.f32 1e-12, %v1967_v61 }
 0xf6f   : > { %4273 = vrsqrt.f32 %v1969_v24 }
 0xf79   : > { %v4274_v28 = vpop.eup %4273 }
 0xf7a   : > { %v1973_v29 = vmul.f32 %v4274_v28, %v1957_v49 }
 0xf7c   : > { %v1981_v32 = vmul.f32 %v3666_v30, %v1973_v29  ;;  %v4233_v29 = vld [vmem:[%s5085_s2 + $0x20] sm:$0xff]  }
 0xf7e   : > { %v1989_v36 = vadd.f32 %v3667_v33, %v1981_v32  ;;  %v4236_v32 = vld [vmem:[%s5058_s11 + $0x28] sm:$0xff]  }
 0xffa   : > { %v1954_v17 = vpop.xlane.xlu0 %1953 }
 0xffb   : > { %v1956_v18 = vmul.f32 0.03125, %v1954_v17 }
 0xffd   : > { %v1958_v19 = vsub.f32 %v1946_v14, %v1956_v18 }
 0xfff   : > { %v1960_v20 = vmul.f32 %v1958_v19, %v1958_v19 }
0x1001   : > { %v1964_v21 = vsel %vm854_vm5, %v1960_v20, 0.0 }
0x1002   : > { %1965 = vadd.xlane.f32.xlu0 %v1964_v21 }
0x108f   : > { %v1966_v25 = vpop.xlane.xlu0 %1965 }
0x1090   : > { %v1968_v26 = vmul.f32 0.03125, %v1966_v25 }
0x1092   : > { %v1970_v27 = vadd.f32 1e-12, %v1968_v26 }
0x1094   : > { %4275 = vrsqrt.f32 %v1970_v27 }
0x109e   : > { %v4276_v31 = vpop.eup %4275 }
0x109f   : > { %v1974_v16 = vmul.f32 %v4276_v31, %v1958_v19  ;;  %v4235_v31 = vld [vmem:[%s5085_s2 + $0x28] sm:$0xff]  }
0x10a1   : > { %v1982_v34 = vmul.f32 %v3666_v30, %v1974_v16  ;;  %v4234_v30 = vld [vmem:[%s5058_s11 + $0x20] sm:$0xff]  }
0x10a3   : > { %v1990_v37 = vadd.f32 %v3667_v33, %v1982_v34 }
0x10a5   : > { %v1995_v38 = vpack.c.bf16 %v1990_v37, %v1989_v36 }
0x10a7   : > { %4039 = vmatmul.mubr.msk.bf16.vlgmr.msra.gmra.mrb[28].mxu0 %vm854_vm5, %v1995_v38 }
0x10a8   : > { %4058 = vmatprep.mubr.msk.bf16.mxu0 %vm4323_vm1, %v4322_v2  ;;  %4055 = vmatpush3.bf16.msra.mxu0 %v4233_v29 }
0x10a9   : > { %4056 = vmatprep.subr.bf16.mxu0 %v4322_v2 }
0x10ac   : > { %4057 = vmatpush3.bf16.msra.mxu0 %v4235_v31 }
0x10ad   : > { %4062 = vmatprep.subr.bf16.mxu0 %v4322_v2 }
0x117a   : > { %v2052_v45 = vpop.f32.mrb[28].mxu0 }
0x117b   : > { %v2053_v12 = vadd.f32 %v3668_v44, %v2052_v45  ;;  %v4040_v46 = vpop.f32.mrb[29].mxu0 }
0x117c   : > { %v2055_v47 = vpop.f32.mrb[30].mxu0 }
0x117d   : > { %v2059_v48 = vmul.f32 %v2053_v12, %v2053_v12  ;;  %v2056_v49 = vadd.f32 %v3668_v44, %v2055_v47  ;;  %v4041_v59 = vpop.f32.mrb[31].mxu0 }
0x117f   : > { %v2061_v50 = vmul.f32 %v2059_v48, %v2053_v12  ;;  %v2060_v51 = vmul.f32 %v2056_v49, %v2056_v49 }
0x1181   : > { %v2063_v52 = vmul.f32 0.044715, %v2061_v50  ;;  %v2062_v56 = vmul.f32 %v2060_v51, %v2056_v49  ;;  %v4238_v50 = vld [vmem:[%s5056_s9 + $0x28] sm:$0xff]   ;;  %v3703_v51 = vld [vmem:[%s5059_s12 + $0x2] ss:$0 sm:$0xff] }
0x1183   : > { %v2065_v53 = vadd.f32 %v2063_v52, %v2053_v12  ;;  %v2064_v54 = vmul.f32 0.044715, %v2062_v56 }
0x1185   : > { %v2067_v55 = vmul.f32 0.7978846, %v2065_v53  ;;  %v2066_v58 = vadd.f32 %v2064_v54, %v2056_v49 }
0x1187   : > { %4277 = vtanh.f32 %v2067_v55  ;;  %v2068_v60 = vmul.f32 0.7978846, %v2066_v58 }
0x1189   : > { %4279 = vtanh.f32 %v2068_v60 }
0x1191   : > { %v4278_v62 = vpop.eup %4277 }
0x1192   : > { %v2071_v63 = vadd.f32 1.0, %v4278_v62 }
0x1193   : > { %v4280_v0 = vpop.eup %4279 }
0x1194   : > { %v2073_v1 = vmul.f32 0.5, %v2071_v63  ;;  %v2072_v4 = vadd.f32 1.0, %v4280_v0 }
0x1196   : > { %v2074_v5 = vmul.f32 0.5, %v2072_v4  ;;  %v2075_v6 = vmul.f32 %v2073_v1, %v2053_v12  ;;  %v3679_v12 = vld [vmem:[%s5069_s22] ss:$0 sm:$0xff] }
0x1198   : > { %v2076_v7 = vmul.f32 %v2074_v5, %v2056_v49  ;;  %v4237_v49 = vld [vmem:[%s5056_s9 + $0x20] sm:$0xff]  }
0x1199   : > { %v3694_v5 = vld [vmem:[%s5057_s10 + $0x2] ss:$0 sm:$0xff] }
0x119a   : > { %v2085_v39 = vpack.c.bf16 %v2076_v7, %v2075_v6 }
0x119c   : > { %4051 = vmatmul.mubr.msk.bf16.vlgmr.msra.gmra.mrb[48].mxu1 %vm2117_vm9, %v2085_v39 }
0x119d   : > { %4074 = vmatprep.mubr.msk.bf16.mxu1 %vm4323_vm1, %v4322_v2  ;;  %4071 = vmatpush3.bf16.msra.mxu1 %v4234_v30 }
0x119e   : > { %4072 = vmatprep.subr.bf16.mxu1 %v4322_v2 }
0x11a1   : > { %4073 = vmatpush3.bf16.msra.mxu1 %v4236_v32 }
0x11a2   : > { %4084 = vmatprep.subr.bf16.mxu1 %v4322_v2 }
0x126f   : > { %v2155_v9 = vpop.f32.mrb[48].mxu1 }
0x1270   : > { %v2156_v10 = vadd.f32 %v3672_v8, %v2155_v9  ;;  %v4052_v11 = vpop.f32.mrb[49].mxu1 }
0x1271   : > { %v2158_v13 = vpop.f32.mrb[50].mxu1  ;;  %v3685_v11 = vld [vmem:[%s5055_s8 + $0x2] ss:$0 sm:$0xff] }
0x1272   : > { %v2159_v14 = vadd.f32 %v3672_v8, %v2158_v13  ;;  %v4053_v15 = vpop.f32.mrb[51].mxu1  ;;  %v2162_v17 = vadd.f32 %v2156_v10, %v1989_v36 }
0x1274   : > { %v2166_v18 = vsel %vm854_vm5, %v2162_v17, 0.0  ;;  %v2163_v19 = vadd.f32 %v2159_v14, %v1990_v37 }
0x1275   : > { %2167 = vadd.xlane.f32.xlu1 %v2166_v18 }
0x1276   : > { %v2169_v20 = vsel %vm854_vm5, %v2163_v19, 0.0 }
0x1277   : > { %2170 = vadd.xlane.f32.xlu0 %v2169_v20 }
0x1302   : > { %v2168_v21 = vpop.xlane.xlu1 %2167 }
0x1303   : > { %v2172_v22 = vmul.f32 0.03125, %v2168_v21  ;;  %v4239_v21 = vld [vmem:[%s5085_s2 + $0x30] sm:$0xff]  }
0x1304   : > { %v2171_v23 = vpop.xlane.xlu0 %2170 }
0x1305   : > { %v2174_v57 = vsub.f32 %v2162_v17, %v2172_v22  ;;  %v2173_v61 = vmul.f32 0.03125, %v2171_v23  ;;  %v4240_v23 = vld [vmem:[%s5085_s2 + $0x38] sm:$0xff]  }
0x1307   : > { %v2175_v24 = vsub.f32 %v2163_v19, %v2173_v61  ;;  %v2176_v25 = vmul.f32 %v2174_v57, %v2174_v57  ;;  %v4242_v61 = vld [vmem:[%s5058_s11 + $0x38] sm:$0xff]  }
0x1309   : > { %v2178_v26 = vsel %vm854_vm5, %v2176_v25, 0.0  ;;  %v2177_v27 = vmul.f32 %v2175_v24, %v2175_v24 }
0x130a   : > { %2179 = vadd.xlane.f32.xlu1 %v2178_v26 }
0x130b   : > { %v2181_v28 = vsel %vm854_vm5, %v2177_v27, 0.0 }
0x130c   : > { %2182 = vadd.xlane.f32.xlu0 %v2181_v28 }
0x1397   : > { %v2180_v16 = vpop.xlane.xlu1 %2179 }
0x1398   : > { %v2184_v33 = vmul.f32 0.03125, %v2180_v16 }
0x1399   : > { %v2183_v34 = vpop.xlane.xlu0 %2182 }
0x139a   : > { %v2186_v36 = vadd.f32 1e-12, %v2184_v33  ;;  %v2185_v37 = vmul.f32 0.03125, %v2183_v34 }
0x139c   : > { %4281 = vrsqrt.f32 %v2186_v36  ;;  %v2187_v38 = vadd.f32 1e-12, %v2185_v37 }
0x139e   : > { %4283 = vrsqrt.f32 %v2187_v38 }
0x13a6   : > { %v4282_v40 = vpop.eup %4281 }
0x13a7   : > { %v2190_v42 = vmul.f32 %v4282_v40, %v2174_v57  ;;  %v4241_v57 = vld [vmem:[%s5058_s11 + $0x30] sm:$0xff]  }
0x13a8   : > { %v4284_v43 = vpop.eup %4283 }
0x13a9   : > { %v2198_v44 = vmul.f32 %v3678_v41, %v2190_v42  ;;  %v2191_v45 = vmul.f32 %v4284_v43, %v2175_v24 }
0x13ab   : > { %v2199_v46 = vmul.f32 %v3678_v41, %v2191_v45  ;;  %v4801_v47 = vadd.f32 %v3679_v12, %v2198_v44  ;;  %v4885_v41 = vld [vmem:[%s5055_s8 + $0x3] ss:$0 sm:$0xff] }
0x13ac   : > { %v3736_v45 = vld [vmem:[%s5059_s12 + $0x3] ss:$0 sm:$0xff] }
0x13ad   : > { %v4803_v48 = vadd.f32 %v3679_v12, %v2199_v46 }
0x13af   : > { %v4810_v59 = vpack.c.bf16 %v4803_v48, %v4801_v47 }
0x13b1   : > { %4059 = vmatmul.mubr.msk.bf16.vlgmr.msra.gmra.mrb[32].mxu0 %vm854_vm5, %v4810_v59  ;;  %4075 = vmatmul.mubr.msk.bf16.vlgmr.msra.gmra.mrb[52].mxu1 %vm854_vm5, %v4810_v59 }
0x13b2   : > { %4063 = vmatpush3.bf16.msra.mxu0 %v4237_v49  ;;  %4066 = vmatprep.mubr.msk.bf16.mxu0 %vm4323_vm1, %v4322_v2 }
0x13b3   : > { %4064 = vmatprep.subr.bf16.mxu0 %v4322_v2  ;;  %4086 = vmatprep.mubr.msk.bf16.mxu1 %vm4323_vm1, %v4322_v2 }
0x13b6   : > { %4065 = vmatpush3.bf16.msra.mxu0 %v4238_v50 }
0x13b7   : > { %4078 = vmatprep.subr.bf16.mxu0 %v4322_v2 }
0x13b9   : > { %4067 = vmatmul.mubr.msk.bf16.vlgmr.msra.gmra.mrb[36].mxu0 %vm854_vm5, %v4810_v59 }
0x13ba   : > { %4080 = vmatprep.mubr.msk.bf16.mxu0 %vm4323_vm1, %v4322_v2 }
0x1484   : > { %v2271_v52 = vpop.f32.mrb[32].mxu0  ;;  %v2403_v56 = vpop.f32.mrb[52].mxu1 }
0x1485   : > { %v2404_v53 = vadd.f32 %v3703_v51, %v2403_v56  ;;  %v4060_v54 = vpop.f32.mrb[33].mxu0  ;;  %v4076_v55 = vpop.f32.mrb[53].mxu1  ;;  %v2272_v15 = vadd.f32 %v3685_v11, %v2271_v52 }
0x1486   : > { %v2274_v58 = vpop.f32.mrb[34].mxu0  ;;  %v2406_v60 = vpop.f32.mrb[54].mxu1 }
0x1487   : > { %v2472_v62 = vpack.c.bf16 %v2404_v53, %v2404_v53  ;;  %v4832_v63 = vadd.f32 %v3703_v51, %v2406_v60  ;;  %v4061_v0 = vpop.f32.mrb[35].mxu0  ;;  %v4077_v1 = vpop.f32.mrb[55].mxu1  ;;  %v2410_v18 = vpack.c.bf16 %v2272_v15, %v2272_v15  ;;  %v2275_v20 = vadd.f32 %v3685_v11, %v2274_v58 }
0x1489   : > { %v2477_v4 = vsel %vm1170_vm7, %v2472_v62, 0  ;;  %v2523_v22 = vpack.c.bf16 %v2275_v20, %v2275_v20 }
0x148a   : > { %4085 = vmatpush3.bf16.msra.mxu1 %v2477_v4 }
0x148b   : > { %4096 = vmatprep.subr.bf16.mxu1 %v4322_v2 }
0x148c   : > { %v2337_v6 = vpop.f32.mrb[36].mxu0 }
0x148d   : > { %v2338_v7 = vadd.f32 %v3694_v5, %v2337_v6  ;;  %v4068_v39 = vpop.f32.mrb[37].mxu0 }
0x148e   : > { %v2340_v8 = vpop.f32.mrb[38].mxu0 }
0x148f   : > { %v2411_v9 = vpack.c.bf16 %v2338_v7, %v2338_v7  ;;  %v4069_v10 = vpop.f32.mrb[39].mxu0  ;;  %v2341_v14 = vadd.f32 %v3694_v5, %v2340_v8 }
0x1491   : > { %v2416_v13 = vsel %vm1100_vm6, %v2411_v9, 0  ;;  %v2524_v17 = vpack.c.bf16 %v2341_v14, %v2341_v14  ;;  %v2585_v9 = vpack.c.bf16 %v4832_v63, %v4832_v63  ;;  %v4244_v63 = vld [vmem:[%s5056_s9 + $0x38] sm:$0xff]  }
0x1492   : > { %4079 = vmatpush3.bf16.xpose.msra.mxu0 %v2416_v13 }
0x1493   : > { %4090 = vmatprep.subr.bf16.mxu0 %v4322_v2  ;;  %v2529_v19 = vsel %vm1100_vm6, %v2524_v17, 0  ;;  %v2590_v13 = vsel %vm1170_vm7, %v2585_v9, 0  ;;  %v4243_v17 = vld [vmem:[%s5056_s9 + $0x30] sm:$0xff]  }
0x1499   : > { %4081 = vmatmul.mubr.msk.bf16.vlgmr.msra.gmra.mrb[40].mxu0 %vm1100_vm6, %v2410_v18 }
0x149a   : > { %4091 = vmatpush3.bf16.xpose.msra.mxu0 %v2529_v19  ;;  %4092 = vmatprep.mubr.msk.bf16.mxu0 %vm4323_vm1, %v4322_v2 }
0x149b   : > { %4102 = vmatprep.subr.bf16.mxu0 %v4322_v2 }
0x14a1   : > { %4093 = vmatmul.mubr.msk.bf16.vlgmr.msra.gmra.mrb[44].mxu0 %vm1100_vm6, %v2523_v22 }
0x14a2   : > { %4103 = vmatpush3.bf16.msra.mxu0 %v4239_v21  ;;  %4106 = vmatprep.mubr.msk.bf16.mxu0 %vm4323_vm1, %v4322_v2 }
0x14a3   : > { %4104 = vmatprep.subr.bf16.mxu0 %v4322_v2 }
0x14a6   : > { %4105 = vmatpush3.bf16.msra.mxu0 %v4240_v23 }
0x14a7   : > { %4118 = vmatprep.subr.bf16.mxu0 %v4322_v2 }
0x14a9   : > { %4107 = vmatmul.mubr.msk.bf16.vlgmr.msra.gmra.mrb[48].mxu0 %vm854_vm5, %v4810_v59 }
0x14aa   : > { %4119 = vmatpush3.bf16.msra.mxu0 %v4241_v57  ;;  %4122 = vmatprep.mubr.msk.bf16.mxu0 %vm4323_vm1, %v4322_v2 }
0x14ab   : > { %4120 = vmatprep.subr.bf16.mxu0 %v4322_v2 }
0x14ae   : > { %4121 = vmatpush3.bf16.msra.mxu0 %v4242_v61 }
0x14af   : > { %4132 = vmatprep.subr.bf16.mxu0 %v4322_v2 }
0x14b1   : > { %4123 = vmatmul.mubr.msk.bf16.vlgmr.msra.gmra.mrb[52].mxu0 %vm854_vm5, %v4810_v59 }
0x14b2   : > { %4134 = vmatprep.mubr.msk.bf16.mxu0 %vm4323_vm1, %v4322_v2 }
0x156c   : > { %v2452_v24 = vpop.f32.mrb[40].mxu0 }
0x156d   : > { %v2458_v25 = vmul.f32 0.25, %v2452_v24  ;;  %v4082_v26 = vpop.f32.mrb[41].mxu0 }
0x156e   : > { %v2455_v27 = vpop.f32.mrb[42].mxu0 }
0x156f   : > { %v4083_v28 = vpop.f32.mrb[43].mxu0  ;;  %v2459_v29 = vadd.f32 %v2458_v25, %v4588_v35  ;;  %v3727_v25 = vld [vmem:[%s5057_s10 + $0x3] ss:$0 sm:$0xff] }
0x1571   : > { %v2460_v30 = vsel %vm1153_vm8, %v2459_v29, -inf }
0x1572   : > { %2461 = vmax.xlane.f32.xlu1 %v2460_v30 }
0x1574   : > { %v2565_v31 = vpop.f32.mrb[44].mxu0 }
0x1575   : > { %v2571_v32 = vmul.f32 0.25, %v2565_v31  ;;  %v4094_v16 = vpop.f32.mrb[45].mxu0 }
0x1576   : > { %v2568_v33 = vpop.f32.mrb[46].mxu0 }
0x1577   : > { %v4095_v34 = vpop.f32.mrb[47].mxu0  ;;  %v2572_v36 = vadd.f32 %v2571_v32, %v4629_v3 }
0x1579   : > { %v2573_v37 = vsel %vm1153_vm8, %v2572_v36, -inf }
0x157a   : > { %2574 = vmax.xlane.f32.xlu0 %v2573_v37 }
0x157c   : > { %v4880_v38 = vpop.f32.mrb[48].mxu0 }
0x157d   : > { %v4108_v40 = vpop.f32.mrb[49].mxu0  ;;  %v2693_v16 = vadd.f32 %v4885_v41, %v4880_v38 }
0x157e   : > { %v2695_v42 = vpop.f32.mrb[50].mxu0 }
0x157f   : > { %v4888_v43 = vadd.f32 %v4885_v41, %v2695_v42  ;;  %v4109_v44 = vpop.f32.mrb[51].mxu0  ;;  %v2831_v33 = vpack.c.bf16 %v2693_v16, %v2693_v16 }
0x1584   : > { %v2824_v12 = vpop.f32.mrb[52].mxu0 }
0x1585   : > { %v2825_v46 = vadd.f32 %v3736_v45, %v2824_v12  ;;  %v4124_v49 = vpop.f32.mrb[53].mxu0 }
0x1586   : > { %v2827_v50 = vpop.f32.mrb[54].mxu0 }
0x1587   : > { %v2893_v51 = vpack.c.bf16 %v2825_v46, %v2825_v46  ;;  %v4893_v52 = vadd.f32 %v3736_v45, %v2827_v50  ;;  %v4125_v56 = vpop.f32.mrb[55].mxu0  ;;  %v4246_v50 = vld [vmem:[%s5060_s13 + $0x18] sm:$0xff]  }
0x1589   : > { %v2898_v53 = vsel %vm1170_vm7, %v2893_v51, 0 }
0x158a   : > { %4133 = vmatpush3.bf16.msra.mxu0 %v2898_v53  ;;  %v4943_v53 = vld [vmem:[%s5060_s13 + $0x10] sm:$0xff]  }
0x158b   : > { %4144 = vmatprep.subr.bf16.mxu0 %v4322_v2 }
0x15ff   : > { %v2462_v54 = vpop.xlane.xlu1 %2461 }
0x1600   : > { %v2463_v55 = vsub.f32 %v2459_v29, %v2462_v54 }
0x1602   : > { %v2464_v58 = vmul.f32 1.442695, %v2463_v55  ;;  %v3104_v55 = vpack.c.bf16 %v4893_v52, %v4893_v52 }
0x1604   : > { %4285 = vpow2.f32 %v2464_v58 }
0x1607   : > { %v2575_v60 = vpop.xlane.xlu0 %2574 }
0x1608   : > { %v2576_v62 = vsub.f32 %v2572_v36, %v2575_v60  ;;  %v3109_v60 = vsel %vm1170_vm7, %v3104_v55, 0 }
0x160a   : > { %v2577_v0 = vmul.f32 1.442695, %v2576_v62 }
0x160c   : > { %4287 = vpow2.f32 %v2577_v0 }
0x160e   : > { %v4286_v1 = vpop.eup %4285 }
0x160f   : > { %v2466_v4 = vsel %vm1153_vm8, %v4286_v1, 0.0 }
0x1610   : > { %2467 = vadd.xlane.f32.xlu1 %v2466_v4 }
0x1616   : > { %v4288_v5 = vpop.eup %4287 }
0x1617   : > { %v2579_v6 = vsel %vm1153_vm8, %v4288_v5, 0.0 }
0x1618   : > { %2580 = vadd.xlane.f32.xlu0 %v2579_v6 }
0x169d   : > { %v2468_v7 = vpop.xlane.xlu1 %2467 }
0x169e   : > { %4289 = vrcp.f32 %v2468_v7 }
0x16a5   : > { %v2581_v39 = vpop.xlane.xlu0 %2580 }
0x16a6   : > { %4291 = vrcp.f32 %v2581_v39  ;;  %v3042_v39 = vpack.c.bf16 %v4888_v43, %v4888_v43  ;;  %v3753_v43 = vld [vmem:[%s5061_s14 + $0x1] ss:$0 sm:$0xff] }
0x16a8   : > { %v4290_v8 = vpop.eup %4289 }
0x16a9   : > { %v2470_v10 = vmul.f32 %v4290_v8, %v4286_v1 }
0x16ab   : > { %v2471_v11 = vpack.c.bf16 %v2470_v10, %v2470_v10 }
0x16ad   : > { %4087 = vmatmul.mubr.msk.bf16.vlgmr.msra.gmra.mrb[56].mxu1 %vm1153_vm8, %v2471_v11 }
0x16ae   : > { %4097 = vmatpush3.bf16.msra.mxu1 %v2590_v13  ;;  %4098 = vmatprep.mubr.msk.bf16.mxu1 %vm4323_vm1, %v4322_v2 }
0x16af   : > { %4110 = vmatprep.subr.bf16.mxu1 %v4322_v2 }
0x16b0   : > { %v4292_v14 = vpop.eup %4291 }
0x16b1   : > { %v2583_v15 = vmul.f32 %v4292_v14, %v4288_v5 }
0x16b3   : > { %v2584_v18 = vpack.c.bf16 %v2583_v15, %v2583_v15 }
0x16b5   : > { %4099 = vmatmul.mubr.msk.bf16.vlgmr.msra.gmra.mrb[60].mxu1 %vm1153_vm8, %v2584_v18 }
0x16b6   : > { %4111 = vmatpush3.bf16.msra.mxu1 %v4243_v17  ;;  %4114 = vmatprep.mubr.msk.bf16.mxu1 %vm4323_vm1, %v4322_v2 }
0x16b7   : > { %4112 = vmatprep.subr.bf16.mxu1 %v4322_v2 }
0x16ba   : > { %4113 = vmatpush3.bf16.msra.mxu1 %v4244_v63 }
0x16bb   : > { %4126 = vmatprep.subr.bf16.mxu1 %v4322_v2 }
0x16bd   : > { %4115 = vmatmul.mubr.msk.bf16.vlgmr.msra.gmra.mrb[64].mxu1 %vm854_vm5, %v4810_v59 }
0x16be   : > { %4128 = vmatprep.mubr.msk.bf16.mxu1 %vm4323_vm1, %v4322_v2 }
0x1780   : > { %v2513_v19 = vpop.f32.mrb[56].mxu1 }
0x1781   : > { %v4088_v20 = vpop.f32.mrb[57].mxu1  ;;  %v2522_v58 = vpack.c.bf16 %v2513_v19, %v2513_v19 }
0x1782   : > { %v2516_v21 = vpop.f32.mrb[58].mxu1 }
0x1783   : > { %v4089_v22 = vpop.f32.mrb[59].mxu1 }
0x1788   : > { %v4921_v23 = vpop.f32.mrb[60].mxu1 }
0x1789   : > { %v4100_v57 = vpop.f32.mrb[61].mxu1 }
0x178a   : > { %v2629_v61 = vpop.f32.mrb[62].mxu1 }
0x178b   : > { %v4101_v24 = vpop.f32.mrb[63].mxu1 }
0x1790   : > { %v2758_v26 = vpop.f32.mrb[64].mxu1 }
0x1791   : > { %v2759_v27 = vadd.f32 %v3727_v25, %v2758_v26  ;;  %v4116_v28 = vpop.f32.mrb[65].mxu1 }
0x1792   : > { %v2761_v59 = vpop.f32.mrb[66].mxu1 }
0x1793   : > { %v2832_v29 = vpack.c.bf16 %v2759_v27, %v2759_v27  ;;  %v2762_v30 = vadd.f32 %v3727_v25, %v2761_v59  ;;  %v4117_v31 = vpop.f32.mrb[67].mxu1 }
0x1795   : > { %v2837_v32 = vsel %vm1100_vm6, %v2832_v29, 0  ;;  %v3043_v62 = vpack.c.bf16 %v2762_v30, %v2762_v30 }
0x1796   : > { %4127 = vmatpush3.bf16.xpose.msra.mxu1 %v2837_v32 }
0x1797   : > { %4138 = vmatprep.subr.bf16.mxu1 %v4322_v2  ;;  %v3048_v6 = vsel %vm1100_vm6, %v3043_v62, 0 }
0x179d   : > { %4129 = vmatmul.mubr.msk.bf16.vlgmr.msra.gmra.mrb[68].mxu1 %vm1100_vm6, %v2831_v33 }
0x179e   : > { %4140 = vmatprep.mubr.msk.bf16.mxu1 %vm4323_vm1, %v4322_v2  ;;  %4139 = vmatpush3.bf16.msra.mxu1 %v4246_v50 }
0x179f   : > { %4150 = vmatprep.subr.bf16.mxu1 %v4322_v2 }
0x1870   : > { %v2873_v34 = vpop.f32.mrb[68].mxu1 }
0x1871   : > { %v2879_v36 = vmul.f32 0.25, %v2873_v34  ;;  %v4130_v37 = vpop.f32.mrb[69].mxu1 }
0x1872   : > { %v2876_v40 = vpop.f32.mrb[70].mxu1  ;;  %v2632_v37 = vpack.c.bf16 %v4921_v23, %v4921_v23 }
0x1873   : > { %v4131_v42 = vpop.f32.mrb[71].mxu1  ;;  %v2880_v44 = vadd.f32 %v2879_v36, %v4588_v35 }
0x1875   : > { %v2881_v45 = vsel %vm1153_vm8, %v2880_v44, -inf }
0x1876   : > { %2882 = vmax.xlane.f32.xlu1 %v2881_v45 }
0x1903   : > { %v2883_v12 = vpop.xlane.xlu1 %2882 }
0x1904   : > { %v2884_v38 = vsub.f32 %v2880_v44, %v2883_v12 }
0x1906   : > { %v2885_v41 = vmul.f32 1.442695, %v2884_v38 }
0x1908   : > { %4293 = vpow2.f32 %v2885_v41 }
0x1912   : > { %v4294_v46 = vpop.eup %4293 }
0x1913   : > { %v2887_v49 = vsel %vm1153_vm8, %v4294_v46, 0.0 }
0x1914   : > { %2888 = vadd.xlane.f32.xlu0 %v2887_v49 }
0x19a1   : > { %v2889_v51 = vpop.xlane.xlu0 %2888 }
0x19a2   : > { %4295 = vrcp.f32 %v2889_v51 }
0x19ac   : > { %v4296_v35 = vpop.eup %4295 }
0x19ad   : > { %v2891_v56 = vmul.f32 %v4296_v35, %v4294_v46 }
0x19af   : > { %v2892_v54 = vpack.c.bf16 %v2891_v56, %v2891_v56 }
0x19b1   : > { %4135 = vmatmul.mubr.msk.bf16.vlgmr.msra.gmra.mrb[56].mxu0 %vm1153_vm8, %v2892_v54 }
0x19b2   : > { %4145 = vmatpush3.bf16.msra.mxu0 %v4943_v53  ;;  %4146 = vmatprep.mubr.msk.bf16.mxu0 %vm4323_vm1, %v4322_v2 }
0x19b3   : > { %4156 = vmatprep.subr.bf16.mxu0 %v4322_v2 }
0x19b9   : > { %4147 = vmatmul.mubr.msk.bf16.vlgmr.msra.gmra.mrb[60].mxu0 %vm1100_vm6, %v2522_v58 }
0x19ba   : > { %4157 = vmatpush3.bf16.msra.mxu0 %v3109_v60  ;;  %4158 = vmatprep.mubr.msk.bf16.mxu0 %vm4323_vm1, %v4322_v2 }
0x19bb   : > { %4168 = vmatprep.subr.bf16.mxu0 %v4322_v2 }
0x1a84   : > { %v2934_v0 = vpop.f32.mrb[56].mxu0 }
0x1a85   : > { %v2943_v1 = vpack.c.bf16 %v2934_v0, %v2934_v0  ;;  %v4136_v4 = vpop.f32.mrb[57].mxu0 }
0x1a86   : > { %v2937_v5 = vpop.f32.mrb[58].mxu0  ;;  %v4247_v4 = vld [vmem:[%s5064_s17 + $0x10] sm:$0xff]  }
0x1a87   : > { %v4137_v7 = vpop.f32.mrb[59].mxu0  ;;  %4141 = vmatmul.mubr.msk.bf16.vlgmr.msra.gmra.mrb[72].mxu1 %vm1100_vm6, %v2943_v1  ;;  %v4248_v5 = vld [vmem:[%s5064_s17 + $0x18] sm:$0xff]  }
0x1a88   : > { %4151 = vmatpush3.bf16.xpose.msra.mxu1 %v3048_v6  ;;  %4152 = vmatprep.mubr.msk.bf16.mxu1 %vm4323_vm1, %v4322_v2 }
0x1a89   : > { %4162 = vmatprep.subr.bf16.mxu1 %v4322_v2 }
0x1a8c   : > { %v3036_v52 = vpop.f32.mrb[60].mxu0 }
0x1a8d   : > { %v4148_v8 = vpop.f32.mrb[61].mxu0 }
0x1a8e   : > { %v3039_v9 = vpop.f32.mrb[62].mxu0 }
0x1a8f   : > { %v4149_v10 = vpop.f32.mrb[63].mxu0  ;;  %4153 = vmatmul.mubr.msk.bf16.vlgmr.msra.gmra.mrb[76].mxu1 %vm1100_vm6, %v3042_v39 }
0x1a90   : > { %4163 = vmatpush3.bf16.msra.mxu1 %v4246_v50  ;;  %4164 = vmatprep.mubr.msk.bf16.mxu1 %vm4323_vm1, %v4322_v2 }
0x1a91   : > { %4174 = vmatprep.subr.bf16.mxu1 %v4322_v2 }
0x1b5a   : > { %v2987_v11 = vpop.f32.mrb[72].mxu1 }
0x1b5b   : > { %v3037_v13 = vadd.f32 %v3036_v52, %v2987_v11  ;;  %v4142_v14 = vpop.f32.mrb[73].mxu1  ;;  %v3756_v11 = vld [vmem:[%s5062_s15 + $0x1] ss:$0 sm:$0xff] }
0x1b5c   : > { %v2990_v15 = vpop.f32.mrb[74].mxu1 }
0x1b5d   : > { %v4143_v17 = vpop.f32.mrb[75].mxu1  ;;  %v3246_v63 = vadd.f32 %v3753_v43, %v3037_v13 }
0x1b5e   : > { %v3757_v17 = vld [vmem:[%s5063_s16 + $0x1] ss:$0 sm:$0xff] }
0x1b5f   : > { %v3248_v24 = vadd.f32 %v3246_v63, %v4801_v47 }
0x1b61   : > { %v3254_v25 = vsel %vm854_vm5, %v3248_v24, 0.0 }
0x1b62   : > { %v3084_v18 = vpop.f32.mrb[76].mxu1 }
0x1b63   : > { %v3090_v19 = vmul.f32 0.25, %v3084_v18  ;;  %v4154_v20 = vpop.f32.mrb[77].mxu1 }
0x1b64   : > { %v3087_v21 = vpop.f32.mrb[78].mxu1  ;;  %v4249_v20 = vld [vmem:[%s5066_s19 + $0x20] sm:$0xff]  }
0x1b65   : > { %v4155_v22 = vpop.f32.mrb[79].mxu1  ;;  %v3091_v57 = vadd.f32 %v3090_v19, %v4629_v3  ;;  %v4250_v21 = vld [vmem:[%s5066_s19 + $0x28] sm:$0xff]  }
0x1b66   : > { %v4251_v22 = vld [vmem:[%s5066_s19 + $0x30] sm:$0xff]  }
0x1b67   : > { %v3092_v61 = vsel %vm1153_vm8, %v3091_v57, -inf }
0x1b68   : > { %3093 = vmax.xlane.f32.xlu1 %v3092_v61  ;;  %v3763_v61 = vld [vmem:[%s5065_s18 + $0x1] ss:$0 sm:$0xff] }
0x1b6c   : > { %3255 = vadd.xlane.f32.xlu1 %v3254_v25 }
0x1bf5   : > { %v3094_v26 = vpop.xlane.xlu1 %3093 }
0x1bf6   : > { %v3095_v27 = vsub.f32 %v3091_v57, %v3094_v26  ;;  %v4252_v57 = vld [vmem:[%s5066_s19 + $0x38] sm:$0xff]  }
0x1bf8   : > { %v3096_v28 = vmul.f32 1.442695, %v3095_v27 }
0x1bf9   : > { %v3256_v59 = vpop.xlane.xlu1 %3255 }
0x1bfa   : > { %4297 = vpow2.f32 %v3096_v28  ;;  %v3260_v29 = vmul.f32 0.03125, %v3256_v59 }
0x1bfc   : > { %v3262_v30 = vsub.f32 %v3248_v24, %v3260_v29 }
0x1bfe   : > { %v3264_v31 = vmul.f32 %v3262_v30, %v3262_v30 }
0x1c00   : > { %v3266_v32 = vsel %vm854_vm5, %v3264_v31, 0.0 }
0x1c01   : > { %3267 = vadd.xlane.f32.xlu1 %v3266_v32 }
0x1c04   : > { %v4298_v3 = vpop.eup %4297 }
0x1c05   : > { %v3098_v16 = vsel %vm1153_vm8, %v4298_v3, 0.0 }
0x1c06   : > { %3099 = vadd.xlane.f32.xlu0 %v3098_v16 }
0x1c93   : > { %v3100_v47 = vpop.xlane.xlu0 %3099 }
0x1c94   : > { %4299 = vrcp.f32 %v3100_v47 }
0x1c9e   : > { %v4300_v33 = vpop.eup %4299 }
0x1c9f   : > { %v3102_v34 = vmul.f32 %v4300_v33, %v4298_v3 }
0x1ca1   : > { %v3103_v36 = vpack.c.bf16 %v3102_v34, %v3102_v34 }
0x1ca3   : > { %4159 = vmatmul.mubr.msk.bf16.vlgmr.msra.gmra.mrb[64].mxu0 %vm1153_vm8, %v3103_v36 }
0x1ca4   : > { %4169 = vmatpush3.bf16.msra.mxu0 %v4943_v53  ;;  %4170 = vmatprep.mubr.msk.bf16.mxu0 %vm4323_vm1, %v4322_v2 }
0x1ca5   : > { %4182 = vmatprep.subr.bf16.mxu0 %v4322_v2 }
0x1cab   : > { %4171 = vmatmul.mubr.msk.bf16.vlgmr.msra.gmra.mrb[68].mxu0 %vm1100_vm6, %v2632_v37 }
0x1cac   : > { %4190 = vmatprep.mubr.msk.bf16.mxu0 %vm4323_vm1, %v4322_v2  ;;  %4183 = vmatpush3.bf16.msra.mxu0 %v4249_v20  ;;  %v3785_v20 = vld [vmem:[%s5069_s22 + $0x1] ss:$0 sm:$0xff] }
0x1cad   : > { %4184 = vmatprep.subr.bf16.mxu0 %v4322_v2 }
0x1cb0   : > { %4185 = vmatpush3.bf16.msra.mxu0 %v4250_v21 }
0x1cb1   : > { %4186 = vmatprep.subr.bf16.mxu0 %v4322_v2 }
0x1cb4   : > { %4187 = vmatpush3.bf16.msra.mxu0 %v4251_v22 }
0x1cb5   : > { %4188 = vmatprep.subr.bf16.mxu0 %v4322_v2 }
0x1cb8   : > { %4189 = vmatpush3.bf16.msra.mxu0 %v4252_v57 }
0x1d76   : > { %v3145_v40 = vpop.f32.mrb[64].mxu0 }
0x1d77   : > { %v3151_v42 = vpack.c.bf16 %v3145_v40, %v3145_v40  ;;  %v4160_v44 = vpop.f32.mrb[65].mxu0 }
0x1d78   : > { %v3148_v45 = vpop.f32.mrb[66].mxu0 }
0x1d79   : > { %v4161_v12 = vpop.f32.mrb[67].mxu0  ;;  %4165 = vmatmul.mubr.msk.bf16.vlgmr.msra.gmra.mrb[80].mxu1 %vm1100_vm6, %v3151_v42 }
0x1d7a   : > { %4178 = vmatprep.mubr.msk.bf16.mxu1 %vm4323_vm1, %v4322_v2  ;;  %4175 = vmatpush3.bf16.msra.mxu1 %v4247_v4 }
0x1d7b   : > { %4176 = vmatprep.subr.bf16.mxu1 %v4322_v2 }
0x1d7e   : > { %v3232_v38 = vpop.f32.mrb[68].mxu0  ;;  %4177 = vmatpush3.bf16.msra.mxu1 %v4248_v5 }
0x1d7f   : > { %v4172_v41 = vpop.f32.mrb[69].mxu0 }
0x1d80   : > { %v3235_v46 = vpop.f32.mrb[70].mxu0 }
0x1d81   : > { %v4173_v49 = vpop.f32.mrb[71].mxu0  ;;  %v3776_v46 = vld [vmem:[%s5067_s20 + $0x1] ss:$0 sm:$0xff] }
0x1e4c   : > { %v3189_v23 = vpop.f32.mrb[80].mxu1 }
0x1e4d   : > { %v3233_v50 = vadd.f32 %v3232_v38, %v3189_v23  ;;  %v4166_v51 = vpop.f32.mrb[81].mxu1 }
0x1e4e   : > { %v3192_v35 = vpop.f32.mrb[82].mxu1 }
0x1e4f   : > { %v3247_v56 = vadd.f32 %v3753_v43, %v3233_v50  ;;  %v4167_v53 = vpop.f32.mrb[83].mxu1 }
0x1e51   : > { %v3249_v54 = vadd.f32 %v3247_v56, %v4803_v48  ;;  %v3268_v48 = vpop.xlane.xlu1 %3267 }
0x1e52   : > { %v3272_v6 = vmul.f32 0.03125, %v3268_v48 }
0x1e53   : > { %v3257_v55 = vsel %vm854_vm5, %v3249_v54, 0.0 }
0x1e54   : > { %3258 = vadd.xlane.f32.xlu0 %v3257_v55  ;;  %v3274_v7 = vadd.f32 1e-12, %v3272_v6 }
0x1e56   : > { %4301 = vrsqrt.f32 %v3274_v7 }
0x1e60   : > { %v4302_v9 = vpop.eup %4301 }
0x1e61   : > { %v3278_v10 = vmul.f32 %v4302_v9, %v3262_v30 }
0x1e63   : > { %v3286_v14 = vmul.f32 %v3756_v11, %v3278_v10 }
0x1e65   : > { %v3294_v18 = vadd.f32 %v3757_v17, %v3286_v14 }
0x1ee1   : > { %v3259_v58 = vpop.xlane.xlu0 %3258 }
0x1ee2   : > { %v3261_v60 = vmul.f32 0.03125, %v3259_v58 }
0x1ee4   : > { %v3263_v62 = vsub.f32 %v3249_v54, %v3261_v60 }
0x1ee6   : > { %v3265_v0 = vmul.f32 %v3263_v62, %v3263_v62 }
0x1ee8   : > { %v3269_v1 = vsel %vm854_vm5, %v3265_v0, 0.0 }
0x1ee9   : > { %3270 = vadd.xlane.f32.xlu0 %v3269_v1 }
0x1f76   : > { %v3271_v52 = vpop.xlane.xlu0 %3270 }
0x1f77   : > { %v3273_v39 = vmul.f32 0.03125, %v3271_v52 }
0x1f79   : > { %v3275_v8 = vadd.f32 1e-12, %v3273_v39 }
0x1f7b   : > { %4303 = vrsqrt.f32 %v3275_v8 }
0x1f85   : > { %v4304_v13 = vpop.eup %4303 }
0x1f86   : > { %v3279_v15 = vmul.f32 %v4304_v13, %v3263_v62 }
0x1f88   : > { %v3287_v43 = vmul.f32 %v3756_v11, %v3279_v15 }
0x1f8a   : > { %v3295_v63 = vadd.f32 %v3757_v17, %v3287_v43  ;;  %v3784_v43 = vld [vmem:[%s5068_s21 + $0x1] ss:$0 sm:$0xff] }
0x1f8c   : > { %v3301_v19 = vpack.c.bf16 %v3295_v63, %v3294_v18 }
0x1f8e   : > { %4179 = vmatmul.mubr.msk.bf16.vlgmr.msra.gmra.mrb[84].mxu1 %vm854_vm5, %v3301_v19 }
0x2061   : > { %v3359_v24 = vpop.f32.mrb[84].mxu1 }
0x2062   : > { %v3360_v25 = vadd.f32 %v3763_v61, %v3359_v24  ;;  %v4180_v26 = vpop.f32.mrb[85].mxu1 }
0x2063   : > { %v3362_v27 = vpop.f32.mrb[86].mxu1 }
0x2064   : > { %v3366_v28 = vmul.f32 %v3360_v25, %v3360_v25  ;;  %v3363_v59 = vadd.f32 %v3763_v61, %v3362_v27  ;;  %v4181_v29 = vpop.f32.mrb[87].mxu1 }
0x2066   : > { %v3368_v30 = vmul.f32 %v3366_v28, %v3360_v25  ;;  %v3367_v31 = vmul.f32 %v3363_v59, %v3363_v59 }
0x2068   : > { %v3370_v32 = vmul.f32 0.044715, %v3368_v30  ;;  %v3369_v2 = vmul.f32 %v3367_v31, %v3363_v59 }
0x206a   : > { %v3372_v3 = vadd.f32 %v3370_v32, %v3360_v25  ;;  %v3371_v16 = vmul.f32 0.044715, %v3369_v2 }
0x206c   : > { %v3374_v47 = vmul.f32 0.7978846, %v3372_v3  ;;  %v3373_v33 = vadd.f32 %v3371_v16, %v3363_v59 }
0x206e   : > { %4305 = vtanh.f32 %v3374_v47  ;;  %v3375_v34 = vmul.f32 0.7978846, %v3373_v33 }
0x2070   : > { %4307 = vtanh.f32 %v3375_v34 }
0x2078   : > { %v4306_v36 = vpop.eup %4305 }
0x2079   : > { %v3378_v37 = vadd.f32 1.0, %v4306_v36 }
0x207a   : > { %v4308_v40 = vpop.eup %4307 }
0x207b   : > { %v3380_v42 = vmul.f32 0.5, %v3378_v37  ;;  %v3379_v44 = vadd.f32 1.0, %v4308_v40 }
0x207d   : > { %v3381_v45 = vmul.f32 0.5, %v3379_v44  ;;  %v3382_v12 = vmul.f32 %v3380_v42, %v3360_v25 }
0x207f   : > { %v3383_v38 = vmul.f32 %v3381_v45, %v3363_v59 }
0x2081   : > { %v3393_v41 = vpack.c.bf16 %v3383_v38, %v3382_v12 }
0x2083   : > { %4191 = vmatmul.mubr.msk.bf16.vlgmr.msra.gmra.mrb[72].mxu0 %vm2117_vm9, %v3393_v41 }
0x2156   : > { %v3463_v49 = vpop.f32.mrb[72].mxu0 }
0x2157   : > { %v3464_v23 = vadd.f32 %v3776_v46, %v3463_v49  ;;  %v4192_v50 = vpop.f32.mrb[73].mxu0 }
0x2158   : > { %v3466_v51 = vpop.f32.mrb[74].mxu0 }
0x2159   : > { %v3467_v35 = vadd.f32 %v3776_v46, %v3466_v51  ;;  %v4193_v56 = vpop.f32.mrb[75].mxu0  ;;  %v3470_v53 = vadd.f32 %v3464_v23, %v3294_v18 }
0x215b   : > { %v3476_v54 = vsel %vm854_vm5, %v3470_v53, 0.0  ;;  %v3471_v55 = vadd.f32 %v3467_v35, %v3295_v63 }
0x215c   : > { %3477 = vadd.xlane.f32.xlu0 %v3476_v54 }
0x215d   : > { %v3479_v58 = vsel %vm854_vm5, %v3471_v55, 0.0 }
0x215e   : > { %3480 = vadd.xlane.f32.xlu1 %v3479_v58 }
0x21e9   : > { %v3478_v60 = vpop.xlane.xlu0 %3477 }
0x21ea   : > { %v3482_v62 = vmul.f32 0.03125, %v3478_v60 }
0x21eb   : > { %v3481_v0 = vpop.xlane.xlu1 %3480 }
0x21ec   : > { %v3484_v1 = vsub.f32 %v3470_v53, %v3482_v62  ;;  %v3483_v4 = vmul.f32 0.03125, %v3481_v0 }
0x21ee   : > { %v3485_v5 = vsub.f32 %v3471_v55, %v3483_v4  ;;  %v3486_v48 = vmul.f32 %v3484_v1, %v3484_v1 }
0x21f0   : > { %v3488_v6 = vsel %vm854_vm5, %v3486_v48, 0.0  ;;  %v3487_v7 = vmul.f32 %v3485_v5, %v3485_v5 }
0x21f1   : > { %3489 = vadd.xlane.f32.xlu0 %v3488_v6 }
0x21f2   : > { %v3491_v52 = vsel %vm854_vm5, %v3487_v7, 0.0 }
0x21f3   : > { %3492 = vadd.xlane.f32.xlu1 %v3491_v52 }
0x227e   : > { %v3490_v39 = vpop.xlane.xlu0 %3489 }
0x227f   : > { %v3494_v8 = vmul.f32 0.03125, %v3490_v39 }
0x2280   : > { %v3493_v9 = vpop.xlane.xlu1 %3492 }
0x2281   : > { %v3496_v10 = vadd.f32 1e-12, %v3494_v8  ;;  %v3495_v11 = vmul.f32 0.03125, %v3493_v9 }
0x2283   : > { %4309 = vrsqrt.f32 %v3496_v10  ;;  %v3497_v13 = vadd.f32 1e-12, %v3495_v11 }
0x2285   : > { %4311 = vrsqrt.f32 %v3497_v13 }
0x228d   : > { %v4310_v14 = vpop.eup %4309 }
0x228e   : > { %v3500_v15 = vmul.f32 %v4310_v14, %v3484_v1 }
0x228f   : > { %v4312_v17 = vpop.eup %4311 }
0x2290   : > { %v3501_v18 = vmul.f32 %v4312_v17, %v3485_v5  ;;  %v3508_v63 = vmul.f32 %v3784_v43, %v3500_v15 }
0x2292   : > { %v3509_v19 = vmul.f32 %v3784_v43, %v3501_v18  ;;  %v3516_v22 = vadd.f32 %v3785_v20, %v3508_v63 }
0x2294   : > { %v3517_v21 = vadd.f32 %v3785_v20, %v3509_v19 }
0x2296   : > { %v3519_v57 = vrot.slane %v3517_v21, 7 }
0x2298   : > { %v3522_v61 = vsel %vm3521_vm10, %v3516_v22, %v3519_v57 }
0x2299   : > { %3524 = vst.msk [vmem:[%s727_s27] sm:$0x3] %vm3523_vm11, %v3522_v61 }
0x229a PF: > { %s33_s4 = sadd.s32 1, %s4319_s4  }
0x229b   : > { %p30_p5 = scmp.ge.s32.totalorder %s33_s4, 4  }
0x229d   :  { %32 = sbr.rel (!%p30_p5) target bundleno = 9 (0x9), region = 175 }

</bundles_post_ra>
